<compile_context>
chip_gen: v5e
topology: v5e:2x2
jax: 0.10.0
libtpu: 0.0.40
codegen_flags: <defaults>
</compile_context>

<pallas_src>
import jax
import jax.numpy as jnp
from jax import lax
from jax.experimental import pallas as pl
from jax.experimental.pallas import tpu as pltpu


def _round_up(x, m):
    return (x + m - 1) // m * m


# ----------------------------------------------------------------------------
# Kernel 1: layer-major 3-layer LSTM (emits top-layer h per step, final h/c).
# ----------------------------------------------------------------------------
def _lstm_kernel(embeds_ref, h0_ref, c0_ref,
                 wih0_ref, whh0_ref, b0_ref,
                 wih1_ref, whh1_ref, b1_ref,
                 wih2_ref, whh2_ref, b2_ref,
                 top_ref, hn_ref, cn_ref,
                 xproj_sc, seq_sc):
    SB = top_ref.shape[0]                      # S * Bp (flattened time x batch)
    Bp = h0_ref.shape[1]
    H = h0_ref.shape[2]
    S = SB // Bp

    wih = (wih0_ref, wih1_ref, wih2_ref)
    whh = (whh0_ref, whh1_ref, whh2_ref)
    bias = (b0_ref, b1_ref, b2_ref)

    for l in range(3):
        # (1) Whole-sequence input projection: one big bf16 MXU matmul with the
        #     bias folded in -- off the serial critical path.
        x_seq = embeds_ref[...] if l == 0 else seq_sc[...]          # bf16
        xproj_sc[...] = (jnp.dot(x_seq, wih[l][...],
                                 preferred_element_type=jnp.float32)
                         + bias[l][...])

        # (2) Serial recurrence: only h_prev @ W_hh + gate nonlinearities.
        w_hh = whh[l][...]                       # (H, 4H) bf16, hoisted
        dst = seq_sc if l < 2 else top_ref       # next layer's input / output

        def step(t, carry):
            h_prev, c_prev = carry               # f32 state
            row = pl.multiple_of(t * Bp, Bp)
            gates = xproj_sc[pl.ds(row, Bp), :] + jnp.dot(
                h_prev.astype(jnp.bfloat16), w_hh,
                preferred_element_type=jnp.float32)
            # gate axis pre-reordered to (i, f, o, g): one sigmoid slab + tanh.
            sig = jax.nn.sigmoid(gates[:, :3 * H])
            g_g = jnp.tanh(gates[:, 3 * H:])
            i_g = sig[:, 0 * H:1 * H]
            f_g = sig[:, 1 * H:2 * H]
            o_g = sig[:, 2 * H:3 * H]
            c_new = f_g * c_prev + i_g * g_g
            h_new = o_g * jnp.tanh(c_new)
            dst[pl.ds(row, Bp), :] = h_new.astype(jnp.bfloat16)
            return h_new, c_new

        h_fin, c_fin = lax.fori_loop(0, S, step, (h0_ref[l], c0_ref[l]),
                                     unroll=min(S, 8))   # capped unroll
        hn_ref[l] = h_fin
        cn_ref[l] = c_fin


# ----------------------------------------------------------------------------
# Kernel 2: MLP head over the flattened (S*B, H) activations, gridded over
# (row tiles, vocab tiles).  a2 cached in bf16 scratch across the vocab axis.
# ----------------------------------------------------------------------------
def _fc_head_kernel(x_ref, fw1_ref, fb1_ref, fw2_ref, fb2_ref, fw3_ref, fb3_ref,
                    out_ref, a2_sc):
    j = pl.program_id(1)

    @pl.when(j == 0)
    def _():
        a1 = jnp.maximum(
            jnp.dot(x_ref[...], fw1_ref[...],
                    preferred_element_type=jnp.float32) + fb1_ref[...], 0.0)
        a2 = jnp.maximum(
            jnp.dot(a1.astype(jnp.bfloat16), fw2_ref[...],
                    preferred_element_type=jnp.float32) + fb2_ref[...], 0.0)
        a2_sc[...] = a2.astype(jnp.bfloat16)

    out_ref[...] = (jnp.dot(a2_sc[...], fw3_ref[...],
                            preferred_element_type=jnp.float32) + fb3_ref[...])


# ----------------------------------------------------------------------------
# Parameter handling
# ----------------------------------------------------------------------------
def init_torch_params(key, vocab_size, embedding_dim, hidden_dim):
    """Synthetic params in PyTorch convention (shapes/init ranges of the module)."""
    H = hidden_dim
    ks = jax.random.split(key, 24)

    def u(k, shape, fan_in):
        s = float(fan_in) ** -0.5
        return jax.random.uniform(k, shape, jnp.float32, -s, s)

    p = {'emb': jax.random.normal(ks[0], (vocab_size, embedding_dim), jnp.float32)}
    idx = 1
    for l in range(3):
        in_dim = embedding_dim if l == 0 else H
        p[f'w_ih{l}'] = u(ks[idx], (4 * H, in_dim), H); idx += 1
        p[f'w_hh{l}'] = u(ks[idx], (4 * H, H), H); idx += 1
        p[f'b_ih{l}'] = u(ks[idx], (4 * H,), H); idx += 1
        p[f'b_hh{l}'] = u(ks[idx], (4 * H,), H); idx += 1
    p['fc1_w'] = u(ks[13], (512, H), H)
    p['fc1_b'] = u(ks[14], (512,), H)
    p['fc2_w'] = u(ks[15], (2048, 512), 512)
    p['fc2_b'] = u(ks[16], (2048,), 512)
    p['fc3_w'] = u(ks[17], (vocab_size, 2048), 2048)
    p['fc3_b'] = u(ks[18], (vocab_size,), 2048)
    return p


def _reorder_gates_ifog(w_4h, H):
    """Reorder the fused gate axis from PyTorch (i,f,g,o) to (i,f,o,g)."""
    i = w_4h[..., 0 * H:1 * H]
    f = w_4h[..., 1 * H:2 * H]
    g = w_4h[..., 2 * H:3 * H]
    o = w_4h[..., 3 * H:4 * H]
    return jnp.concatenate([i, f, o, g], axis=-1)


def prepare_kernel_params(tp):
    """Convert PyTorch-convention params to the kernel layout (done once)."""
    H = tp['w_hh0'].shape[1]
    V, E = tp['emb'].shape
    kp = {'emb': tp['emb'].astype(jnp.float32),
          'hidden_dim': H, 'embedding_dim': E, 'vocab_size': V}
    for l in range(3):
        w_ih = _reorder_gates_ifog(tp[f'w_ih{l}'].T, H)          # (in, 4H)
        w_hh = _reorder_gates_ifog(tp[f'w_hh{l}'].T, H)          # (H, 4H)
        b = _reorder_gates_ifog(
            (tp[f'b_ih{l}'] + tp[f'b_hh{l}']).reshape(1, 4 * H), H)
        kp[f'wih{l}'] = w_ih.astype(jnp.bfloat16)                # bf16 weights
        kp[f'whh{l}'] = w_hh.astype(jnp.bfloat16)
        kp[f'b{l}'] = b.astype(jnp.float32)                      # f32 bias
    # FC head: bf16 weights (f32 accumulate in-kernel), vocab padded to x128.
    Vp = _round_up(V, 128)
    fw3 = tp['fc3_w'].T.astype(jnp.bfloat16)                     # (2048, V)
    fb3 = tp['fc3_b'].reshape(1, V).astype(jnp.float32)
    if Vp != V:
        fw3 = jnp.pad(fw3, ((0, 0), (0, Vp - V)))
        fb3 = jnp.pad(fb3, ((0, 0), (0, Vp - V)))
    kp['fw1'] = tp['fc1_w'].T.astype(jnp.bfloat16)               # (H, 512)
    kp['fb1'] = tp['fc1_b'].reshape(1, -1).astype(jnp.float32)
    kp['fw2'] = tp['fc2_w'].T.astype(jnp.bfloat16)               # (512, 2048)
    kp['fb2'] = tp['fc2_b'].reshape(1, -1).astype(jnp.float32)
    kp['fw3'] = fw3
    kp['fb3'] = fb3
    return kp


# ----------------------------------------------------------------------------
# Forward
# ----------------------------------------------------------------------------
def poetry_forward(kp, input_ids, hidden=None):
    """input_ids: (seq_len, batch) int32.  Returns (logits (S*B, V), (h_n, c_n))."""
    S, B = input_ids.shape
    H = kp['hidden_dim']
    E = kp['embedding_dim']
    V = kp['vocab_size']
    Vp = kp['fw3'].shape[1]
    Bp = _round_up(B, 16)        # 16-sublane alignment (bf16 per-step stores)

    # TODO(synk): embedding gather stays in plain JAX (data-dependent row gather).
    embeds = jnp.take(kp['emb'], input_ids, axis=0)              # (S, B, E) f32
    if Bp != B:
        embeds = jnp.pad(embeds, ((0, 0), (0, Bp - B), (0, 0)))
    embeds = embeds.reshape(S * Bp, E).astype(jnp.bfloat16)      # flattened, bf16

    if hidden is None:
        h0 = jnp.zeros((3, Bp, H), jnp.float32)
        c0 = jnp.zeros((3, Bp, H), jnp.float32)
    else:
        h0, c0 = hidden
        if Bp != B:
            h0 = jnp.pad(h0, ((0, 0), (0, Bp - B), (0, 0)))
            c0 = jnp.pad(c0, ((0, 0), (0, Bp - B), (0, 0)))

    vmem = pl.BlockSpec(memory_space=pltpu.MemorySpace.VMEM)
    lstm_inputs = (embeds, h0, c0,
                   kp['wih0'], kp['whh0'], kp['b0'],
                   kp['wih1'], kp['whh1'], kp['b1'],
                   kp['wih2'], kp['whh2'], kp['b2'])
    top, hn, cn = pl.pallas_call(
        _lstm_kernel,
        out_shape=(jax.ShapeDtypeStruct((S * Bp, H), jnp.bfloat16),   # top-layer h
                   jax.ShapeDtypeStruct((3, Bp, H), jnp.float32),
                   jax.ShapeDtypeStruct((3, Bp, H), jnp.float32)),
        in_specs=[vmem] * len(lstm_inputs),
        out_specs=(vmem, vmem, vmem),
        scratch_shapes=[pltpu.VMEM((S * Bp, 4 * H), jnp.float32),     # xproj
                        pltpu.VMEM((S * Bp, H), jnp.bfloat16)],       # layer seq
        compiler_params=pltpu.CompilerParams(
            vmem_limit_bytes=48 * 1024 * 1024),    # <= v7x 64 MiB physical VMEM
    )(*lstm_inputs)

    # FC head on flattened (S*B, H) activations (output.view(S*B, -1) equivalent).
    feats = top.reshape(S, Bp, H)[:, :B, :].reshape(S * B, H)     # drop batch pad
    rows = S * B
    if rows >= 512:
        TM = 512                 # amortize fw3 streaming; fills 256-wide MXU
    elif rows >= 256:
        TM = 256
    elif rows >= 128:
        TM = 128
    else:
        TM = _round_up(rows, 16)
    rows_p = _round_up(rows, TM)
    if rows_p != rows:
        feats = jnp.pad(feats, ((0, rows_p - rows), (0, 0)))
    TN = next(t for t in (512, 256, 128) if Vp % t == 0)

    D1 = kp['fw1'].shape[1]
    D2 = kp['fw2'].shape[1]

    logits_p = pl.pallas_call(
        _fc_head_kernel,
        out_shape=jax.ShapeDtypeStruct((rows_p, Vp), jnp.float32),
        grid=(rows_p // TM, Vp // TN),
        in_specs=[
            pl.BlockSpec((TM, H), lambda i, j: (i, 0)),      # activations (bf16)
            pl.BlockSpec((H, D1), lambda i, j: (0, 0)),      # fw1 (resident)
            pl.BlockSpec((1, D1), lambda i, j: (0, 0)),      # fb1
            pl.BlockSpec((D1, D2), lambda i, j: (0, 0)),     # fw2 (resident)
            pl.BlockSpec((1, D2), lambda i, j: (0, 0)),      # fb2
            pl.BlockSpec((D2, TN), lambda i, j: (0, j)),     # fw3 streamed by vocab tile
            pl.BlockSpec((1, TN), lambda i, j: (0, j)),      # fb3
        ],
        out_specs=pl.BlockSpec((TM, TN), lambda i, j: (i, j)),
        scratch_shapes=[pltpu.VMEM((TM, D2), jnp.bfloat16)],  # a2 cache (bf16)
        compiler_params=pltpu.CompilerParams(
            dimension_semantics=("parallel", "arbitrary")),
    )(feats, kp['fw1'], kp['fb1'], kp['fw2'], kp['fb2'], kp['fw3'], kp['fb3'])

    logits = logits_p[:rows, :V]
    return logits, (hn[:, :B, :], cn[:, :B, :])


# ----------------------------------------------------------------------------
# Pure-JAX reference (PyTorch semantics; matmuls use the same bf16-operand /
# f32-accumulate recipe as the kernel so tolerances stay tight).
# ----------------------------------------------------------------------------
def poetry_forward_ref(tp, input_ids, hidden=None):
    S, B = input_ids.shape
    H = tp['w_hh0'].shape[1]

    def mm(a, w):   # a @ w.T with bf16 operands, f32 accumulation
        return jnp.dot(a.astype(jnp.bfloat16), w.T.astype(jnp.bfloat16),
                       preferred_element_type=jnp.float32)

    embeds = jnp.take(tp['emb'], input_ids, axis=0).astype(jnp.float32)
    if hidden is None:
        h = jnp.zeros((3, B, H), jnp.float32)
        c = jnp.zeros((3, B, H), jnp.float32)
    else:
        h, c = hidden
    outs = []
    for t in range(S):
        x = embeds[t]
        nh, nc = [], []
        for l in range(3):
            w_ih, w_hh = tp[f'w_ih{l}'], tp[f'w_hh{l}']
            b_ih, b_hh = tp[f'b_ih{l}'], tp[f'b_hh{l}']
            gates = mm(x, w_ih) + mm(h[l], w_hh) + b_ih + b_hh   # order i,f,g,o
            i_g = jax.nn.sigmoid(gates[:, 0 * H:1 * H])
            f_g = jax.nn.sigmoid(gates[:, 1 * H:2 * H])
            g_g = jnp.tanh(gates[:, 2 * H:3 * H])
            o_g = jax.nn.sigmoid(gates[:, 3 * H:4 * H])
            cc = f_g * c[l] + i_g * g_g
            hh = o_g * jnp.tanh(cc)
            nh.append(hh)
            nc.append(cc)
            x = hh
        h = jnp.stack(nh)
        c = jnp.stack(nc)
        outs.append(x)
    out = jnp.stack(outs).reshape(S * B, H)

    a1 = jnp.maximum(mm(out, tp['fc1_w']) + tp['fc1_b'], 0.0)
    a2 = jnp.maximum(mm(a1, tp['fc2_w']) + tp['fc2_b'], 0.0)
    logits = mm(a2, tp['fc3_w']) + tp['fc3_b']
    return logits, (h, c)


if __name__ == "__main__":
    # NOTE: real configs should use hidden_dim as a multiple of 128 so the gate
    # slices are lane-aligned; small demo shapes kept here for a quick check.
    vocab_size, embedding_dim, hidden_dim = 128, 32, 32
    seq_len, batch = 8, 4

    key = jax.random.PRNGKey(0)
    pkey, dkey = jax.random.split(key)
    tparams = init_torch_params(pkey, vocab_size, embedding_dim, hidden_dim)
    kparams = prepare_kernel_params(tparams)
    input_ids = jax.random.randint(dkey, (seq_len, batch), 0, vocab_size,
                                   dtype=jnp.int32)

    logits, (hn, cn) = poetry_forward(kparams, input_ids)
    jax.block_until_ready((logits, hn, cn))

    assert logits.shape == (seq_len * batch, vocab_size)
    assert hn.shape == (3, batch, hidden_dim) and cn.shape == (3, batch, hidden_dim)

    ref_logits, (ref_hn, ref_cn) = poetry_forward_ref(tparams, input_ids)
    assert jnp.allclose(logits, ref_logits, atol=5e-3, rtol=5e-3), \
        float(jnp.max(jnp.abs(logits - ref_logits)))
    assert jnp.allclose(hn, ref_hn, atol=2e-3, rtol=2e-3)
    assert jnp.allclose(cn, ref_cn, atol=2e-3, rtol=2e-3)

    print("KERNEL_OK")
</pallas_src>

<mosaic_0001>
module attributes {stable_mosaic.version = 11 : i64} {
  func.func @_lstm_kernel(%arg0: memref<128x32xbf16, #tpu.memory_space<vmem>>, %arg1: memref<3x16x32xf32, #tpu.memory_space<vmem>>, %arg2: memref<3x16x32xf32, #tpu.memory_space<vmem>>, %arg3: memref<32x128xbf16, #tpu.memory_space<vmem>>, %arg4: memref<32x128xbf16, #tpu.memory_space<vmem>>, %arg5: memref<1x128xf32, #tpu.memory_space<vmem>>, %arg6: memref<32x128xbf16, #tpu.memory_space<vmem>>, %arg7: memref<32x128xbf16, #tpu.memory_space<vmem>>, %arg8: memref<1x128xf32, #tpu.memory_space<vmem>>, %arg9: memref<32x128xbf16, #tpu.memory_space<vmem>>, %arg10: memref<32x128xbf16, #tpu.memory_space<vmem>>, %arg11: memref<1x128xf32, #tpu.memory_space<vmem>>, %arg12: memref<128x32xbf16, #tpu.memory_space<vmem>>, %arg13: memref<3x16x32xf32, #tpu.memory_space<vmem>>, %arg14: memref<3x16x32xf32, #tpu.memory_space<vmem>>, %arg15: memref<128x128xf32, #tpu.memory_space<vmem>>, %arg16: memref<128x32xbf16, #tpu.memory_space<vmem>>) attributes {dimension_semantics = [], scalar_prefetch = 0 : i64, scratch_operands = 2 : i64, tpu.core_type = #tpu.core_type<tc>} {
    %c0 = arith.constant 0 : index
    %c0_0 = arith.constant 0 : index
    %0 = vector.load %arg0[%c0, %c0_0] : memref<128x32xbf16, #tpu.memory_space<vmem>>, vector<128x32xbf16>
    %c0_1 = arith.constant 0 : index
    %c0_2 = arith.constant 0 : index
    %1 = vector.load %arg3[%c0_1, %c0_2] : memref<32x128xbf16, #tpu.memory_space<vmem>>, vector<32x128xbf16>
    %cst = arith.constant dense<0.000000e+00> : vector<128x128xf32>
    %2 = tpu.matmul %0, %1, %cst {dimension_numbers = #tpu.dot_dimension_numbers<[1], [0], [0], [1], [0, 0, 1, 1], [], []>} : vector<128x32xbf16>, vector<32x128xbf16>, vector<128x128xf32> -> vector<128x128xf32>
    %c0_3 = arith.constant 0 : index
    %c0_4 = arith.constant 0 : index
    %3 = vector.load %arg5[%c0_3, %c0_4] : memref<1x128xf32, #tpu.memory_space<vmem>>, vector<1x128xf32>
    %4 = vector.broadcast %3 : vector<1x128xf32> to vector<128x128xf32>
    %5 = arith.addf %2, %4 : vector<128x128xf32>
    %c0_5 = arith.constant 0 : index
    %c0_6 = arith.constant 0 : index
    %6 = vector.load %arg15[%c0_5, %c0_6] : memref<128x128xf32, #tpu.memory_space<vmem>>, vector<128x128xf32>
    tpu.vector_store %arg15[%c0_5, %c0_6], %5 {strides = array<i32>} : memref<128x128xf32, #tpu.memory_space<vmem>>, vector<128x128xf32>,
    %c0_7 = arith.constant 0 : index
    %c0_8 = arith.constant 0 : index
    %7 = vector.load %arg4[%c0_7, %c0_8] : memref<32x128xbf16, #tpu.memory_space<vmem>>, vector<32x128xbf16>
    %c0_9 = arith.constant 0 : index
    %c0_10 = arith.constant 0 : index
    %c0_11 = arith.constant 0 : index
    %8 = vector.load %arg1[%c0_9, %c0_10, %c0_11] : memref<3x16x32xf32, #tpu.memory_space<vmem>>, vector<1x16x32xf32>
    %9 = vector.shape_cast %8 : vector<1x16x32xf32> to vector<16x32xf32>
    %c0_12 = arith.constant 0 : index
    %c0_13 = arith.constant 0 : index
    %c0_14 = arith.constant 0 : index
    %10 = vector.load %arg2[%c0_12, %c0_13, %c0_14] : memref<3x16x32xf32, #tpu.memory_space<vmem>>, vector<1x16x32xf32>
    %11 = vector.shape_cast %10 : vector<1x16x32xf32> to vector<16x32xf32>
    %c0_i32 = arith.constant 0 : i32
    %c16_i32 = arith.constant 16 : i32
    %12 = arith.muli %c0_i32, %c16_i32 : i32
    %13 = tpu.assume_multiple %12, 16 : i32
    %14 = arith.index_cast %13 : i32 to index
    %c0_15 = arith.constant 0 : index
    %15 = vector.load %arg15[%14, %c0_15] : memref<128x128xf32, #tpu.memory_space<vmem>>, vector<16x128xf32>
    %16 = arith.truncf %9 : vector<16x32xf32> to vector<16x32xbf16>
    %cst_16 = arith.constant dense<0.000000e+00> : vector<16x128xf32>
    %17 = tpu.matmul %16, %7, %cst_16 {dimension_numbers = #tpu.dot_dimension_numbers<[1], [0], [0], [1], [0, 0, 1, 1], [], []>} : vector<16x32xbf16>, vector<32x128xbf16>, vector<16x128xf32> -> vector<16x128xf32>
    %18 = arith.addf %15, %17 : vector<16x128xf32>
    %19 = vector.extract_strided_slice %18 {offsets = [0, 0], sizes = [16, 96], strides = [1, 1]} : vector<16x128xf32> to vector<16x96xf32>
    %20 = arith.negf %19 : vector<16x96xf32>
    %21 = math.exp %20 : vector<16x96xf32>
    %cst_17 = arith.constant 1.000000e+00 : f32
    %22 = vector.broadcast %cst_17 : f32 to vector<16x96xf32>
    %23 = arith.addf %22, %21 : vector<16x96xf32>
    %24 = arith.divf %22, %23 : vector<16x96xf32>
    %25 = vector.extract_strided_slice %18 {offsets = [0, 96], sizes = [16, 32], strides = [1, 1]} : vector<16x128xf32> to vector<16x32xf32>
    %26 = math.tanh %25 : vector<16x32xf32>
    %27 = vector.extract_strided_slice %24 {offsets = [0, 0], sizes = [16, 32], strides = [1, 1]} : vector<16x96xf32> to vector<16x32xf32>
    %28 = vector.extract_strided_slice %24 {offsets = [0, 32], sizes = [16, 32], strides = [1, 1]} : vector<16x96xf32> to vector<16x32xf32>
    %29 = vector.extract_strided_slice %24 {offsets = [0, 64], sizes = [16, 32], strides = [1, 1]} : vector<16x96xf32> to vector<16x32xf32>
    %30 = arith.mulf %28, %11 : vector<16x32xf32>
    %31 = arith.mulf %27, %26 : vector<16x32xf32>
    %32 = arith.addf %30, %31 : vector<16x32xf32>
    %33 = math.tanh %32 : vector<16x32xf32>
    %34 = arith.mulf %29, %33 : vector<16x32xf32>
    %35 = arith.truncf %34 : vector<16x32xf32> to vector<16x32xbf16>
    %36 = arith.index_cast %13 : i32 to index
    %c0_18 = arith.constant 0 : index
    %37 = vector.load %arg16[%36, %c0_18] : memref<128x32xbf16, #tpu.memory_space<vmem>>, vector<16x32xbf16>
    tpu.vector_store %arg16[%36, %c0_18], %35 {strides = array<i32>} : memref<128x32xbf16, #tpu.memory_space<vmem>>, vector<16x32xbf16>,
    %c1_i32 = arith.constant 1 : i32
    %c16_i32_19 = arith.constant 16 : i32
    %38 = arith.muli %c1_i32, %c16_i32_19 : i32
    %39 = tpu.assume_multiple %38, 16 : i32
    %40 = arith.index_cast %39 : i32 to index
    %c0_20 = arith.constant 0 : index
    %41 = vector.load %arg15[%40, %c0_20] : memref<128x128xf32, #tpu.memory_space<vmem>>, vector<16x128xf32>
    %42 = arith.truncf %34 : vector<16x32xf32> to vector<16x32xbf16>
    %cst_21 = arith.constant dense<0.000000e+00> : vector<16x128xf32>
    %43 = tpu.matmul %42, %7, %cst_21 {dimension_numbers = #tpu.dot_dimension_numbers<[1], [0], [0], [1], [0, 0, 1, 1], [], []>} : vector<16x32xbf16>, vector<32x128xbf16>, vector<16x128xf32> -> vector<16x128xf32>
    %44 = arith.addf %41, %43 : vector<16x128xf32>
    %45 = vector.extract_strided_slice %44 {offsets = [0, 0], sizes = [16, 96], strides = [1, 1]} : vector<16x128xf32> to vector<16x96xf32>
    %46 = arith.negf %45 : vector<16x96xf32>
    %47 = math.exp %46 : vector<16x96xf32>
    %cst_22 = arith.constant 1.000000e+00 : f32
    %48 = vector.broadcast %cst_22 : f32 to vector<16x96xf32>
    %49 = arith.addf %48, %47 : vector<16x96xf32>
    %50 = arith.divf %48, %49 : vector<16x96xf32>
    %51 = vector.extract_strided_slice %44 {offsets = [0, 96], sizes = [16, 32], strides = [1, 1]} : vector<16x128xf32> to vector<16x32xf32>
    %52 = math.tanh %51 : vector<16x32xf32>
    %53 = vector.extract_strided_slice %50 {offsets = [0, 0], sizes = [16, 32], strides = [1, 1]} : vector<16x96xf32> to vector<16x32xf32>
    %54 = vector.extract_strided_slice %50 {offsets = [0, 32], sizes = [16, 32], strides = [1, 1]} : vector<16x96xf32> to vector<16x32xf32>
    %55 = vector.extract_strided_slice %50 {offsets = [0, 64], sizes = [16, 32], strides = [1, 1]} : vector<16x96xf32> to vector<16x32xf32>
    %56 = arith.mulf %54, %32 : vector<16x32xf32>
    %57 = arith.mulf %53, %52 : vector<16x32xf32>
    %58 = arith.addf %56, %57 : vector<16x32xf32>
    %59 = math.tanh %58 : vector<16x32xf32>
    %60 = arith.mulf %55, %59 : vector<16x32xf32>
    %61 = arith.truncf %60 : vector<16x32xf32> to vector<16x32xbf16>
    %62 = arith.index_cast %39 : i32 to index
    %c0_23 = arith.constant 0 : index
    %63 = vector.load %arg16[%62, %c0_23] : memref<128x32xbf16, #tpu.memory_space<vmem>>, vector<16x32xbf16>
    tpu.vector_store %arg16[%62, %c0_23], %61 {strides = array<i32>} : memref<128x32xbf16, #tpu.memory_space<vmem>>, vector<16x32xbf16>,
    %c2_i32 = arith.constant 2 : i32
    %c16_i32_24 = arith.constant 16 : i32
    %64 = arith.muli %c2_i32, %c16_i32_24 : i32
    %65 = tpu.assume_multiple %64, 16 : i32
    %66 = arith.index_cast %65 : i32 to index
    %c0_25 = arith.constant 0 : index
    %67 = vector.load %arg15[%66, %c0_25] : memref<128x128xf32, #tpu.memory_space<vmem>>, vector<16x128xf32>
    %68 = arith.truncf %60 : vector<16x32xf32> to vector<16x32xbf16>
    %cst_26 = arith.constant dense<0.000000e+00> : vector<16x128xf32>
    %69 = tpu.matmul %68, %7, %cst_26 {dimension_numbers = #tpu.dot_dimension_numbers<[1], [0], [0], [1], [0, 0, 1, 1], [], []>} : vector<16x32xbf16>, vector<32x128xbf16>, vector<16x128xf32> -> vector<16x128xf32>
    %70 = arith.addf %67, %69 : vector<16x128xf32>
    %71 = vector.extract_strided_slice %70 {offsets = [0, 0], sizes = [16, 96], strides = [1, 1]} : vector<16x128xf32> to vector<16x96xf32>
    %72 = arith.negf %71 : vector<16x96xf32>
    %73 = math.exp %72 : vector<16x96xf32>
    %cst_27 = arith.constant 1.000000e+00 : f32
    %74 = vector.broadcast %cst_27 : f32 to vector<16x96xf32>
    %75 = arith.addf %74, %73 : vector<16x96xf32>
    %76 = arith.divf %74, %75 : vector<16x96xf32>
    %77 = vector.extract_strided_slice %70 {offsets = [0, 96], sizes = [16, 32], strides = [1, 1]} : vector<16x128xf32> to vector<16x32xf32>
    %78 = math.tanh %77 : vector<16x32xf32>
    %79 = vector.extract_strided_slice %76 {offsets = [0, 0], sizes = [16, 32], strides = [1, 1]} : vector<16x96xf32> to vector<16x32xf32>
    %80 = vector.extract_strided_slice %76 {offsets = [0, 32], sizes = [16, 32], strides = [1, 1]} : vector<16x96xf32> to vector<16x32xf32>
    %81 = vector.extract_strided_slice %76 {offsets = [0, 64], sizes = [16, 32], strides = [1, 1]} : vector<16x96xf32> to vector<16x32xf32>
    %82 = arith.mulf %80, %58 : vector<16x32xf32>
    %83 = arith.mulf %79, %78 : vector<16x32xf32>
    %84 = arith.addf %82, %83 : vector<16x32xf32>
    %85 = math.tanh %84 : vector<16x32xf32>
    %86 = arith.mulf %81, %85 : vector<16x32xf32>
    %87 = arith.truncf %86 : vector<16x32xf32> to vector<16x32xbf16>
    %88 = arith.index_cast %65 : i32 to index
    %c0_28 = arith.constant 0 : index
    %89 = vector.load %arg16[%88, %c0_28] : memref<128x32xbf16, #tpu.memory_space<vmem>>, vector<16x32xbf16>
    tpu.vector_store %arg16[%88, %c0_28], %87 {strides = array<i32>} : memref<128x32xbf16, #tpu.memory_space<vmem>>, vector<16x32xbf16>,
    %c3_i32 = arith.constant 3 : i32
    %c16_i32_29 = arith.constant 16 : i32
    %90 = arith.muli %c3_i32, %c16_i32_29 : i32
    %91 = tpu.assume_multiple %90, 16 : i32
    %92 = arith.index_cast %91 : i32 to index
    %c0_30 = arith.constant 0 : index
    %93 = vector.load %arg15[%92, %c0_30] : memref<128x128xf32, #tpu.memory_space<vmem>>, vector<16x128xf32>
    %94 = arith.truncf %86 : vector<16x32xf32> to vector<16x32xbf16>
    %cst_31 = arith.constant dense<0.000000e+00> : vector<16x128xf32>
    %95 = tpu.matmul %94, %7, %cst_31 {dimension_numbers = #tpu.dot_dimension_numbers<[1], [0], [0], [1], [0, 0, 1, 1], [], []>} : vector<16x32xbf16>, vector<32x128xbf16>, vector<16x128xf32> -> vector<16x128xf32>
    %96 = arith.addf %93, %95 : vector<16x128xf32>
    %97 = vector.extract_strided_slice %96 {offsets = [0, 0], sizes = [16, 96], strides = [1, 1]} : vector<16x128xf32> to vector<16x96xf32>
    %98 = arith.negf %97 : vector<16x96xf32>
    %99 = math.exp %98 : vector<16x96xf32>
    %cst_32 = arith.constant 1.000000e+00 : f32
    %100 = vector.broadcast %cst_32 : f32 to vector<16x96xf32>
    %101 = arith.addf %100, %99 : vector<16x96xf32>
    %102 = arith.divf %100, %101 : vector<16x96xf32>
    %103 = vector.extract_strided_slice %96 {offsets = [0, 96], sizes = [16, 32], strides = [1, 1]} : vector<16x128xf32> to vector<16x32xf32>
    %104 = math.tanh %103 : vector<16x32xf32>
    %105 = vector.extract_strided_slice %102 {offsets = [0, 0], sizes = [16, 32], strides = [1, 1]} : vector<16x96xf32> to vector<16x32xf32>
    %106 = vector.extract_strided_slice %102 {offsets = [0, 32], sizes = [16, 32], strides = [1, 1]} : vector<16x96xf32> to vector<16x32xf32>
    %107 = vector.extract_strided_slice %102 {offsets = [0, 64], sizes = [16, 32], strides = [1, 1]} : vector<16x96xf32> to vector<16x32xf32>
    %108 = arith.mulf %106, %84 : vector<16x32xf32>
    %109 = arith.mulf %105, %104 : vector<16x32xf32>
    %110 = arith.addf %108, %109 : vector<16x32xf32>
    %111 = math.tanh %110 : vector<16x32xf32>
    %112 = arith.mulf %107, %111 : vector<16x32xf32>
    %113 = arith.truncf %112 : vector<16x32xf32> to vector<16x32xbf16>
    %114 = arith.index_cast %91 : i32 to index
    %c0_33 = arith.constant 0 : index
    %115 = vector.load %arg16[%114, %c0_33] : memref<128x32xbf16, #tpu.memory_space<vmem>>, vector<16x32xbf16>
    tpu.vector_store %arg16[%114, %c0_33], %113 {strides = array<i32>} : memref<128x32xbf16, #tpu.memory_space<vmem>>, vector<16x32xbf16>,
    %c4_i32 = arith.constant 4 : i32
    %c16_i32_34 = arith.constant 16 : i32
    %116 = arith.muli %c4_i32, %c16_i32_34 : i32
    %117 = tpu.assume_multiple %116, 16 : i32
    %118 = arith.index_cast %117 : i32 to index
    %c0_35 = arith.constant 0 : index
    %119 = vector.load %arg15[%118, %c0_35] : memref<128x128xf32, #tpu.memory_space<vmem>>, vector<16x128xf32>
    %120 = arith.truncf %112 : vector<16x32xf32> to vector<16x32xbf16>
    %cst_36 = arith.constant dense<0.000000e+00> : vector<16x128xf32>
    %121 = tpu.matmul %120, %7, %cst_36 {dimension_numbers = #tpu.dot_dimension_numbers<[1], [0], [0], [1], [0, 0, 1, 1], [], []>} : vector<16x32xbf16>, vector<32x128xbf16>, vector<16x128xf32> -> vector<16x128xf32>
    %122 = arith.addf %119, %121 : vector<16x128xf32>
    %123 = vector.extract_strided_slice %122 {offsets = [0, 0], sizes = [16, 96], strides = [1, 1]} : vector<16x128xf32> to vector<16x96xf32>
    %124 = arith.negf %123 : vector<16x96xf32>
    %125 = math.exp %124 : vector<16x96xf32>
    %cst_37 = arith.constant 1.000000e+00 : f32
    %126 = vector.broadcast %cst_37 : f32 to vector<16x96xf32>
    %127 = arith.addf %126, %125 : vector<16x96xf32>
    %128 = arith.divf %126, %127 : vector<16x96xf32>
    %129 = vector.extract_strided_slice %122 {offsets = [0, 96], sizes = [16, 32], strides = [1, 1]} : vector<16x128xf32> to vector<16x32xf32>
    %130 = math.tanh %129 : vector<16x32xf32>
    %131 = vector.extract_strided_slice %128 {offsets = [0, 0], sizes = [16, 32], strides = [1, 1]} : vector<16x96xf32> to vector<16x32xf32>
    %132 = vector.extract_strided_slice %128 {offsets = [0, 32], sizes = [16, 32], strides = [1, 1]} : vector<16x96xf32> to vector<16x32xf32>
    %133 = vector.extract_strided_slice %128 {offsets = [0, 64], sizes = [16, 32], strides = [1, 1]} : vector<16x96xf32> to vector<16x32xf32>
    %134 = arith.mulf %132, %110 : vector<16x32xf32>
    %135 = arith.mulf %131, %130 : vector<16x32xf32>
    %136 = arith.addf %134, %135 : vector<16x32xf32>
    %137 = math.tanh %136 : vector<16x32xf32>
    %138 = arith.mulf %133, %137 : vector<16x32xf32>
    %139 = arith.truncf %138 : vector<16x32xf32> to vector<16x32xbf16>
    %140 = arith.index_cast %117 : i32 to index
    %c0_38 = arith.constant 0 : index
    %141 = vector.load %arg16[%140, %c0_38] : memref<128x32xbf16, #tpu.memory_space<vmem>>, vector<16x32xbf16>
    tpu.vector_store %arg16[%140, %c0_38], %139 {strides = array<i32>} : memref<128x32xbf16, #tpu.memory_space<vmem>>, vector<16x32xbf16>,
    %c5_i32 = arith.constant 5 : i32
    %c16_i32_39 = arith.constant 16 : i32
    %142 = arith.muli %c5_i32, %c16_i32_39 : i32
    %143 = tpu.assume_multiple %142, 16 : i32
    %144 = arith.index_cast %143 : i32 to index
    %c0_40 = arith.constant 0 : index
    %145 = vector.load %arg15[%144, %c0_40] : memref<128x128xf32, #tpu.memory_space<vmem>>, vector<16x128xf32>
    %146 = arith.truncf %138 : vector<16x32xf32> to vector<16x32xbf16>
    %cst_41 = arith.constant dense<0.000000e+00> : vector<16x128xf32>
    %147 = tpu.matmul %146, %7, %cst_41 {dimension_numbers = #tpu.dot_dimension_numbers<[1], [0], [0], [1], [0, 0, 1, 1], [], []>} : vector<16x32xbf16>, vector<32x128xbf16>, vector<16x128xf32> -> vector<16x128xf32>
    %148 = arith.addf %145, %147 : vector<16x128xf32>
    %149 = vector.extract_strided_slice %148 {offsets = [0, 0], sizes = [16, 96], strides = [1, 1]} : vector<16x128xf32> to vector<16x96xf32>
    %150 = arith.negf %149 : vector<16x96xf32>
    %151 = math.exp %150 : vector<16x96xf32>
    %cst_42 = arith.constant 1.000000e+00 : f32
    %152 = vector.broadcast %cst_42 : f32 to vector<16x96xf32>
    %153 = arith.addf %152, %151 : vector<16x96xf32>
    %154 = arith.divf %152, %153 : vector<16x96xf32>
    %155 = vector.extract_strided_slice %148 {offsets = [0, 96], sizes = [16, 32], strides = [1, 1]} : vector<16x128xf32> to vector<16x32xf32>
    %156 = math.tanh %155 : vector<16x32xf32>
    %157 = vector.extract_strided_slice %154 {offsets = [0, 0], sizes = [16, 32], strides = [1, 1]} : vector<16x96xf32> to vector<16x32xf32>
    %158 = vector.extract_strided_slice %154 {offsets = [0, 32], sizes = [16, 32], strides = [1, 1]} : vector<16x96xf32> to vector<16x32xf32>
    %159 = vector.extract_strided_slice %154 {offsets = [0, 64], sizes = [16, 32], strides = [1, 1]} : vector<16x96xf32> to vector<16x32xf32>
    %160 = arith.mulf %158, %136 : vector<16x32xf32>
    %161 = arith.mulf %157, %156 : vector<16x32xf32>
    %162 = arith.addf %160, %161 : vector<16x32xf32>
    %163 = math.tanh %162 : vector<16x32xf32>
    %164 = arith.mulf %159, %163 : vector<16x32xf32>
    %165 = arith.truncf %164 : vector<16x32xf32> to vector<16x32xbf16>
    %166 = arith.index_cast %143 : i32 to index
    %c0_43 = arith.constant 0 : index
    %167 = vector.load %arg16[%166, %c0_43] : memref<128x32xbf16, #tpu.memory_space<vmem>>, vector<16x32xbf16>
    tpu.vector_store %arg16[%166, %c0_43], %165 {strides = array<i32>} : memref<128x32xbf16, #tpu.memory_space<vmem>>, vector<16x32xbf16>,
    %c6_i32 = arith.constant 6 : i32
    %c16_i32_44 = arith.constant 16 : i32
    %168 = arith.muli %c6_i32, %c16_i32_44 : i32
    %169 = tpu.assume_multiple %168, 16 : i32
    %170 = arith.index_cast %169 : i32 to index
    %c0_45 = arith.constant 0 : index
    %171 = vector.load %arg15[%170, %c0_45] : memref<128x128xf32, #tpu.memory_space<vmem>>, vector<16x128xf32>
    %172 = arith.truncf %164 : vector<16x32xf32> to vector<16x32xbf16>
    %cst_46 = arith.constant dense<0.000000e+00> : vector<16x128xf32>
    %173 = tpu.matmul %172, %7, %cst_46 {dimension_numbers = #tpu.dot_dimension_numbers<[1], [0], [0], [1], [0, 0, 1, 1], [], []>} : vector<16x32xbf16>, vector<32x128xbf16>, vector<16x128xf32> -> vector<16x128xf32>
    %174 = arith.addf %171, %173 : vector<16x128xf32>
    %175 = vector.extract_strided_slice %174 {offsets = [0, 0], sizes = [16, 96], strides = [1, 1]} : vector<16x128xf32> to vector<16x96xf32>
    %176 = arith.negf %175 : vector<16x96xf32>
    %177 = math.exp %176 : vector<16x96xf32>
    %cst_47 = arith.constant 1.000000e+00 : f32
    %178 = vector.broadcast %cst_47 : f32 to vector<16x96xf32>
    %179 = arith.addf %178, %177 : vector<16x96xf32>
    %180 = arith.divf %178, %179 : vector<16x96xf32>
    %181 = vector.extract_strided_slice %174 {offsets = [0, 96], sizes = [16, 32], strides = [1, 1]} : vector<16x128xf32> to vector<16x32xf32>
    %182 = math.tanh %181 : vector<16x32xf32>
    %183 = vector.extract_strided_slice %180 {offsets = [0, 0], sizes = [16, 32], strides = [1, 1]} : vector<16x96xf32> to vector<16x32xf32>
    %184 = vector.extract_strided_slice %180 {offsets = [0, 32], sizes = [16, 32], strides = [1, 1]} : vector<16x96xf32> to vector<16x32xf32>
    %185 = vector.extract_strided_slice %180 {offsets = [0, 64], sizes = [16, 32], strides = [1, 1]} : vector<16x96xf32> to vector<16x32xf32>
    %186 = arith.mulf %184, %162 : vector<16x32xf32>
    %187 = arith.mulf %183, %182 : vector<16x32xf32>
    %188 = arith.addf %186, %187 : vector<16x32xf32>
    %189 = math.tanh %188 : vector<16x32xf32>
    %190 = arith.mulf %185, %189 : vector<16x32xf32>
    %191 = arith.truncf %190 : vector<16x32xf32> to vector<16x32xbf16>
    %192 = arith.index_cast %169 : i32 to index
    %c0_48 = arith.constant 0 : index
    %193 = vector.load %arg16[%192, %c0_48] : memref<128x32xbf16, #tpu.memory_space<vmem>>, vector<16x32xbf16>
    tpu.vector_store %arg16[%192, %c0_48], %191 {strides = array<i32>} : memref<128x32xbf16, #tpu.memory_space<vmem>>, vector<16x32xbf16>,
    %c7_i32 = arith.constant 7 : i32
    %c16_i32_49 = arith.constant 16 : i32
    %194 = arith.muli %c7_i32, %c16_i32_49 : i32
    %195 = tpu.assume_multiple %194, 16 : i32
    %196 = arith.index_cast %195 : i32 to index
    %c0_50 = arith.constant 0 : index
    %197 = vector.load %arg15[%196, %c0_50] : memref<128x128xf32, #tpu.memory_space<vmem>>, vector<16x128xf32>
    %198 = arith.truncf %190 : vector<16x32xf32> to vector<16x32xbf16>
    %cst_51 = arith.constant dense<0.000000e+00> : vector<16x128xf32>
    %199 = tpu.matmul %198, %7, %cst_51 {dimension_numbers = #tpu.dot_dimension_numbers<[1], [0], [0], [1], [0, 0, 1, 1], [], []>} : vector<16x32xbf16>, vector<32x128xbf16>, vector<16x128xf32> -> vector<16x128xf32>
    %200 = arith.addf %197, %199 : vector<16x128xf32>
    %201 = vector.extract_strided_slice %200 {offsets = [0, 0], sizes = [16, 96], strides = [1, 1]} : vector<16x128xf32> to vector<16x96xf32>
    %202 = arith.negf %201 : vector<16x96xf32>
    %203 = math.exp %202 : vector<16x96xf32>
    %cst_52 = arith.constant 1.000000e+00 : f32
    %204 = vector.broadcast %cst_52 : f32 to vector<16x96xf32>
    %205 = arith.addf %204, %203 : vector<16x96xf32>
    %206 = arith.divf %204, %205 : vector<16x96xf32>
    %207 = vector.extract_strided_slice %200 {offsets = [0, 96], sizes = [16, 32], strides = [1, 1]} : vector<16x128xf32> to vector<16x32xf32>
    %208 = math.tanh %207 : vector<16x32xf32>
    %209 = vector.extract_strided_slice %206 {offsets = [0, 0], sizes = [16, 32], strides = [1, 1]} : vector<16x96xf32> to vector<16x32xf32>
    %210 = vector.extract_strided_slice %206 {offsets = [0, 32], sizes = [16, 32], strides = [1, 1]} : vector<16x96xf32> to vector<16x32xf32>
    %211 = vector.extract_strided_slice %206 {offsets = [0, 64], sizes = [16, 32], strides = [1, 1]} : vector<16x96xf32> to vector<16x32xf32>
    %212 = arith.mulf %210, %188 : vector<16x32xf32>
    %213 = arith.mulf %209, %208 : vector<16x32xf32>
    %214 = arith.addf %212, %213 : vector<16x32xf32>
    %215 = math.tanh %214 : vector<16x32xf32>
    %216 = arith.mulf %211, %215 : vector<16x32xf32>
    %217 = arith.truncf %216 : vector<16x32xf32> to vector<16x32xbf16>
    %218 = arith.index_cast %195 : i32 to index
    %c0_53 = arith.constant 0 : index
    %219 = vector.load %arg16[%218, %c0_53] : memref<128x32xbf16, #tpu.memory_space<vmem>>, vector<16x32xbf16>
    tpu.vector_store %arg16[%218, %c0_53], %217 {strides = array<i32>} : memref<128x32xbf16, #tpu.memory_space<vmem>>, vector<16x32xbf16>,
    %c8_i32 = arith.constant 8 : i32
    %c0_54 = arith.constant 0 : index
    %c0_55 = arith.constant 0 : index
    %c0_56 = arith.constant 0 : index
    %220 = vector.load %arg13[%c0_54, %c0_55, %c0_56] : memref<3x16x32xf32, #tpu.memory_space<vmem>>, vector<1x16x32xf32>
    %221 = vector.shape_cast %220 : vector<1x16x32xf32> to vector<16x32xf32>
    %222 = vector.shape_cast %216 : vector<16x32xf32> to vector<1x16x32xf32>
    tpu.vector_store %arg13[%c0_54, %c0_55, %c0_56], %222 {strides = array<i32>} : memref<3x16x32xf32, #tpu.memory_space<vmem>>, vector<1x16x32xf32>,
    %c0_57 = arith.constant 0 : index
    %c0_58 = arith.constant 0 : index
    %c0_59 = arith.constant 0 : index
    %223 = vector.load %arg14[%c0_57, %c0_58, %c0_59] : memref<3x16x32xf32, #tpu.memory_space<vmem>>, vector<1x16x32xf32>
    %224 = vector.shape_cast %223 : vector<1x16x32xf32> to vector<16x32xf32>
    %225 = vector.shape_cast %214 : vector<16x32xf32> to vector<1x16x32xf32>
    tpu.vector_store %arg14[%c0_57, %c0_58, %c0_59], %225 {strides = array<i32>} : memref<3x16x32xf32, #tpu.memory_space<vmem>>, vector<1x16x32xf32>,
    %c0_60 = arith.constant 0 : index
    %c0_61 = arith.constant 0 : index
    %226 = vector.load %arg16[%c0_60, %c0_61] : memref<128x32xbf16, #tpu.memory_space<vmem>>, vector<128x32xbf16>
    %c0_62 = arith.constant 0 : index
    %c0_63 = arith.constant 0 : index
    %227 = vector.load %arg6[%c0_62, %c0_63] : memref<32x128xbf16, #tpu.memory_space<vmem>>, vector<32x128xbf16>
    %cst_64 = arith.constant dense<0.000000e+00> : vector<128x128xf32>
    %228 = tpu.matmul %226, %227, %cst_64 {dimension_numbers = #tpu.dot_dimension_numbers<[1], [0], [0], [1], [0, 0, 1, 1], [], []>} : vector<128x32xbf16>, vector<32x128xbf16>, vector<128x128xf32> -> vector<128x128xf32>
    %c0_65 = arith.constant 0 : index
    %c0_66 = arith.constant 0 : index
    %229 = vector.load %arg8[%c0_65, %c0_66] : memref<1x128xf32, #tpu.memory_space<vmem>>, vector<1x128xf32>
    %230 = vector.broadcast %229 : vector<1x128xf32> to vector<128x128xf32>
    %231 = arith.addf %228, %230 : vector<128x128xf32>
    %c0_67 = arith.constant 0 : index
    %c0_68 = arith.constant 0 : index
    %232 = vector.load %arg15[%c0_67, %c0_68] : memref<128x128xf32, #tpu.memory_space<vmem>>, vector<128x128xf32>
    tpu.vector_store %arg15[%c0_67, %c0_68], %231 {strides = array<i32>} : memref<128x128xf32, #tpu.memory_space<vmem>>, vector<128x128xf32>,
    %c0_69 = arith.constant 0 : index
    %c0_70 = arith.constant 0 : index
    %233 = vector.load %arg7[%c0_69, %c0_70] : memref<32x128xbf16, #tpu.memory_space<vmem>>, vector<32x128xbf16>
    %c1 = arith.constant 1 : index
    %c0_71 = arith.constant 0 : index
    %c0_72 = arith.constant 0 : index
    %234 = vector.load %arg1[%c1, %c0_71, %c0_72] : memref<3x16x32xf32, #tpu.memory_space<vmem>>, vector<1x16x32xf32>
    %235 = vector.shape_cast %234 : vector<1x16x32xf32> to vector<16x32xf32>
    %c1_73 = arith.constant 1 : index
    %c0_74 = arith.constant 0 : index
    %c0_75 = arith.constant 0 : index
    %236 = vector.load %arg2[%c1_73, %c0_74, %c0_75] : memref<3x16x32xf32, #tpu.memory_space<vmem>>, vector<1x16x32xf32>
    %237 = vector.shape_cast %236 : vector<1x16x32xf32> to vector<16x32xf32>
    %c0_i32_76 = arith.constant 0 : i32
    %c16_i32_77 = arith.constant 16 : i32
    %238 = arith.muli %c0_i32_76, %c16_i32_77 : i32
    %239 = tpu.assume_multiple %238, 16 : i32
    %240 = arith.index_cast %239 : i32 to index
    %c0_78 = arith.constant 0 : index
    %241 = vector.load %arg15[%240, %c0_78] : memref<128x128xf32, #tpu.memory_space<vmem>>, vector<16x128xf32>
    %242 = arith.truncf %235 : vector<16x32xf32> to vector<16x32xbf16>
    %cst_79 = arith.constant dense<0.000000e+00> : vector<16x128xf32>
    %243 = tpu.matmul %242, %233, %cst_79 {dimension_numbers = #tpu.dot_dimension_numbers<[1], [0], [0], [1], [0, 0, 1, 1], [], []>} : vector<16x32xbf16>, vector<32x128xbf16>, vector<16x128xf32> -> vector<16x128xf32>
    %244 = arith.addf %241, %243 : vector<16x128xf32>
    %245 = vector.extract_strided_slice %244 {offsets = [0, 0], sizes = [16, 96], strides = [1, 1]} : vector<16x128xf32> to vector<16x96xf32>
    %246 = arith.negf %245 : vector<16x96xf32>
    %247 = math.exp %246 : vector<16x96xf32>
    %cst_80 = arith.constant 1.000000e+00 : f32
    %248 = vector.broadcast %cst_80 : f32 to vector<16x96xf32>
    %249 = arith.addf %248, %247 : vector<16x96xf32>
    %250 = arith.divf %248, %249 : vector<16x96xf32>
    %251 = vector.extract_strided_slice %244 {offsets = [0, 96], sizes = [16, 32], strides = [1, 1]} : vector<16x128xf32> to vector<16x32xf32>
    %252 = math.tanh %251 : vector<16x32xf32>
    %253 = vector.extract_strided_slice %250 {offsets = [0, 0], sizes = [16, 32], strides = [1, 1]} : vector<16x96xf32> to vector<16x32xf32>
    %254 = vector.extract_strided_slice %250 {offsets = [0, 32], sizes = [16, 32], strides = [1, 1]} : vector<16x96xf32> to vector<16x32xf32>
    %255 = vector.extract_strided_slice %250 {offsets = [0, 64], sizes = [16, 32], strides = [1, 1]} : vector<16x96xf32> to vector<16x32xf32>
    %256 = arith.mulf %254, %237 : vector<16x32xf32>
    %257 = arith.mulf %253, %252 : vector<16x32xf32>
    %258 = arith.addf %256, %257 : vector<16x32xf32>
    %259 = math.tanh %258 : vector<16x32xf32>
    %260 = arith.mulf %255, %259 : vector<16x32xf32>
    %261 = arith.truncf %260 : vector<16x32xf32> to vector<16x32xbf16>
    %262 = arith.index_cast %239 : i32 to index
    %c0_81 = arith.constant 0 : index
    %263 = vector.load %arg16[%262, %c0_81] : memref<128x32xbf16, #tpu.memory_space<vmem>>, vector<16x32xbf16>
    tpu.vector_store %arg16[%262, %c0_81], %261 {strides = array<i32>} : memref<128x32xbf16, #tpu.memory_space<vmem>>, vector<16x32xbf16>,
    %c1_i32_82 = arith.constant 1 : i32
    %c16_i32_83 = arith.constant 16 : i32
    %264 = arith.muli %c1_i32_82, %c16_i32_83 : i32
    %265 = tpu.assume_multiple %264, 16 : i32
    %266 = arith.index_cast %265 : i32 to index
    %c0_84 = arith.constant 0 : index
    %267 = vector.load %arg15[%266, %c0_84] : memref<128x128xf32, #tpu.memory_space<vmem>>, vector<16x128xf32>
    %268 = arith.truncf %260 : vector<16x32xf32> to vector<16x32xbf16>
    %cst_85 = arith.constant dense<0.000000e+00> : vector<16x128xf32>
    %269 = tpu.matmul %268, %233, %cst_85 {dimension_numbers = #tpu.dot_dimension_numbers<[1], [0], [0], [1], [0, 0, 1, 1], [], []>} : vector<16x32xbf16>, vector<32x128xbf16>, vector<16x128xf32> -> vector<16x128xf32>
    %270 = arith.addf %267, %269 : vector<16x128xf32>
    %271 = vector.extract_strided_slice %270 {offsets = [0, 0], sizes = [16, 96], strides = [1, 1]} : vector<16x128xf32> to vector<16x96xf32>
    %272 = arith.negf %271 : vector<16x96xf32>
    %273 = math.exp %272 : vector<16x96xf32>
    %cst_86 = arith.constant 1.000000e+00 : f32
    %274 = vector.broadcast %cst_86 : f32 to vector<16x96xf32>
    %275 = arith.addf %274, %273 : vector<16x96xf32>
    %276 = arith.divf %274, %275 : vector<16x96xf32>
    %277 = vector.extract_strided_slice %270 {offsets = [0, 96], sizes = [16, 32], strides = [1, 1]} : vector<16x128xf32> to vector<16x32xf32>
    %278 = math.tanh %277 : vector<16x32xf32>
    %279 = vector.extract_strided_slice %276 {offsets = [0, 0], sizes = [16, 32], strides = [1, 1]} : vector<16x96xf32> to vector<16x32xf32>
    %280 = vector.extract_strided_slice %276 {offsets = [0, 32], sizes = [16, 32], strides = [1, 1]} : vector<16x96xf32> to vector<16x32xf32>
    %281 = vector.extract_strided_slice %276 {offsets = [0, 64], sizes = [16, 32], strides = [1, 1]} : vector<16x96xf32> to vector<16x32xf32>
    %282 = arith.mulf %280, %258 : vector<16x32xf32>
    %283 = arith.mulf %279, %278 : vector<16x32xf32>
    %284 = arith.addf %282, %283 : vector<16x32xf32>
    %285 = math.tanh %284 : vector<16x32xf32>
    %286 = arith.mulf %281, %285 : vector<16x32xf32>
    %287 = arith.truncf %286 : vector<16x32xf32> to vector<16x32xbf16>
    %288 = arith.index_cast %265 : i32 to index
    %c0_87 = arith.constant 0 : index
    %289 = vector.load %arg16[%288, %c0_87] : memref<128x32xbf16, #tpu.memory_space<vmem>>, vector<16x32xbf16>
    tpu.vector_store %arg16[%288, %c0_87], %287 {strides = array<i32>} : memref<128x32xbf16, #tpu.memory_space<vmem>>, vector<16x32xbf16>,
    %c2_i32_88 = arith.constant 2 : i32
    %c16_i32_89 = arith.constant 16 : i32
    %290 = arith.muli %c2_i32_88, %c16_i32_89 : i32
    %291 = tpu.assume_multiple %290, 16 : i32
    %292 = arith.index_cast %291 : i32 to index
    %c0_90 = arith.constant 0 : index
    %293 = vector.load %arg15[%292, %c0_90] : memref<128x128xf32, #tpu.memory_space<vmem>>, vector<16x128xf32>
    %294 = arith.truncf %286 : vector<16x32xf32> to vector<16x32xbf16>
    %cst_91 = arith.constant dense<0.000000e+00> : vector<16x128xf32>
    %295 = tpu.matmul %294, %233, %cst_91 {dimension_numbers = #tpu.dot_dimension_numbers<[1], [0], [0], [1], [0, 0, 1, 1], [], []>} : vector<16x32xbf16>, vector<32x128xbf16>, vector<16x128xf32> -> vector<16x128xf32>
    %296 = arith.addf %293, %295 : vector<16x128xf32>
    %297 = vector.extract_strided_slice %296 {offsets = [0, 0], sizes = [16, 96], strides = [1, 1]} : vector<16x128xf32> to vector<16x96xf32>
    %298 = arith.negf %297 : vector<16x96xf32>
    %299 = math.exp %298 : vector<16x96xf32>
    %cst_92 = arith.constant 1.000000e+00 : f32
    %300 = vector.broadcast %cst_92 : f32 to vector<16x96xf32>
    %301 = arith.addf %300, %299 : vector<16x96xf32>
    %302 = arith.divf %300, %301 : vector<16x96xf32>
    %303 = vector.extract_strided_slice %296 {offsets = [0, 96], sizes = [16, 32], strides = [1, 1]} : vector<16x128xf32> to vector<16x32xf32>
    %304 = math.tanh %303 : vector<16x32xf32>
    %305 = vector.extract_strided_slice %302 {offsets = [0, 0], sizes = [16, 32], strides = [1, 1]} : vector<16x96xf32> to vector<16x32xf32>
    %306 = vector.extract_strided_slice %302 {offsets = [0, 32], sizes = [16, 32], strides = [1, 1]} : vector<16x96xf32> to vector<16x32xf32>
    %307 = vector.extract_strided_slice %302 {offsets = [0, 64], sizes = [16, 32], strides = [1, 1]} : vector<16x96xf32> to vector<16x32xf32>
    %308 = arith.mulf %306, %284 : vector<16x32xf32>
    %309 = arith.mulf %305, %304 : vector<16x32xf32>
    %310 = arith.addf %308, %309 : vector<16x32xf32>
    %311 = math.tanh %310 : vector<16x32xf32>
    %312 = arith.mulf %307, %311 : vector<16x32xf32>
    %313 = arith.truncf %312 : vector<16x32xf32> to vector<16x32xbf16>
    %314 = arith.index_cast %291 : i32 to index
    %c0_93 = arith.constant 0 : index
    %315 = vector.load %arg16[%314, %c0_93] : memref<128x32xbf16, #tpu.memory_space<vmem>>, vector<16x32xbf16>
    tpu.vector_store %arg16[%314, %c0_93], %313 {strides = array<i32>} : memref<128x32xbf16, #tpu.memory_space<vmem>>, vector<16x32xbf16>,
    %c3_i32_94 = arith.constant 3 : i32
    %c16_i32_95 = arith.constant 16 : i32
    %316 = arith.muli %c3_i32_94, %c16_i32_95 : i32
    %317 = tpu.assume_multiple %316, 16 : i32
    %318 = arith.index_cast %317 : i32 to index
    %c0_96 = arith.constant 0 : index
    %319 = vector.load %arg15[%318, %c0_96] : memref<128x128xf32, #tpu.memory_space<vmem>>, vector<16x128xf32>
    %320 = arith.truncf %312 : vector<16x32xf32> to vector<16x32xbf16>
    %cst_97 = arith.constant dense<0.000000e+00> : vector<16x128xf32>
    %321 = tpu.matmul %320, %233, %cst_97 {dimension_numbers = #tpu.dot_dimension_numbers<[1], [0], [0], [1], [0, 0, 1, 1], [], []>} : vector<16x32xbf16>, vector<32x128xbf16>, vector<16x128xf32> -> vector<16x128xf32>
    %322 = arith.addf %319, %321 : vector<16x128xf32>
    %323 = vector.extract_strided_slice %322 {offsets = [0, 0], sizes = [16, 96], strides = [1, 1]} : vector<16x128xf32> to vector<16x96xf32>
    %324 = arith.negf %323 : vector<16x96xf32>
    %325 = math.exp %324 : vector<16x96xf32>
    %cst_98 = arith.constant 1.000000e+00 : f32
    %326 = vector.broadcast %cst_98 : f32 to vector<16x96xf32>
    %327 = arith.addf %326, %325 : vector<16x96xf32>
    %328 = arith.divf %326, %327 : vector<16x96xf32>
    %329 = vector.extract_strided_slice %322 {offsets = [0, 96], sizes = [16, 32], strides = [1, 1]} : vector<16x128xf32> to vector<16x32xf32>
    %330 = math.tanh %329 : vector<16x32xf32>
    %331 = vector.extract_strided_slice %328 {offsets = [0, 0], sizes = [16, 32], strides = [1, 1]} : vector<16x96xf32> to vector<16x32xf32>
    %332 = vector.extract_strided_slice %328 {offsets = [0, 32], sizes = [16, 32], strides = [1, 1]} : vector<16x96xf32> to vector<16x32xf32>
    %333 = vector.extract_strided_slice %328 {offsets = [0, 64], sizes = [16, 32], strides = [1, 1]} : vector<16x96xf32> to vector<16x32xf32>
    %334 = arith.mulf %332, %310 : vector<16x32xf32>
    %335 = arith.mulf %331, %330 : vector<16x32xf32>
    %336 = arith.addf %334, %335 : vector<16x32xf32>
    %337 = math.tanh %336 : vector<16x32xf32>
    %338 = arith.mulf %333, %337 : vector<16x32xf32>
    %339 = arith.truncf %338 : vector<16x32xf32> to vector<16x32xbf16>
    %340 = arith.index_cast %317 : i32 to index
    %c0_99 = arith.constant 0 : index
    %341 = vector.load %arg16[%340, %c0_99] : memref<128x32xbf16, #tpu.memory_space<vmem>>, vector<16x32xbf16>
    tpu.vector_store %arg16[%340, %c0_99], %339 {strides = array<i32>} : memref<128x32xbf16, #tpu.memory_space<vmem>>, vector<16x32xbf16>,
    %c4_i32_100 = arith.constant 4 : i32
    %c16_i32_101 = arith.constant 16 : i32
    %342 = arith.muli %c4_i32_100, %c16_i32_101 : i32
    %343 = tpu.assume_multiple %342, 16 : i32
    %344 = arith.index_cast %343 : i32 to index
    %c0_102 = arith.constant 0 : index
    %345 = vector.load %arg15[%344, %c0_102] : memref<128x128xf32, #tpu.memory_space<vmem>>, vector<16x128xf32>
    %346 = arith.truncf %338 : vector<16x32xf32> to vector<16x32xbf16>
    %cst_103 = arith.constant dense<0.000000e+00> : vector<16x128xf32>
    %347 = tpu.matmul %346, %233, %cst_103 {dimension_numbers = #tpu.dot_dimension_numbers<[1], [0], [0], [1], [0, 0, 1, 1], [], []>} : vector<16x32xbf16>, vector<32x128xbf16>, vector<16x128xf32> -> vector<16x128xf32>
    %348 = arith.addf %345, %347 : vector<16x128xf32>
    %349 = vector.extract_strided_slice %348 {offsets = [0, 0], sizes = [16, 96], strides = [1, 1]} : vector<16x128xf32> to vector<16x96xf32>
    %350 = arith.negf %349 : vector<16x96xf32>
    %351 = math.exp %350 : vector<16x96xf32>
    %cst_104 = arith.constant 1.000000e+00 : f32
    %352 = vector.broadcast %cst_104 : f32 to vector<16x96xf32>
    %353 = arith.addf %352, %351 : vector<16x96xf32>
    %354 = arith.divf %352, %353 : vector<16x96xf32>
    %355 = vector.extract_strided_slice %348 {offsets = [0, 96], sizes = [16, 32], strides = [1, 1]} : vector<16x128xf32> to vector<16x32xf32>
    %356 = math.tanh %355 : vector<16x32xf32>
    %357 = vector.extract_strided_slice %354 {offsets = [0, 0], sizes = [16, 32], strides = [1, 1]} : vector<16x96xf32> to vector<16x32xf32>
    %358 = vector.extract_strided_slice %354 {offsets = [0, 32], sizes = [16, 32], strides = [1, 1]} : vector<16x96xf32> to vector<16x32xf32>
    %359 = vector.extract_strided_slice %354 {offsets = [0, 64], sizes = [16, 32], strides = [1, 1]} : vector<16x96xf32> to vector<16x32xf32>
    %360 = arith.mulf %358, %336 : vector<16x32xf32>
    %361 = arith.mulf %357, %356 : vector<16x32xf32>
    %362 = arith.addf %360, %361 : vector<16x32xf32>
    %363 = math.tanh %362 : vector<16x32xf32>
    %364 = arith.mulf %359, %363 : vector<16x32xf32>
    %365 = arith.truncf %364 : vector<16x32xf32> to vector<16x32xbf16>
    %366 = arith.index_cast %343 : i32 to index
    %c0_105 = arith.constant 0 : index
    %367 = vector.load %arg16[%366, %c0_105] : memref<128x32xbf16, #tpu.memory_space<vmem>>, vector<16x32xbf16>
    tpu.vector_store %arg16[%366, %c0_105], %365 {strides = array<i32>} : memref<128x32xbf16, #tpu.memory_space<vmem>>, vector<16x32xbf16>,
    %c5_i32_106 = arith.constant 5 : i32
    %c16_i32_107 = arith.constant 16 : i32
    %368 = arith.muli %c5_i32_106, %c16_i32_107 : i32
    %369 = tpu.assume_multiple %368, 16 : i32
    %370 = arith.index_cast %369 : i32 to index
    %c0_108 = arith.constant 0 : index
    %371 = vector.load %arg15[%370, %c0_108] : memref<128x128xf32, #tpu.memory_space<vmem>>, vector<16x128xf32>
    %372 = arith.truncf %364 : vector<16x32xf32> to vector<16x32xbf16>
    %cst_109 = arith.constant dense<0.000000e+00> : vector<16x128xf32>
    %373 = tpu.matmul %372, %233, %cst_109 {dimension_numbers = #tpu.dot_dimension_numbers<[1], [0], [0], [1], [0, 0, 1, 1], [], []>} : vector<16x32xbf16>, vector<32x128xbf16>, vector<16x128xf32> -> vector<16x128xf32>
    %374 = arith.addf %371, %373 : vector<16x128xf32>
    %375 = vector.extract_strided_slice %374 {offsets = [0, 0], sizes = [16, 96], strides = [1, 1]} : vector<16x128xf32> to vector<16x96xf32>
    %376 = arith.negf %375 : vector<16x96xf32>
    %377 = math.exp %376 : vector<16x96xf32>
    %cst_110 = arith.constant 1.000000e+00 : f32
    %378 = vector.broadcast %cst_110 : f32 to vector<16x96xf32>
    %379 = arith.addf %378, %377 : vector<16x96xf32>
    %380 = arith.divf %378, %379 : vector<16x96xf32>
    %381 = vector.extract_strided_slice %374 {offsets = [0, 96], sizes = [16, 32], strides = [1, 1]} : vector<16x128xf32> to vector<16x32xf32>
    %382 = math.tanh %381 : vector<16x32xf32>
    %383 = vector.extract_strided_slice %380 {offsets = [0, 0], sizes = [16, 32], strides = [1, 1]} : vector<16x96xf32> to vector<16x32xf32>
    %384 = vector.extract_strided_slice %380 {offsets = [0, 32], sizes = [16, 32], strides = [1, 1]} : vector<16x96xf32> to vector<16x32xf32>
    %385 = vector.extract_strided_slice %380 {offsets = [0, 64], sizes = [16, 32], strides = [1, 1]} : vector<16x96xf32> to vector<16x32xf32>
    %386 = arith.mulf %384, %362 : vector<16x32xf32>
    %387 = arith.mulf %383, %382 : vector<16x32xf32>
    %388 = arith.addf %386, %387 : vector<16x32xf32>
    %389 = math.tanh %388 : vector<16x32xf32>
    %390 = arith.mulf %385, %389 : vector<16x32xf32>
    %391 = arith.truncf %390 : vector<16x32xf32> to vector<16x32xbf16>
    %392 = arith.index_cast %369 : i32 to index
    %c0_111 = arith.constant 0 : index
    %393 = vector.load %arg16[%392, %c0_111] : memref<128x32xbf16, #tpu.memory_space<vmem>>, vector<16x32xbf16>
    tpu.vector_store %arg16[%392, %c0_111], %391 {strides = array<i32>} : memref<128x32xbf16, #tpu.memory_space<vmem>>, vector<16x32xbf16>,
    %c6_i32_112 = arith.constant 6 : i32
    %c16_i32_113 = arith.constant 16 : i32
    %394 = arith.muli %c6_i32_112, %c16_i32_113 : i32
    %395 = tpu.assume_multiple %394, 16 : i32
    %396 = arith.index_cast %395 : i32 to index
    %c0_114 = arith.constant 0 : index
    %397 = vector.load %arg15[%396, %c0_114] : memref<128x128xf32, #tpu.memory_space<vmem>>, vector<16x128xf32>
    %398 = arith.truncf %390 : vector<16x32xf32> to vector<16x32xbf16>
    %cst_115 = arith.constant dense<0.000000e+00> : vector<16x128xf32>
    %399 = tpu.matmul %398, %233, %cst_115 {dimension_numbers = #tpu.dot_dimension_numbers<[1], [0], [0], [1], [0, 0, 1, 1], [], []>} : vector<16x32xbf16>, vector<32x128xbf16>, vector<16x128xf32> -> vector<16x128xf32>
    %400 = arith.addf %397, %399 : vector<16x128xf32>
    %401 = vector.extract_strided_slice %400 {offsets = [0, 0], sizes = [16, 96], strides = [1, 1]} : vector<16x128xf32> to vector<16x96xf32>
    %402 = arith.negf %401 : vector<16x96xf32>
    %403 = math.exp %402 : vector<16x96xf32>
    %cst_116 = arith.constant 1.000000e+00 : f32
    %404 = vector.broadcast %cst_116 : f32 to vector<16x96xf32>
    %405 = arith.addf %404, %403 : vector<16x96xf32>
    %406 = arith.divf %404, %405 : vector<16x96xf32>
    %407 = vector.extract_strided_slice %400 {offsets = [0, 96], sizes = [16, 32], strides = [1, 1]} : vector<16x128xf32> to vector<16x32xf32>
    %408 = math.tanh %407 : vector<16x32xf32>
    %409 = vector.extract_strided_slice %406 {offsets = [0, 0], sizes = [16, 32], strides = [1, 1]} : vector<16x96xf32> to vector<16x32xf32>
    %410 = vector.extract_strided_slice %406 {offsets = [0, 32], sizes = [16, 32], strides = [1, 1]} : vector<16x96xf32> to vector<16x32xf32>
    %411 = vector.extract_strided_slice %406 {offsets = [0, 64], sizes = [16, 32], strides = [1, 1]} : vector<16x96xf32> to vector<16x32xf32>
    %412 = arith.mulf %410, %388 : vector<16x32xf32>
    %413 = arith.mulf %409, %408 : vector<16x32xf32>
    %414 = arith.addf %412, %413 : vector<16x32xf32>
    %415 = math.tanh %414 : vector<16x32xf32>
    %416 = arith.mulf %411, %415 : vector<16x32xf32>
    %417 = arith.truncf %416 : vector<16x32xf32> to vector<16x32xbf16>
    %418 = arith.index_cast %395 : i32 to index
    %c0_117 = arith.constant 0 : index
    %419 = vector.load %arg16[%418, %c0_117] : memref<128x32xbf16, #tpu.memory_space<vmem>>, vector<16x32xbf16>
    tpu.vector_store %arg16[%418, %c0_117], %417 {strides = array<i32>} : memref<128x32xbf16, #tpu.memory_space<vmem>>, vector<16x32xbf16>,
    %c7_i32_118 = arith.constant 7 : i32
    %c16_i32_119 = arith.constant 16 : i32
    %420 = arith.muli %c7_i32_118, %c16_i32_119 : i32
    %421 = tpu.assume_multiple %420, 16 : i32
    %422 = arith.index_cast %421 : i32 to index
    %c0_120 = arith.constant 0 : index
    %423 = vector.load %arg15[%422, %c0_120] : memref<128x128xf32, #tpu.memory_space<vmem>>, vector<16x128xf32>
    %424 = arith.truncf %416 : vector<16x32xf32> to vector<16x32xbf16>
    %cst_121 = arith.constant dense<0.000000e+00> : vector<16x128xf32>
    %425 = tpu.matmul %424, %233, %cst_121 {dimension_numbers = #tpu.dot_dimension_numbers<[1], [0], [0], [1], [0, 0, 1, 1], [], []>} : vector<16x32xbf16>, vector<32x128xbf16>, vector<16x128xf32> -> vector<16x128xf32>
    %426 = arith.addf %423, %425 : vector<16x128xf32>
    %427 = vector.extract_strided_slice %426 {offsets = [0, 0], sizes = [16, 96], strides = [1, 1]} : vector<16x128xf32> to vector<16x96xf32>
    %428 = arith.negf %427 : vector<16x96xf32>
    %429 = math.exp %428 : vector<16x96xf32>
    %cst_122 = arith.constant 1.000000e+00 : f32
    %430 = vector.broadcast %cst_122 : f32 to vector<16x96xf32>
    %431 = arith.addf %430, %429 : vector<16x96xf32>
    %432 = arith.divf %430, %431 : vector<16x96xf32>
    %433 = vector.extract_strided_slice %426 {offsets = [0, 96], sizes = [16, 32], strides = [1, 1]} : vector<16x128xf32> to vector<16x32xf32>
    %434 = math.tanh %433 : vector<16x32xf32>
    %435 = vector.extract_strided_slice %432 {offsets = [0, 0], sizes = [16, 32], strides = [1, 1]} : vector<16x96xf32> to vector<16x32xf32>
    %436 = vector.extract_strided_slice %432 {offsets = [0, 32], sizes = [16, 32], strides = [1, 1]} : vector<16x96xf32> to vector<16x32xf32>
    %437 = vector.extract_strided_slice %432 {offsets = [0, 64], sizes = [16, 32], strides = [1, 1]} : vector<16x96xf32> to vector<16x32xf32>
    %438 = arith.mulf %436, %414 : vector<16x32xf32>
    %439 = arith.mulf %435, %434 : vector<16x32xf32>
    %440 = arith.addf %438, %439 : vector<16x32xf32>
    %441 = math.tanh %440 : vector<16x32xf32>
    %442 = arith.mulf %437, %441 : vector<16x32xf32>
    %443 = arith.truncf %442 : vector<16x32xf32> to vector<16x32xbf16>
    %444 = arith.index_cast %421 : i32 to index
    %c0_123 = arith.constant 0 : index
    %445 = vector.load %arg16[%444, %c0_123] : memref<128x32xbf16, #tpu.memory_space<vmem>>, vector<16x32xbf16>
    tpu.vector_store %arg16[%444, %c0_123], %443 {strides = array<i32>} : memref<128x32xbf16, #tpu.memory_space<vmem>>, vector<16x32xbf16>,
    %c8_i32_124 = arith.constant 8 : i32
    %c1_125 = arith.constant 1 : index
    %c0_126 = arith.constant 0 : index
    %c0_127 = arith.constant 0 : index
    %446 = vector.load %arg13[%c1_125, %c0_126, %c0_127] : memref<3x16x32xf32, #tpu.memory_space<vmem>>, vector<1x16x32xf32>
    %447 = vector.shape_cast %446 : vector<1x16x32xf32> to vector<16x32xf32>
    %448 = vector.shape_cast %442 : vector<16x32xf32> to vector<1x16x32xf32>
    tpu.vector_store %arg13[%c1_125, %c0_126, %c0_127], %448 {strides = array<i32>} : memref<3x16x32xf32, #tpu.memory_space<vmem>>, vector<1x16x32xf32>,
    %c1_128 = arith.constant 1 : index
    %c0_129 = arith.constant 0 : index
    %c0_130 = arith.constant 0 : index
    %449 = vector.load %arg14[%c1_128, %c0_129, %c0_130] : memref<3x16x32xf32, #tpu.memory_space<vmem>>, vector<1x16x32xf32>
    %450 = vector.shape_cast %449 : vector<1x16x32xf32> to vector<16x32xf32>
    %451 = vector.shape_cast %440 : vector<16x32xf32> to vector<1x16x32xf32>
    tpu.vector_store %arg14[%c1_128, %c0_129, %c0_130], %451 {strides = array<i32>} : memref<3x16x32xf32, #tpu.memory_space<vmem>>, vector<1x16x32xf32>,
    %c0_131 = arith.constant 0 : index
    %c0_132 = arith.constant 0 : index
    %452 = vector.load %arg16[%c0_131, %c0_132] : memref<128x32xbf16, #tpu.memory_space<vmem>>, vector<128x32xbf16>
    %c0_133 = arith.constant 0 : index
    %c0_134 = arith.constant 0 : index
    %453 = vector.load %arg9[%c0_133, %c0_134] : memref<32x128xbf16, #tpu.memory_space<vmem>>, vector<32x128xbf16>
    %cst_135 = arith.constant dense<0.000000e+00> : vector<128x128xf32>
    %454 = tpu.matmul %452, %453, %cst_135 {dimension_numbers = #tpu.dot_dimension_numbers<[1], [0], [0], [1], [0, 0, 1, 1], [], []>} : vector<128x32xbf16>, vector<32x128xbf16>, vector<128x128xf32> -> vector<128x128xf32>
    %c0_136 = arith.constant 0 : index
    %c0_137 = arith.constant 0 : index
    %455 = vector.load %arg11[%c0_136, %c0_137] : memref<1x128xf32, #tpu.memory_space<vmem>>, vector<1x128xf32>
    %456 = vector.broadcast %455 : vector<1x128xf32> to vector<128x128xf32>
    %457 = arith.addf %454, %456 : vector<128x128xf32>
    %c0_138 = arith.constant 0 : index
    %c0_139 = arith.constant 0 : index
    %458 = vector.load %arg15[%c0_138, %c0_139] : memref<128x128xf32, #tpu.memory_space<vmem>>, vector<128x128xf32>
    tpu.vector_store %arg15[%c0_138, %c0_139], %457 {strides = array<i32>} : memref<128x128xf32, #tpu.memory_space<vmem>>, vector<128x128xf32>,
    %c0_140 = arith.constant 0 : index
    %c0_141 = arith.constant 0 : index
    %459 = vector.load %arg10[%c0_140, %c0_141] : memref<32x128xbf16, #tpu.memory_space<vmem>>, vector<32x128xbf16>
    %c2 = arith.constant 2 : index
    %c0_142 = arith.constant 0 : index
    %c0_143 = arith.constant 0 : index
    %460 = vector.load %arg1[%c2, %c0_142, %c0_143] : memref<3x16x32xf32, #tpu.memory_space<vmem>>, vector<1x16x32xf32>
    %461 = vector.shape_cast %460 : vector<1x16x32xf32> to vector<16x32xf32>
    %c2_144 = arith.constant 2 : index
    %c0_145 = arith.constant 0 : index
    %c0_146 = arith.constant 0 : index
    %462 = vector.load %arg2[%c2_144, %c0_145, %c0_146] : memref<3x16x32xf32, #tpu.memory_space<vmem>>, vector<1x16x32xf32>
    %463 = vector.shape_cast %462 : vector<1x16x32xf32> to vector<16x32xf32>
    %c0_i32_147 = arith.constant 0 : i32
    %c16_i32_148 = arith.constant 16 : i32
    %464 = arith.muli %c0_i32_147, %c16_i32_148 : i32
    %465 = tpu.assume_multiple %464, 16 : i32
    %466 = arith.index_cast %465 : i32 to index
    %c0_149 = arith.constant 0 : index
    %467 = vector.load %arg15[%466, %c0_149] : memref<128x128xf32, #tpu.memory_space<vmem>>, vector<16x128xf32>
    %468 = arith.truncf %461 : vector<16x32xf32> to vector<16x32xbf16>
    %cst_150 = arith.constant dense<0.000000e+00> : vector<16x128xf32>
    %469 = tpu.matmul %468, %459, %cst_150 {dimension_numbers = #tpu.dot_dimension_numbers<[1], [0], [0], [1], [0, 0, 1, 1], [], []>} : vector<16x32xbf16>, vector<32x128xbf16>, vector<16x128xf32> -> vector<16x128xf32>
    %470 = arith.addf %467, %469 : vector<16x128xf32>
    %471 = vector.extract_strided_slice %470 {offsets = [0, 0], sizes = [16, 96], strides = [1, 1]} : vector<16x128xf32> to vector<16x96xf32>
    %472 = arith.negf %471 : vector<16x96xf32>
    %473 = math.exp %472 : vector<16x96xf32>
    %cst_151 = arith.constant 1.000000e+00 : f32
    %474 = vector.broadcast %cst_151 : f32 to vector<16x96xf32>
    %475 = arith.addf %474, %473 : vector<16x96xf32>
    %476 = arith.divf %474, %475 : vector<16x96xf32>
    %477 = vector.extract_strided_slice %470 {offsets = [0, 96], sizes = [16, 32], strides = [1, 1]} : vector<16x128xf32> to vector<16x32xf32>
    %478 = math.tanh %477 : vector<16x32xf32>
    %479 = vector.extract_strided_slice %476 {offsets = [0, 0], sizes = [16, 32], strides = [1, 1]} : vector<16x96xf32> to vector<16x32xf32>
    %480 = vector.extract_strided_slice %476 {offsets = [0, 32], sizes = [16, 32], strides = [1, 1]} : vector<16x96xf32> to vector<16x32xf32>
    %481 = vector.extract_strided_slice %476 {offsets = [0, 64], sizes = [16, 32], strides = [1, 1]} : vector<16x96xf32> to vector<16x32xf32>
    %482 = arith.mulf %480, %463 : vector<16x32xf32>
    %483 = arith.mulf %479, %478 : vector<16x32xf32>
    %484 = arith.addf %482, %483 : vector<16x32xf32>
    %485 = math.tanh %484 : vector<16x32xf32>
    %486 = arith.mulf %481, %485 : vector<16x32xf32>
    %487 = arith.truncf %486 : vector<16x32xf32> to vector<16x32xbf16>
    %488 = arith.index_cast %465 : i32 to index
    %c0_152 = arith.constant 0 : index
    %489 = vector.load %arg12[%488, %c0_152] : memref<128x32xbf16, #tpu.memory_space<vmem>>, vector<16x32xbf16>
    tpu.vector_store %arg12[%488, %c0_152], %487 {strides = array<i32>} : memref<128x32xbf16, #tpu.memory_space<vmem>>, vector<16x32xbf16>,
    %c1_i32_153 = arith.constant 1 : i32
    %c16_i32_154 = arith.constant 16 : i32
    %490 = arith.muli %c1_i32_153, %c16_i32_154 : i32
    %491 = tpu.assume_multiple %490, 16 : i32
    %492 = arith.index_cast %491 : i32 to index
    %c0_155 = arith.constant 0 : index
    %493 = vector.load %arg15[%492, %c0_155] : memref<128x128xf32, #tpu.memory_space<vmem>>, vector<16x128xf32>
    %494 = arith.truncf %486 : vector<16x32xf32> to vector<16x32xbf16>
    %cst_156 = arith.constant dense<0.000000e+00> : vector<16x128xf32>
    %495 = tpu.matmul %494, %459, %cst_156 {dimension_numbers = #tpu.dot_dimension_numbers<[1], [0], [0], [1], [0, 0, 1, 1], [], []>} : vector<16x32xbf16>, vector<32x128xbf16>, vector<16x128xf32> -> vector<16x128xf32>
    %496 = arith.addf %493, %495 : vector<16x128xf32>
    %497 = vector.extract_strided_slice %496 {offsets = [0, 0], sizes = [16, 96], strides = [1, 1]} : vector<16x128xf32> to vector<16x96xf32>
    %498 = arith.negf %497 : vector<16x96xf32>
    %499 = math.exp %498 : vector<16x96xf32>
    %cst_157 = arith.constant 1.000000e+00 : f32
    %500 = vector.broadcast %cst_157 : f32 to vector<16x96xf32>
    %501 = arith.addf %500, %499 : vector<16x96xf32>
    %502 = arith.divf %500, %501 : vector<16x96xf32>
    %503 = vector.extract_strided_slice %496 {offsets = [0, 96], sizes = [16, 32], strides = [1, 1]} : vector<16x128xf32> to vector<16x32xf32>
    %504 = math.tanh %503 : vector<16x32xf32>
    %505 = vector.extract_strided_slice %502 {offsets = [0, 0], sizes = [16, 32], strides = [1, 1]} : vector<16x96xf32> to vector<16x32xf32>
    %506 = vector.extract_strided_slice %502 {offsets = [0, 32], sizes = [16, 32], strides = [1, 1]} : vector<16x96xf32> to vector<16x32xf32>
    %507 = vector.extract_strided_slice %502 {offsets = [0, 64], sizes = [16, 32], strides = [1, 1]} : vector<16x96xf32> to vector<16x32xf32>
    %508 = arith.mulf %506, %484 : vector<16x32xf32>
    %509 = arith.mulf %505, %504 : vector<16x32xf32>
    %510 = arith.addf %508, %509 : vector<16x32xf32>
    %511 = math.tanh %510 : vector<16x32xf32>
    %512 = arith.mulf %507, %511 : vector<16x32xf32>
    %513 = arith.truncf %512 : vector<16x32xf32> to vector<16x32xbf16>
    %514 = arith.index_cast %491 : i32 to index
    %c0_158 = arith.constant 0 : index
    %515 = vector.load %arg12[%514, %c0_158] : memref<128x32xbf16, #tpu.memory_space<vmem>>, vector<16x32xbf16>
    tpu.vector_store %arg12[%514, %c0_158], %513 {strides = array<i32>} : memref<128x32xbf16, #tpu.memory_space<vmem>>, vector<16x32xbf16>,
    %c2_i32_159 = arith.constant 2 : i32
    %c16_i32_160 = arith.constant 16 : i32
    %516 = arith.muli %c2_i32_159, %c16_i32_160 : i32
    %517 = tpu.assume_multiple %516, 16 : i32
    %518 = arith.index_cast %517 : i32 to index
    %c0_161 = arith.constant 0 : index
    %519 = vector.load %arg15[%518, %c0_161] : memref<128x128xf32, #tpu.memory_space<vmem>>, vector<16x128xf32>
    %520 = arith.truncf %512 : vector<16x32xf32> to vector<16x32xbf16>
    %cst_162 = arith.constant dense<0.000000e+00> : vector<16x128xf32>
    %521 = tpu.matmul %520, %459, %cst_162 {dimension_numbers = #tpu.dot_dimension_numbers<[1], [0], [0], [1], [0, 0, 1, 1], [], []>} : vector<16x32xbf16>, vector<32x128xbf16>, vector<16x128xf32> -> vector<16x128xf32>
    %522 = arith.addf %519, %521 : vector<16x128xf32>
    %523 = vector.extract_strided_slice %522 {offsets = [0, 0], sizes = [16, 96], strides = [1, 1]} : vector<16x128xf32> to vector<16x96xf32>
    %524 = arith.negf %523 : vector<16x96xf32>
    %525 = math.exp %524 : vector<16x96xf32>
    %cst_163 = arith.constant 1.000000e+00 : f32
    %526 = vector.broadcast %cst_163 : f32 to vector<16x96xf32>
    %527 = arith.addf %526, %525 : vector<16x96xf32>
    %528 = arith.divf %526, %527 : vector<16x96xf32>
    %529 = vector.extract_strided_slice %522 {offsets = [0, 96], sizes = [16, 32], strides = [1, 1]} : vector<16x128xf32> to vector<16x32xf32>
    %530 = math.tanh %529 : vector<16x32xf32>
    %531 = vector.extract_strided_slice %528 {offsets = [0, 0], sizes = [16, 32], strides = [1, 1]} : vector<16x96xf32> to vector<16x32xf32>
    %532 = vector.extract_strided_slice %528 {offsets = [0, 32], sizes = [16, 32], strides = [1, 1]} : vector<16x96xf32> to vector<16x32xf32>
    %533 = vector.extract_strided_slice %528 {offsets = [0, 64], sizes = [16, 32], strides = [1, 1]} : vector<16x96xf32> to vector<16x32xf32>
    %534 = arith.mulf %532, %510 : vector<16x32xf32>
    %535 = arith.mulf %531, %530 : vector<16x32xf32>
    %536 = arith.addf %534, %535 : vector<16x32xf32>
    %537 = math.tanh %536 : vector<16x32xf32>
    %538 = arith.mulf %533, %537 : vector<16x32xf32>
    %539 = arith.truncf %538 : vector<16x32xf32> to vector<16x32xbf16>
    %540 = arith.index_cast %517 : i32 to index
    %c0_164 = arith.constant 0 : index
    %541 = vector.load %arg12[%540, %c0_164] : memref<128x32xbf16, #tpu.memory_space<vmem>>, vector<16x32xbf16>
    tpu.vector_store %arg12[%540, %c0_164], %539 {strides = array<i32>} : memref<128x32xbf16, #tpu.memory_space<vmem>>, vector<16x32xbf16>,
    %c3_i32_165 = arith.constant 3 : i32
    %c16_i32_166 = arith.constant 16 : i32
    %542 = arith.muli %c3_i32_165, %c16_i32_166 : i32
    %543 = tpu.assume_multiple %542, 16 : i32
    %544 = arith.index_cast %543 : i32 to index
    %c0_167 = arith.constant 0 : index
    %545 = vector.load %arg15[%544, %c0_167] : memref<128x128xf32, #tpu.memory_space<vmem>>, vector<16x128xf32>
    %546 = arith.truncf %538 : vector<16x32xf32> to vector<16x32xbf16>
    %cst_168 = arith.constant dense<0.000000e+00> : vector<16x128xf32>
    %547 = tpu.matmul %546, %459, %cst_168 {dimension_numbers = #tpu.dot_dimension_numbers<[1], [0], [0], [1], [0, 0, 1, 1], [], []>} : vector<16x32xbf16>, vector<32x128xbf16>, vector<16x128xf32> -> vector<16x128xf32>
    %548 = arith.addf %545, %547 : vector<16x128xf32>
    %549 = vector.extract_strided_slice %548 {offsets = [0, 0], sizes = [16, 96], strides = [1, 1]} : vector<16x128xf32> to vector<16x96xf32>
    %550 = arith.negf %549 : vector<16x96xf32>
    %551 = math.exp %550 : vector<16x96xf32>
    %cst_169 = arith.constant 1.000000e+00 : f32
    %552 = vector.broadcast %cst_169 : f32 to vector<16x96xf32>
    %553 = arith.addf %552, %551 : vector<16x96xf32>
    %554 = arith.divf %552, %553 : vector<16x96xf32>
    %555 = vector.extract_strided_slice %548 {offsets = [0, 96], sizes = [16, 32], strides = [1, 1]} : vector<16x128xf32> to vector<16x32xf32>
    %556 = math.tanh %555 : vector<16x32xf32>
    %557 = vector.extract_strided_slice %554 {offsets = [0, 0], sizes = [16, 32], strides = [1, 1]} : vector<16x96xf32> to vector<16x32xf32>
    %558 = vector.extract_strided_slice %554 {offsets = [0, 32], sizes = [16, 32], strides = [1, 1]} : vector<16x96xf32> to vector<16x32xf32>
    %559 = vector.extract_strided_slice %554 {offsets = [0, 64], sizes = [16, 32], strides = [1, 1]} : vector<16x96xf32> to vector<16x32xf32>
    %560 = arith.mulf %558, %536 : vector<16x32xf32>
    %561 = arith.mulf %557, %556 : vector<16x32xf32>
    %562 = arith.addf %560, %561 : vector<16x32xf32>
    %563 = math.tanh %562 : vector<16x32xf32>
    %564 = arith.mulf %559, %563 : vector<16x32xf32>
    %565 = arith.truncf %564 : vector<16x32xf32> to vector<16x32xbf16>
    %566 = arith.index_cast %543 : i32 to index
    %c0_170 = arith.constant 0 : index
    %567 = vector.load %arg12[%566, %c0_170] : memref<128x32xbf16, #tpu.memory_space<vmem>>, vector<16x32xbf16>
    tpu.vector_store %arg12[%566, %c0_170], %565 {strides = array<i32>} : memref<128x32xbf16, #tpu.memory_space<vmem>>, vector<16x32xbf16>,
    %c4_i32_171 = arith.constant 4 : i32
    %c16_i32_172 = arith.constant 16 : i32
    %568 = arith.muli %c4_i32_171, %c16_i32_172 : i32
    %569 = tpu.assume_multiple %568, 16 : i32
    %570 = arith.index_cast %569 : i32 to index
    %c0_173 = arith.constant 0 : index
    %571 = vector.load %arg15[%570, %c0_173] : memref<128x128xf32, #tpu.memory_space<vmem>>, vector<16x128xf32>
    %572 = arith.truncf %564 : vector<16x32xf32> to vector<16x32xbf16>
    %cst_174 = arith.constant dense<0.000000e+00> : vector<16x128xf32>
    %573 = tpu.matmul %572, %459, %cst_174 {dimension_numbers = #tpu.dot_dimension_numbers<[1], [0], [0], [1], [0, 0, 1, 1], [], []>} : vector<16x32xbf16>, vector<32x128xbf16>, vector<16x128xf32> -> vector<16x128xf32>
    %574 = arith.addf %571, %573 : vector<16x128xf32>
    %575 = vector.extract_strided_slice %574 {offsets = [0, 0], sizes = [16, 96], strides = [1, 1]} : vector<16x128xf32> to vector<16x96xf32>
    %576 = arith.negf %575 : vector<16x96xf32>
    %577 = math.exp %576 : vector<16x96xf32>
    %cst_175 = arith.constant 1.000000e+00 : f32
    %578 = vector.broadcast %cst_175 : f32 to vector<16x96xf32>
    %579 = arith.addf %578, %577 : vector<16x96xf32>
    %580 = arith.divf %578, %579 : vector<16x96xf32>
    %581 = vector.extract_strided_slice %574 {offsets = [0, 96], sizes = [16, 32], strides = [1, 1]} : vector<16x128xf32> to vector<16x32xf32>
    %582 = math.tanh %581 : vector<16x32xf32>
    %583 = vector.extract_strided_slice %580 {offsets = [0, 0], sizes = [16, 32], strides = [1, 1]} : vector<16x96xf32> to vector<16x32xf32>
    %584 = vector.extract_strided_slice %580 {offsets = [0, 32], sizes = [16, 32], strides = [1, 1]} : vector<16x96xf32> to vector<16x32xf32>
    %585 = vector.extract_strided_slice %580 {offsets = [0, 64], sizes = [16, 32], strides = [1, 1]} : vector<16x96xf32> to vector<16x32xf32>
    %586 = arith.mulf %584, %562 : vector<16x32xf32>
    %587 = arith.mulf %583, %582 : vector<16x32xf32>
    %588 = arith.addf %586, %587 : vector<16x32xf32>
    %589 = math.tanh %588 : vector<16x32xf32>
    %590 = arith.mulf %585, %589 : vector<16x32xf32>
    %591 = arith.truncf %590 : vector<16x32xf32> to vector<16x32xbf16>
    %592 = arith.index_cast %569 : i32 to index
    %c0_176 = arith.constant 0 : index
    %593 = vector.load %arg12[%592, %c0_176] : memref<128x32xbf16, #tpu.memory_space<vmem>>, vector<16x32xbf16>
    tpu.vector_store %arg12[%592, %c0_176], %591 {strides = array<i32>} : memref<128x32xbf16, #tpu.memory_space<vmem>>, vector<16x32xbf16>,
    %c5_i32_177 = arith.constant 5 : i32
    %c16_i32_178 = arith.constant 16 : i32
    %594 = arith.muli %c5_i32_177, %c16_i32_178 : i32
    %595 = tpu.assume_multiple %594, 16 : i32
    %596 = arith.index_cast %595 : i32 to index
    %c0_179 = arith.constant 0 : index
    %597 = vector.load %arg15[%596, %c0_179] : memref<128x128xf32, #tpu.memory_space<vmem>>, vector<16x128xf32>
    %598 = arith.truncf %590 : vector<16x32xf32> to vector<16x32xbf16>
    %cst_180 = arith.constant dense<0.000000e+00> : vector<16x128xf32>
    %599 = tpu.matmul %598, %459, %cst_180 {dimension_numbers = #tpu.dot_dimension_numbers<[1], [0], [0], [1], [0, 0, 1, 1], [], []>} : vector<16x32xbf16>, vector<32x128xbf16>, vector<16x128xf32> -> vector<16x128xf32>
    %600 = arith.addf %597, %599 : vector<16x128xf32>
    %601 = vector.extract_strided_slice %600 {offsets = [0, 0], sizes = [16, 96], strides = [1, 1]} : vector<16x128xf32> to vector<16x96xf32>
    %602 = arith.negf %601 : vector<16x96xf32>
    %603 = math.exp %602 : vector<16x96xf32>
    %cst_181 = arith.constant 1.000000e+00 : f32
    %604 = vector.broadcast %cst_181 : f32 to vector<16x96xf32>
    %605 = arith.addf %604, %603 : vector<16x96xf32>
    %606 = arith.divf %604, %605 : vector<16x96xf32>
    %607 = vector.extract_strided_slice %600 {offsets = [0, 96], sizes = [16, 32], strides = [1, 1]} : vector<16x128xf32> to vector<16x32xf32>
    %608 = math.tanh %607 : vector<16x32xf32>
    %609 = vector.extract_strided_slice %606 {offsets = [0, 0], sizes = [16, 32], strides = [1, 1]} : vector<16x96xf32> to vector<16x32xf32>
    %610 = vector.extract_strided_slice %606 {offsets = [0, 32], sizes = [16, 32], strides = [1, 1]} : vector<16x96xf32> to vector<16x32xf32>
    %611 = vector.extract_strided_slice %606 {offsets = [0, 64], sizes = [16, 32], strides = [1, 1]} : vector<16x96xf32> to vector<16x32xf32>
    %612 = arith.mulf %610, %588 : vector<16x32xf32>
    %613 = arith.mulf %609, %608 : vector<16x32xf32>
    %614 = arith.addf %612, %613 : vector<16x32xf32>
    %615 = math.tanh %614 : vector<16x32xf32>
    %616 = arith.mulf %611, %615 : vector<16x32xf32>
    %617 = arith.truncf %616 : vector<16x32xf32> to vector<16x32xbf16>
    %618 = arith.index_cast %595 : i32 to index
    %c0_182 = arith.constant 0 : index
    %619 = vector.load %arg12[%618, %c0_182] : memref<128x32xbf16, #tpu.memory_space<vmem>>, vector<16x32xbf16>
    tpu.vector_store %arg12[%618, %c0_182], %617 {strides = array<i32>} : memref<128x32xbf16, #tpu.memory_space<vmem>>, vector<16x32xbf16>,
    %c6_i32_183 = arith.constant 6 : i32
    %c16_i32_184 = arith.constant 16 : i32
    %620 = arith.muli %c6_i32_183, %c16_i32_184 : i32
    %621 = tpu.assume_multiple %620, 16 : i32
    %622 = arith.index_cast %621 : i32 to index
    %c0_185 = arith.constant 0 : index
    %623 = vector.load %arg15[%622, %c0_185] : memref<128x128xf32, #tpu.memory_space<vmem>>, vector<16x128xf32>
    %624 = arith.truncf %616 : vector<16x32xf32> to vector<16x32xbf16>
    %cst_186 = arith.constant dense<0.000000e+00> : vector<16x128xf32>
    %625 = tpu.matmul %624, %459, %cst_186 {dimension_numbers = #tpu.dot_dimension_numbers<[1], [0], [0], [1], [0, 0, 1, 1], [], []>} : vector<16x32xbf16>, vector<32x128xbf16>, vector<16x128xf32> -> vector<16x128xf32>
    %626 = arith.addf %623, %625 : vector<16x128xf32>
    %627 = vector.extract_strided_slice %626 {offsets = [0, 0], sizes = [16, 96], strides = [1, 1]} : vector<16x128xf32> to vector<16x96xf32>
    %628 = arith.negf %627 : vector<16x96xf32>
    %629 = math.exp %628 : vector<16x96xf32>
    %cst_187 = arith.constant 1.000000e+00 : f32
    %630 = vector.broadcast %cst_187 : f32 to vector<16x96xf32>
    %631 = arith.addf %630, %629 : vector<16x96xf32>
    %632 = arith.divf %630, %631 : vector<16x96xf32>
    %633 = vector.extract_strided_slice %626 {offsets = [0, 96], sizes = [16, 32], strides = [1, 1]} : vector<16x128xf32> to vector<16x32xf32>
    %634 = math.tanh %633 : vector<16x32xf32>
    %635 = vector.extract_strided_slice %632 {offsets = [0, 0], sizes = [16, 32], strides = [1, 1]} : vector<16x96xf32> to vector<16x32xf32>
    %636 = vector.extract_strided_slice %632 {offsets = [0, 32], sizes = [16, 32], strides = [1, 1]} : vector<16x96xf32> to vector<16x32xf32>
    %637 = vector.extract_strided_slice %632 {offsets = [0, 64], sizes = [16, 32], strides = [1, 1]} : vector<16x96xf32> to vector<16x32xf32>
    %638 = arith.mulf %636, %614 : vector<16x32xf32>
    %639 = arith.mulf %635, %634 : vector<16x32xf32>
    %640 = arith.addf %638, %639 : vector<16x32xf32>
    %641 = math.tanh %640 : vector<16x32xf32>
    %642 = arith.mulf %637, %641 : vector<16x32xf32>
    %643 = arith.truncf %642 : vector<16x32xf32> to vector<16x32xbf16>
    %644 = arith.index_cast %621 : i32 to index
    %c0_188 = arith.constant 0 : index
    %645 = vector.load %arg12[%644, %c0_188] : memref<128x32xbf16, #tpu.memory_space<vmem>>, vector<16x32xbf16>
    tpu.vector_store %arg12[%644, %c0_188], %643 {strides = array<i32>} : memref<128x32xbf16, #tpu.memory_space<vmem>>, vector<16x32xbf16>,
    %c7_i32_189 = arith.constant 7 : i32
    %c16_i32_190 = arith.constant 16 : i32
    %646 = arith.muli %c7_i32_189, %c16_i32_190 : i32
    %647 = tpu.assume_multiple %646, 16 : i32
    %648 = arith.index_cast %647 : i32 to index
    %c0_191 = arith.constant 0 : index
    %649 = vector.load %arg15[%648, %c0_191] : memref<128x128xf32, #tpu.memory_space<vmem>>, vector<16x128xf32>
    %650 = arith.truncf %642 : vector<16x32xf32> to vector<16x32xbf16>
    %cst_192 = arith.constant dense<0.000000e+00> : vector<16x128xf32>
    %651 = tpu.matmul %650, %459, %cst_192 {dimension_numbers = #tpu.dot_dimension_numbers<[1], [0], [0], [1], [0, 0, 1, 1], [], []>} : vector<16x32xbf16>, vector<32x128xbf16>, vector<16x128xf32> -> vector<16x128xf32>
    %652 = arith.addf %649, %651 : vector<16x128xf32>
    %653 = vector.extract_strided_slice %652 {offsets = [0, 0], sizes = [16, 96], strides = [1, 1]} : vector<16x128xf32> to vector<16x96xf32>
    %654 = arith.negf %653 : vector<16x96xf32>
    %655 = math.exp %654 : vector<16x96xf32>
    %cst_193 = arith.constant 1.000000e+00 : f32
    %656 = vector.broadcast %cst_193 : f32 to vector<16x96xf32>
    %657 = arith.addf %656, %655 : vector<16x96xf32>
    %658 = arith.divf %656, %657 : vector<16x96xf32>
    %659 = vector.extract_strided_slice %652 {offsets = [0, 96], sizes = [16, 32], strides = [1, 1]} : vector<16x128xf32> to vector<16x32xf32>
    %660 = math.tanh %659 : vector<16x32xf32>
    %661 = vector.extract_strided_slice %658 {offsets = [0, 0], sizes = [16, 32], strides = [1, 1]} : vector<16x96xf32> to vector<16x32xf32>
    %662 = vector.extract_strided_slice %658 {offsets = [0, 32], sizes = [16, 32], strides = [1, 1]} : vector<16x96xf32> to vector<16x32xf32>
    %663 = vector.extract_strided_slice %658 {offsets = [0, 64], sizes = [16, 32], strides = [1, 1]} : vector<16x96xf32> to vector<16x32xf32>
    %664 = arith.mulf %662, %640 : vector<16x32xf32>
    %665 = arith.mulf %661, %660 : vector<16x32xf32>
    %666 = arith.addf %664, %665 : vector<16x32xf32>
    %667 = math.tanh %666 : vector<16x32xf32>
    %668 = arith.mulf %663, %667 : vector<16x32xf32>
    %669 = arith.truncf %668 : vector<16x32xf32> to vector<16x32xbf16>
    %670 = arith.index_cast %647 : i32 to index
    %c0_194 = arith.constant 0 : index
    %671 = vector.load %arg12[%670, %c0_194] : memref<128x32xbf16, #tpu.memory_space<vmem>>, vector<16x32xbf16>
    tpu.vector_store %arg12[%670, %c0_194], %669 {strides = array<i32>} : memref<128x32xbf16, #tpu.memory_space<vmem>>, vector<16x32xbf16>,
    %c8_i32_195 = arith.constant 8 : i32
    %c2_196 = arith.constant 2 : index
    %c0_197 = arith.constant 0 : index
    %c0_198 = arith.constant 0 : index
    %672 = vector.load %arg13[%c2_196, %c0_197, %c0_198] : memref<3x16x32xf32, #tpu.memory_space<vmem>>, vector<1x16x32xf32>
    %673 = vector.shape_cast %672 : vector<1x16x32xf32> to vector<16x32xf32>
    %674 = vector.shape_cast %668 : vector<16x32xf32> to vector<1x16x32xf32>
    tpu.vector_store %arg13[%c2_196, %c0_197, %c0_198], %674 {strides = array<i32>} : memref<3x16x32xf32, #tpu.memory_space<vmem>>, vector<1x16x32xf32>,
    %c2_199 = arith.constant 2 : index
    %c0_200 = arith.constant 0 : index
    %c0_201 = arith.constant 0 : index
    %675 = vector.load %arg14[%c2_199, %c0_200, %c0_201] : memref<3x16x32xf32, #tpu.memory_space<vmem>>, vector<1x16x32xf32>
    %676 = vector.shape_cast %675 : vector<1x16x32xf32> to vector<16x32xf32>
    %677 = vector.shape_cast %666 : vector<16x32xf32> to vector<1x16x32xf32>
    tpu.vector_store %arg14[%c2_199, %c0_200, %c0_201], %677 {strides = array<i32>} : memref<3x16x32xf32, #tpu.memory_space<vmem>>, vector<1x16x32xf32>,
    return
  }
}

</mosaic_0001>

<bundles_post_ra>
// kernel: tpu_custom_call.1
= control target key start
LH: loop header
LB: loop body
LE: loop exit
PB: predicated region body
PF: predicated region fallthrough
CT: control target
= control target key end

     0   :  { %20 = vsyncpa [#allocation5], 0  ;;  %s5559_s0 = inlined_call_operand.vmem [shape: bf16[128,32], index: 0, kind: input, shape index: {}]   ;;  %s5560_s1 = inlined_call_operand.vmem [shape: f32[3,16,32], index: 1, kind: input, shape index: {}]   ;;  %s5561_s2 = inlined_call_operand.hbm [shape: f32[3,16,32], index: 2, kind: input, shape index: {}]   ;;  %s5562_s3 = inlined_call_operand.vmem [shape: bf16[32,128], index: 3, kind: input, shape index: {}]   ;;  %s5563_s4 = inlined_call_operand.vmem [shape: bf16[32,128], index: 4, kind: input, shape index: {}]   ;;  %s5564_s5 = inlined_call_operand.vmem [shape: f32[1,128], index: 5, kind: input, shape index: {}]   ;;  %s5565_s6 = inlined_call_operand.hbm [shape: bf16[32,128], index: 6, kind: input, shape index: {}]   ;;  %s5566_s7 = inlined_call_operand.hbm [shape: bf16[32,128], index: 7, kind: input, shape index: {}]   ;;  %s5567_s8 = inlined_call_operand.vmem [shape: f32[1,128], index: 8, kind: input, shape index: {}]   ;;  %s5568_s9 = inlined_call_operand.hbm [shape: bf16[32,128], index: 9, kind: input, shape index: {}]   ;;  %s5569_s10 = inlined_call_operand.hbm [shape: bf16[32,128], index: 10, kind: input, shape index: {}]   ;;  %s5570_s11 = inlined_call_operand.vmem [shape: f32[1,128], index: 11, kind: input, shape index: {}]   ;;  %s5571_s12 = inlined_call_operand.vmem [shape: bf16[128,32], index: 12, kind: output, shape index: {0}]   ;;  %s5572_s13 = inlined_call_operand.hbm [shape: f32[3,16,32], index: 13, kind: output, shape index: {1}]   ;;  %s5573_s14 = inlined_call_operand.hbm [shape: f32[3,16,32], index: 14, kind: output, shape index: {2}]  }
   0x1   :  { %21 = vsyncpa [#allocation8], 0 }
   0x2   :  { %22 = vsyncpa [#allocation11], 0 }
   0x3   :  { %23 = vsyncpa [#allocation6], 0  ;;  %s52_s15 = sshll.u32 %s5565_s6, 4  ;;  %s53_s15 = int_to_ptr.hbm [resolvable:$true] %s52_s15 }
   0x4   :  { %24 = vsyncpa [#allocation15], 0  ;;  %s4390_s16 = smov [#allocation7]   ;;  %s80_s20 = sshll.u32 %s5568_s9, 4  ;;  %s81_s20 = int_to_ptr.hbm [resolvable:$true] %s80_s20 }
   0x5   :  { %s54_s17 = sshll.u32 %s4390_s16, 4  ;;  %s4391_s21 = smov 64   ;;  %s55_s17 = int_to_ptr.vmem [resolvable:$true] %s54_s17 }
   0x6   :  { %s4392_s22 = smov 4   ;;  %s4393_s23 = smov [#allocation10]  }
   0x7   :  { %60 = dma.hbm_to_vmem [thread:$0]  %s53_s15, 256, %s55_s17, [#allocation8], %s4391_s21, %s4391_s21, %s4392_s22  }
   0x8   :  { %s82_s24 = sshll.u32 %s4393_s23, 4  ;;  %s33_s26 = sshll.u32 %s5561_s2, 4  ;;  %s83_s24 = int_to_ptr.vmem [resolvable:$true] %s82_s24  ;;  %s34_s26 = int_to_ptr.hbm [resolvable:$true] %s33_s26 }
   0x9   :  { %88 = dma.hbm_to_vmem [thread:$0]  %s81_s20, 256, %s83_s24, [#allocation11], %s4391_s21, %s4391_s21, %s4392_s22  }
   0xa   :  { %s4394_s9 = smov [#allocation4]   ;;  %s65_s30 = sshll.u32 %s5566_s7, 4  ;;  %s66_s30 = int_to_ptr.hbm [resolvable:$true] %s65_s30 }
   0xb   :  { %s35_s27 = sshll.u32 %s4394_s9, 4  ;;  %s4395_s15 = smov 128   ;;  %s36_s27 = int_to_ptr.vmem [resolvable:$true] %s35_s27 }
   0xc   :  { %s4396_s16 = smov 8   ;;  %s4397_s2 = smov [#allocation9]  }
   0xd   :  { %41 = dma.hbm_to_vmem [thread:$0]  %s34_s26, 768, %s36_s27, [#allocation5], %s4395_s15, %s4395_s15, %s4396_s16  }
   0xe   :  { %s67_s17 = sshll.u32 %s4397_s2, 4  ;;  %s93_s20 = sshll.u32 %s5569_s10, 4  ;;  %s68_s17 = int_to_ptr.vmem [resolvable:$true] %s67_s17  ;;  %s94_s20 = int_to_ptr.hbm [resolvable:$true] %s93_s20 }
   0xf   :  { %73 = dma.hbm_to_vmem [thread:$0]  %s66_s30, 256, %s68_s17, [#allocation8], %s4391_s21, %s4391_s21, %s4392_s22  }
  0x10   :  { %s4398_s7 = smov [#allocation12]  }
  0x11   :  { %s95_s23 = sshll.u32 %s4398_s7, 4  ;;  %s96_s23 = int_to_ptr.vmem [resolvable:$true] %s95_s23 }
  0x12   :  { %101 = dma.hbm_to_vmem [thread:$0]  %s94_s20, 256, %s96_s23, [#allocation11], %s4391_s21, %s4391_s21, %s4392_s22  }
  0x13   :  { %4380 = dma.done.wait [#allocation5], 768  }
  0x14   :  { %4381 = vsyncadd [#allocation5], 4294966528 }
  0x15   :  { %4382 = dma.done.wait [#allocation8], 512  }
  0x16   :  { %4383 = vsyncadd [#allocation8], 4294966784 }
  0x17   :  { %4384 = dma.done.wait [#allocation11], 512  }
  0x18   :  { %4385 = vsyncadd [#allocation11], 4294966784  ;;  %v3781_v0 = vld [vmem:[%s5562_s3 + $0x8] sm:$0xff]  ;;  %v3780_v1 = vld [vmem:[%s5562_s3] sm:$0xff]  ;;  %vm201_vm0 = vcmask 261120   ;;  %s4399_s3 = smov 32  }
  0x19   :  { %v4517_v2 = vld [vmem:[%s5563_s4 + $0x8] sm:$0xff]  ;;  %232 = vmatpush.bf16.msra.mxu0 %v3781_v0  ;;  %v3772_v3 = vld [vmem:[%s5559_s0] sm:$0xff]  ;;  %v3774_v5 = vld [vmem:[%s5559_s0 + $0x10] sm:$0xff]  ;;  %s4402_s18 = smov [#allocation13]  }
  0x1a   :  { %445 = vmatpush.bf16.msra.mxu2 %v4517_v2  ;;  %559 = vmatpush.bf16.msra.mxu3 %v4517_v2  ;;  %v3773_v4 = vld [vmem:[%s5559_s0 + $0x8] sm:$0xff]  ;;  %v4537_v6 = vld [vmem:[%s5563_s4] sm:$0xff]  ;;  %v3775_v7 = vld [vmem:[%s5559_s0 + $0x18] sm:$0xff]  ;;  %s3477_s19 = sshll.u32 %s4402_s18, 4  ;;  %s3478_s19 = int_to_ptr.vmem [resolvable:$true] %s3477_s19 }
  0x1b   :  { %v3776_v8 = vld [vmem:[%s5559_s0 + $0x20] sm:$0xff]  ;;  %v3777_v9 = vld [vmem:[%s5559_s0 + $0x28] sm:$0xff]  ;;  %v3778_v10 = vld [vmem:[%s5559_s0 + $0x30] sm:$0xff] }
  0x1c   :  { %v3779_v11 = vld [vmem:[%s5559_s0 + $0x38] sm:$0xff]  ;;  %v295_v12 = vld [vmem:[%s5560_s1] sm:$0xff]  ;;  %v296_v13 = vld [vmem:[%s5560_s1 + $0x8] sm:$0xff] }
  0x1d   :  { %233 = vmatpush.bf16.msra.mxu0 %v3780_v1  ;;  %v301_v14 = vpack.c.bf16 %v296_v13, %v295_v12  ;;  %v297_v17 = vld [vmem:[#allocation4] sm:$0xff]  ;;  %v298_v19 = vld [vmem:[#allocation4 + $0x8] sm:$0xff] }
  0x1e   :  { %446 = vmatpush.bf16.msra.mxu2 %v4537_v6  ;;  %560 = vmatpush.bf16.msra.mxu3 %v4537_v6  ;;  %v4606_v33 = vld [vmem:[%s5564_s5] ss:$0 sm:$0xff] }
  0x1f   :  { %375 = vrot.lane.b32.xlu1 %v297_v17, %s4399_s3 }
  0x20   :  { %3554 = vmatmul.msk.bf16.vlgmr.msra.gmra.mxu0 %vm201_vm0, %v3772_v3 }
  0x21   :  { %323 = vmatpush.bf16.msrb.mxu0 %v4517_v2 }
  0x22   :  { %673 = vmatpush.bf16.msrb.mxu2 %v4517_v2  ;;  %901 = vmatpush.bf16.msrb.mxu3 %v4517_v2 }
  0x25   :  { %324 = vmatpush.bf16.msrb.mxu0 %v4537_v6 }
  0x26   :  { %674 = vmatpush.bf16.msrb.mxu2 %v4537_v6  ;;  %902 = vmatpush.bf16.msrb.mxu3 %v4537_v6 }
  0x27   :  { %377 = vrot.lane.b32.xlu1 %v298_v19, %s4399_s3 }
  0x30   :  { %3555 = vmatmul.msk.bf16.gmra.mxu0 %vm201_vm0, %v3773_v4 }
  0x40   :  { %3556 = vmatmul.msk.bf16.gmra.mxu0 %vm201_vm0, %v3774_v5 }
  0x50   :  { %3557 = vmatmul.msk.bf16.gmra.mxu0 %vm201_vm0, %v3775_v7 }
  0x60   :  { %3558 = vmatmul.msk.bf16.gmra.mxu0 %vm201_vm0, %v3776_v8 }
  0x70   :  { %3559 = vmatmul.msk.bf16.gmra.mxu0 %vm201_vm0, %v3777_v9 }
  0x80   :  { %3560 = vmatmul.msk.bf16.gmra.mxu0 %vm201_vm0, %v3778_v10 }
  0x90   :  { %3561 = vmatmul.msk.bf16.gmra.mxu0 %vm201_vm0, %v3779_v11 }
  0x91   :  { %v376_v10 = vpop.permute.xlu1 %375 }
  0x9d   :  { %v235_v15 = vpop.f32.mrf.mxu0 }
  0x9e   :  { %v236_v34 = vadd.f32 %v4606_v33, %v235_v15 }
  0xa0   :  { %3570 = vmatmul.msk.bf16.vlgmr.msrb.gmra.mxu0 %vm201_vm0, %v301_v14  ;;  %v378_v14 = vpop.permute.xlu1 %377 }
  0xa5   :  { %v237_v16 = vpop.f32.mrf.mxu0 }
  0xa6   :  { %v238_v37 = vadd.f32 %v4606_v33, %v237_v16 }
  0xad   :  { %v4574_v18 = vpop.f32.mrf.mxu0 }
  0xb5   :  { %v4577_v20 = vpop.f32.mrf.mxu0 }
  0xbd   :  { %v4579_v21 = vpop.f32.mrf.mxu0 }
  0xc5   :  { %v4581_v22 = vpop.f32.mrf.mxu0 }
  0xcd   :  { %v4583_v23 = vpop.f32.mrf.mxu0 }
  0xd5   :  { %v4585_v24 = vpop.f32.mrf.mxu0 }
  0xdd   :  { %v4587_v25 = vpop.f32.mrf.mxu0 }
  0xe5   :  { %v4589_v26 = vpop.f32.mrf.mxu0 }
  0xed   :  { %v4591_v27 = vpop.f32.mrf.mxu0 }
  0xf5   :  { %v4593_v28 = vpop.f32.mrf.mxu0 }
  0xfd   :  { %v4595_v29 = vpop.f32.mrf.mxu0 }
 0x105   :  { %v4597_v30 = vpop.f32.mrf.mxu0 }
 0x10d   :  { %v4599_v31 = vpop.f32.mrf.mxu0 }
 0x115   :  { %v4601_v32 = vpop.f32.mrf.mxu0 }
 0x11d   :  { %v326_v35 = vpop.f32.mrf.mxu0 }
 0x11e   :  { %v331_v36 = vadd.f32 %v326_v35, %v236_v34 }
 0x120   :  { %3824 = vtanh.f32 %v331_v36  ;;  %v3571_v42 = vmul.f32 -1.442695, %v331_v36 }
 0x125   :  { %v328_v38 = vpop.f32.mrf.mxu0 }
 0x126   :  { %v3825_v39 = vpop.eup %3824  ;;  %v332_v40 = vadd.f32 %v328_v38, %v238_v37 }
 0x127   :  { %385 = vrot.lane.b32.xlu0 %v3825_v39, %s4399_s3 }
 0x128   :  { %3826 = vtanh.f32 %v332_v40  ;;  %v3572_v43 = vmul.f32 -1.442695, %v332_v40 }
 0x129   :  { %3828 = vpow2.f32 %v3571_v42 }
 0x12a   :  { %3830 = vpow2.f32 %v3572_v43 }
 0x12e   :  { %v3827_v41 = vpop.eup %3826 }
 0x12f   :  { %387 = vrot.lane.b32.xlu0 %v3827_v41, %s4399_s3  ;;  %v3829_v44 = vpop.eup %3828 }
 0x130   :  { %v339_v45 = vadd.f32 1.0, %v3829_v44  ;;  %v3831_v46 = vpop.eup %3830 }
 0x131   :  { %v340_v47 = vadd.f32 1.0, %v3831_v46 }
 0x132   :  { %3832 = vrcp.f32 %v339_v45  ;;  %v352_v56 = vand.u32 2147483648, %v339_v45  ;;  %vm346_vm2 = vweird.f32 %v339_v45  ;;  %v350_v57 = vand.u32 2147483647, %v339_v45 }
 0x133   :  { %3834 = vrcp.f32 %v340_v47  ;;  %v367_v1 = vand.u32 2147483648, %v340_v47  ;;  %vm361_vm6 = vweird.f32 %v340_v47  ;;  %v365_v3 = vand.u32 2147483647, %v340_v47 }
 0x134   :  { %v353_v60 = vor.u32 1.1754944e-38, %v352_v56  ;;  %vm351_vm4 = vcmp.eq.f32.partialorder %v350_v57, 8.507059e+37 }
 0x135   :  { %v368_v5 = vor.u32 1.1754944e-38, %v367_v1  ;;  %vm366_vm8 = vcmp.eq.f32.partialorder %v365_v3, 8.507059e+37 }
 0x138   :  { %v3833_v48 = vpop.eup %3832 }
 0x139   :  { %v342_v49 = vmul.f32 %v3833_v48, %v339_v45  ;;  %v3835_v51 = vpop.eup %3834  ;;  %vm347_vm1 = vweird.f32 %v3833_v48  ;;  %v241_v45 = vadd.f32 %v4606_v33, %v4574_v18 }
 0x13a   :  { %v357_v53 = vmul.f32 %v3835_v51, %v340_v47  ;;  %vm348_vm3 = vmor %vm346_vm2, %vm347_vm1  ;;  %vm362_vm5 = vweird.f32 %v3835_v51 }
 0x13b   :  { %v343_v50 = vsub.f32 1.0, %v342_v49  ;;  %vm363_vm7 = vmor %vm361_vm6, %vm362_vm5 }
 0x13c   :  { %v358_v55 = vsub.f32 1.0, %v357_v53 }
 0x13d   :  { %v344_v52 = vmul.f32 %v3833_v48, %v343_v50 }
 0x13e   :  { %v359_v59 = vmul.f32 %v3835_v51, %v358_v55 }
 0x13f   :  { %v345_v54 = vadd.f32 %v3833_v48, %v344_v52 }
 0x140   :  { %v360_v63 = vadd.f32 %v3835_v51, %v359_v59 }
 0x141   :  { %v349_v58 = vsel %vm348_vm3, %v3833_v48, %v345_v54  ;;  %v243_v48 = vadd.f32 %v4606_v33, %v4577_v20 }
 0x142   :  { %v354_v61 = vsel %vm351_vm4, %v353_v60, %v349_v58  ;;  %v364_v4 = vsel %vm363_vm7, %v3835_v51, %v360_v63 }
 0x143   :  { %v369_v7 = vsel %vm366_vm8, %v368_v5, %v364_v4  ;;  %v381_v11 = vmul.f32 %v376_v10, %v354_v61 }
 0x144   :  { %v382_v15 = vmul.f32 %v378_v14, %v369_v7 }
 0x199   :  { %v386_v62 = vpop.permute.xlu0 %385 }
 0x19a   :  { %v391_v0 = vmul.f32 %v386_v62, %v354_v61 }
 0x19c   :  { %395 = vrot.lane.b32.xlu2 %v391_v0, %s4399_s3 }
 0x1a1   :  { %v388_v8 = vpop.permute.xlu0 %387 }
 0x1a2   :  { %v392_v9 = vmul.f32 %v388_v8, %v369_v7 }
 0x1a4   :  { %397 = vrot.lane.b32.xlu2 %v392_v9, %s4399_s3 }
 0x1f6   :  { %v396_v12 = vpop.permute.xlu2 %395 }
 0x1f7   :  { %v4614_v13 = vadd.f32 %v396_v12, %v381_v11 }
 0x1f9   :  { %3836 = vtanh.f32 %v4614_v13 }
 0x1fe   :  { %v398_v16 = vpop.permute.xlu2 %397 }
 0x1ff   :  { %v3837_v17 = vpop.eup %3836  ;;  %v4617_v19 = vadd.f32 %v398_v16, %v382_v15 }
 0x200   :  { %407 = vrot.lane.b32.xlu0 %v3837_v17, %s4399_s3 }
 0x201   :  { %3838 = vtanh.f32 %v4617_v19 }
 0x207   :  { %v3839_v34 = vpop.eup %3838 }
 0x208   :  { %409 = vrot.lane.b32.xlu1 %v3839_v34, %s4399_s3 }
 0x272   :  { %v408_v35 = vpop.permute.xlu0 %407 }
 0x273   :  { %v413_v36 = vmul.f32 %v408_v35, %v354_v61 }
 0x275   :  { %v4622_v38 = vpack.c.bf16 %v413_v36, %v413_v36 }
 0x277   :  { %v431_v41 = vunpack.c.l.b16 %v4622_v38 }
 0x27a   :  { %v410_v37 = vpop.permute.xlu1 %409 }
 0x27b   :  { %v414_v39 = vmul.f32 %v410_v37, %v369_v7 }
 0x27d   :  { %v4624_v40 = vpack.c.bf16 %v414_v39, %v414_v39 }
 0x27f   :  { %v432_v42 = vunpack.c.l.b16 %v4624_v40 }
 0x281   :  { %v433_v43 = vpack.c.b16 %v432_v42, %v431_v41 }
 0x283   :  { %434 = vrot.lane.b32.xlu2 %v433_v43, %s4391_s21 }
 0x2dd   :  { %v435_v44 = vpop.permute.xlu2 %434 }
 0x2de   :  { %3573 = vmatmul.msk.bf16.vlgmr.msra.gmra.mxu2 %vm201_vm0, %v435_v44 }
 0x2df   :  { %787 = vmatpush.bf16.msra.mxu2 %v4517_v2 }
 0x2e3   :  { %788 = vmatpush.bf16.msra.mxu2 %v4537_v6 }
 0x361   :  { %v448_v46 = vpop.f32.mrf.mxu2 }
 0x362   :  { %v453_v47 = vadd.f32 %v448_v46, %v241_v45 }
 0x364   :  { %3840 = vtanh.f32 %v453_v47  ;;  %v3574_v53 = vmul.f32 -1.442695, %v453_v47 }
 0x369   :  { %v450_v49 = vpop.f32.mrf.mxu2 }
 0x36a   :  { %v3841_v50 = vpop.eup %3840  ;;  %v454_v51 = vadd.f32 %v450_v49, %v243_v48 }
 0x36b   :  { %499 = vrot.lane.b32.xlu0 %v3841_v50, %s4399_s3 }
 0x36c   :  { %3842 = vtanh.f32 %v454_v51  ;;  %v3575_v54 = vmul.f32 -1.442695, %v454_v51 }
 0x36d   :  { %3844 = vpow2.f32 %v3574_v53 }
 0x36e   :  { %3846 = vpow2.f32 %v3575_v54  ;;  %v246_v54 = vadd.f32 %v4606_v33, %v4579_v21 }
 0x372   :  { %v3843_v52 = vpop.eup %3842 }
 0x373   :  { %501 = vrot.lane.b32.xlu1 %v3843_v52, %s4399_s3  ;;  %v3845_v55 = vpop.eup %3844 }
 0x374   :  { %v461_v18 = vadd.f32 1.0, %v3845_v55  ;;  %v3847_v56 = vpop.eup %3846 }
 0x375   :  { %v462_v57 = vadd.f32 1.0, %v3847_v56  ;;  %v248_v56 = vadd.f32 %v4606_v33, %v4581_v22 }
 0x376   :  { %3848 = vrcp.f32 %v461_v18  ;;  %v474_v1 = vand.u32 2147483648, %v461_v18  ;;  %vm468_vm10 = vweird.f32 %v461_v18  ;;  %v472_v3 = vand.u32 2147483647, %v461_v18 }
 0x377   :  { %3850 = vrcp.f32 %v462_v57  ;;  %v489_v12 = vand.u32 2147483648, %v462_v57  ;;  %vm483_vm14 = vweird.f32 %v462_v57  ;;  %v487_v14 = vand.u32 2147483647, %v462_v57 }
 0x378   :  { %v475_v7 = vor.u32 1.1754944e-38, %v474_v1  ;;  %vm473_vm12 = vcmp.eq.f32.partialorder %v472_v3, 8.507059e+37 }
 0x379   :  { %v490_v16 = vor.u32 1.1754944e-38, %v489_v12  ;;  %vm488_vm1 = vcmp.eq.f32.partialorder %v487_v14, 8.507059e+37 }
 0x37c   :  { %v3849_v58 = vpop.eup %3848 }
 0x37d   :  { %v464_v20 = vmul.f32 %v3849_v58, %v461_v18  ;;  %v3851_v60 = vpop.eup %3850  ;;  %vm469_vm9 = vweird.f32 %v3849_v58 }
 0x37e   :  { %v479_v62 = vmul.f32 %v3851_v60, %v462_v57  ;;  %vm470_vm11 = vmor %vm468_vm10, %vm469_vm9  ;;  %vm484_vm13 = vweird.f32 %v3851_v60 }
 0x37f   :  { %v465_v59 = vsub.f32 1.0, %v464_v20  ;;  %vm485_vm15 = vmor %vm483_vm14, %vm484_vm13 }
 0x380   :  { %v480_v0 = vsub.f32 1.0, %v479_v62 }
 0x381   :  { %v466_v61 = vmul.f32 %v3849_v58, %v465_v59 }
 0x382   :  { %v481_v5 = vmul.f32 %v3851_v60, %v480_v0 }
 0x383   :  { %v467_v63 = vadd.f32 %v3849_v58, %v466_v61 }
 0x384   :  { %v482_v11 = vadd.f32 %v3851_v60, %v481_v5 }
 0x385   :  { %v471_v4 = vsel %vm470_vm11, %v3849_v58, %v467_v63 }
 0x386   :  { %v476_v9 = vsel %vm473_vm12, %v475_v7, %v471_v4  ;;  %v486_v15 = vsel %vm485_vm15, %v3851_v60, %v482_v11 }
 0x387   :  { %v491_v34 = vsel %vm488_vm1, %v490_v16, %v486_v15  ;;  %v495_v36 = vmul.f32 %v476_v9, %v4614_v13 }
 0x388   :  { %v496_v42 = vmul.f32 %v491_v34, %v4617_v19 }
 0x3dd   :  { %v500_v8 = vpop.permute.xlu0 %499 }
 0x3de   :  { %v505_v10 = vmul.f32 %v500_v8, %v476_v9 }
 0x3e0   :  { %509 = vrot.lane.b32.xlu2 %v505_v10, %s4399_s3 }
 0x3e5   :  { %v502_v17 = vpop.permute.xlu1 %501 }
 0x3e6   :  { %v506_v35 = vmul.f32 %v502_v17, %v491_v34 }
 0x3e8   :  { %511 = vrot.lane.b32.xlu0 %v506_v35, %s4399_s3 }
 0x43a   :  { %v510_v37 = vpop.permute.xlu2 %509 }
 0x43b   :  { %v4641_v39 = vadd.f32 %v510_v37, %v495_v36 }
 0x43d   :  { %3852 = vtanh.f32 %v4641_v39 }
 0x443   :  { %v3853_v41 = vpop.eup %3852 }
 0x444   :  { %521 = vrot.lane.b32.xlu1 %v3853_v41, %s4399_s3 }
 0x45a   :  { %v512_v43 = vpop.permute.xlu0 %511 }
 0x45b   :  { %v4646_v44 = vadd.f32 %v512_v43, %v496_v42 }
 0x45d   :  { %3854 = vtanh.f32 %v4646_v44 }
 0x463   :  { %v3855_v45 = vpop.eup %3854 }
 0x464   :  { %523 = vrot.lane.b32.xlu2 %v3855_v45, %s4399_s3 }
 0x4b6   :  { %v522_v46 = vpop.permute.xlu1 %521 }
 0x4b7   :  { %v527_v13 = vmul.f32 %v522_v46, %v476_v9 }
 0x4b9   :  { %v4650_v48 = vpack.c.bf16 %v527_v13, %v527_v13 }
 0x4bb   :  { %v545_v51 = vunpack.c.l.b16 %v4650_v48 }
 0x4be   :  { %v524_v47 = vpop.permute.xlu2 %523 }
 0x4bf   :  { %v528_v49 = vmul.f32 %v524_v47, %v491_v34 }
 0x4c1   :  { %v4652_v50 = vpack.c.bf16 %v528_v49, %v528_v49 }
 0x4c3   :  { %v546_v19 = vunpack.c.l.b16 %v4652_v50 }
 0x4c5   :  { %v547_v52 = vpack.c.b16 %v546_v19, %v545_v51 }
 0x4c7   :  { %548 = vrot.lane.b32.xlu0 %v547_v52, %s4391_s21 }
 0x539   :  { %v549_v53 = vpop.permute.xlu0 %548 }
 0x53a   :  { %3576 = vmatmul.msk.bf16.vlgmr.msra.gmra.mxu3 %vm201_vm0, %v549_v53 }
 0x53b   :  { %1015 = vmatpush.bf16.msra.mxu3 %v4517_v2 }
 0x53f   :  { %1016 = vmatpush.bf16.msra.mxu3 %v4537_v6 }
 0x5bd   :  { %v562_v55 = vpop.f32.mrf.mxu3 }
 0x5be   :  { %v567_v18 = vadd.f32 %v562_v55, %v246_v54 }
 0x5c0   :  { %3856 = vtanh.f32 %v567_v18  ;;  %v3577_v21 = vmul.f32 -1.442695, %v567_v18 }
 0x5c5   :  { %v564_v57 = vpop.f32.mrf.mxu3 }
 0x5c6   :  { %v3857_v58 = vpop.eup %3856  ;;  %v568_v20 = vadd.f32 %v564_v57, %v248_v56 }
 0x5c7   :  { %613 = vrot.lane.b32.xlu1 %v3857_v58, %s4399_s3 }
 0x5c8   :  { %3858 = vtanh.f32 %v568_v20  ;;  %v3578_v60 = vmul.f32 -1.442695, %v568_v20 }
 0x5ca   :  { %3860 = vpow2.f32 %v3578_v60 }
 0x5ce   :  { %v3859_v59 = vpop.eup %3858 }
 0x5cf   :  { %615 = vrot.lane.b32.xlu2 %v3859_v59, %s4399_s3 }
 0x5d0   :  { %v3861_v61 = vpop.eup %3860 }
 0x5d1   :  { %v576_v62 = vadd.f32 1.0, %v3861_v61  ;;  %v251_v61 = vadd.f32 %v4606_v33, %v4583_v23 }
 0x5d3   :  { %3862 = vrcp.f32 %v576_v62  ;;  %v603_v8 = vand.u32 2147483648, %v576_v62  ;;  %vm597_vm3 = vweird.f32 %v576_v62  ;;  %v601_v9 = vand.u32 2147483647, %v576_v62 }
 0x5d4   :  { %3864 = vpow2.f32 %v3577_v21 }
 0x5d5   :  { %v604_v12 = vor.u32 1.1754944e-38, %v603_v8  ;;  %vm602_vm5 = vcmp.eq.f32.partialorder %v601_v9, 8.507059e+37 }
 0x5d9   :  { %v3863_v63 = vpop.eup %3862 }
 0x5da   :  { %v3865_v0 = vpop.eup %3864  ;;  %v593_v1 = vmul.f32 %v3863_v63, %v576_v62  ;;  %vm598_vm2 = vweird.f32 %v3863_v63 }
 0x5db   :  { %v575_v22 = vadd.f32 1.0, %v3865_v0  ;;  %vm599_vm4 = vmor %vm597_vm3, %vm598_vm2 }
 0x5dc   :  { %v594_v3 = vsub.f32 1.0, %v593_v1 }
 0x5dd   :  { %3866 = vrcp.f32 %v575_v22  ;;  %v588_v36 = vand.u32 2147483648, %v575_v22  ;;  %vm582_vm7 = vweird.f32 %v575_v22  ;;  %v586_v37 = vand.u32 2147483647, %v575_v22 }
 0x5de   :  { %v595_v4 = vmul.f32 %v3863_v63, %v594_v3 }
 0x5df   :  { %v589_v42 = vor.u32 1.1754944e-38, %v588_v36  ;;  %vm587_vm9 = vcmp.eq.f32.partialorder %v586_v37, 8.507059e+37 }
 0x5e0   :  { %v596_v5 = vadd.f32 %v3863_v63, %v595_v4 }
 0x5e2   :  { %v600_v10 = vsel %vm599_vm4, %v3863_v63, %v596_v5  ;;  %v253_v63 = vadd.f32 %v4606_v33, %v4585_v24 }
 0x5e3   :  { %v3867_v7 = vpop.eup %3866  ;;  %v605_v15 = vsel %vm602_vm5, %v604_v12, %v600_v10 }
 0x5e4   :  { %v578_v11 = vmul.f32 %v3867_v7, %v575_v22  ;;  %vm583_vm6 = vweird.f32 %v3867_v7  ;;  %v610_v13 = vmul.f32 %v605_v15, %v4646_v44 }
 0x5e5   :  { %vm584_vm8 = vmor %vm582_vm7, %vm583_vm6 }
 0x5e6   :  { %v579_v17 = vsub.f32 1.0, %v578_v11 }
 0x5e8   :  { %v580_v34 = vmul.f32 %v3867_v7, %v579_v17 }
 0x5ea   :  { %v581_v35 = vadd.f32 %v3867_v7, %v580_v34 }
 0x5ec   :  { %v585_v41 = vsel %vm584_vm8, %v3867_v7, %v581_v35 }
 0x5ed   :  { %v590_v45 = vsel %vm587_vm9, %v589_v42, %v585_v41 }
 0x5ee   :  { %v609_v19 = vmul.f32 %v590_v45, %v4641_v39 }
 0x629   :  { %v616_v14 = vpop.permute.xlu2 %615 }
 0x62a   :  { %v620_v16 = vmul.f32 %v616_v14, %v605_v15 }
 0x62c   :  { %625 = vrot.lane.b32.xlu1 %v620_v16, %s4399_s3 }
 0x639   :  { %v614_v43 = vpop.permute.xlu1 %613 }
 0x63a   :  { %v619_v46 = vmul.f32 %v614_v43, %v590_v45 }
 0x63c   :  { %623 = vrot.lane.b32.xlu0 %v619_v46, %s4399_s3 }
 0x69e   :  { %v626_v47 = vpop.permute.xlu1 %625 }
 0x69f   :  { %v4669_v49 = vadd.f32 %v626_v47, %v610_v13 }
 0x6a1   :  { %3868 = vtanh.f32 %v4669_v49 }
 0x6a7   :  { %v3869_v51 = vpop.eup %3868 }
 0x6a8   :  { %637 = vrot.lane.b32.xlu0 %v3869_v51, %s4399_s3 }
 0x6ae   :  { %v624_v52 = vpop.permute.xlu0 %623 }
 0x6af   :  { %v4674_v53 = vadd.f32 %v624_v52, %v609_v19 }
 0x6b1   :  { %3870 = vtanh.f32 %v4674_v53 }
 0x6b7   :  { %v3871_v54 = vpop.eup %3870 }
 0x6b8   :  { %635 = vrot.lane.b32.xlu2 %v3871_v54, %s4399_s3 }
 0x712   :  { %v636_v55 = vpop.permute.xlu2 %635 }
 0x713   :  { %v641_v44 = vmul.f32 %v636_v55, %v590_v45 }
 0x715   :  { %v4678_v56 = vpack.c.bf16 %v641_v44, %v641_v44 }
 0x717   :  { %v659_v20 = vunpack.c.l.b16 %v4678_v56 }
 0x71a   :  { %v638_v18 = vpop.permute.xlu0 %637 }
 0x71b   :  { %v642_v57 = vmul.f32 %v638_v18, %v605_v15 }
 0x71d   :  { %v4680_v58 = vpack.c.bf16 %v642_v57, %v642_v57 }
 0x71f   :  { %v660_v39 = vunpack.c.l.b16 %v4680_v58 }
 0x721   :  { %v661_v59 = vpack.c.b16 %v660_v39, %v659_v20 }
 0x723   :  { %662 = vrot.lane.b32.xlu1 %v661_v59, %s4391_s21 }
 0x795   :  { %v663_v60 = vpop.permute.xlu1 %662 }
 0x796   :  { %3579 = vmatmul.msk.bf16.vlgmr.msrb.gmra.mxu2 %vm201_vm0, %v663_v60 }
 0x797   :  { %1129 = vmatpush.bf16.msrb.mxu2 %v4517_v2 }
 0x79b   :  { %1130 = vmatpush.bf16.msrb.mxu2 %v4537_v6 }
 0x819   :  { %v676_v62 = vpop.f32.mrf.mxu2 }
 0x81a   :  { %v681_v21 = vadd.f32 %v676_v62, %v251_v61 }
 0x81c   :  { %3872 = vtanh.f32 %v681_v21  ;;  %v3580_v2 = vmul.f32 -1.442695, %v681_v21 }
 0x821   :  { %v678_v0 = vpop.f32.mrf.mxu2 }
 0x822   :  { %v3873_v1 = vpop.eup %3872  ;;  %v682_v22 = vadd.f32 %v678_v0, %v253_v63 }
 0x823   :  { %727 = vrot.lane.b32.xlu2 %v3873_v1, %s4399_s3 }
 0x824   :  { %3874 = vtanh.f32 %v682_v22  ;;  %v3581_v8 = vmul.f32 -1.442695, %v682_v22 }
 0x825   :  { %3876 = vpow2.f32 %v3580_v2 }
 0x82a   :  { %v3875_v3 = vpop.eup %3874 }
 0x82b   :  { %729 = vrot.lane.b32.xlu0 %v3875_v3, %s4399_s3  ;;  %v3877_v6 = vpop.eup %3876  ;;  %v256_v3 = vadd.f32 %v4606_v33, %v4587_v25 }
 0x82c   :  { %v689_v4 = vadd.f32 1.0, %v3877_v6 }
 0x82e   :  { %3878 = vrcp.f32 %v689_v4  ;;  %v702_v10 = vand.u32 2147483648, %v689_v4  ;;  %vm696_vm11 = vweird.f32 %v689_v4  ;;  %v700_v11 = vand.u32 2147483647, %v689_v4 }
 0x82f   :  { %3880 = vpow2.f32 %v3581_v8 }
 0x830   :  { %v703_v15 = vor.u32 1.1754944e-38, %v702_v10  ;;  %vm701_vm13 = vcmp.eq.f32.partialorder %v700_v11, 8.507059e+37 }
 0x834   :  { %v3879_v23 = vpop.eup %3878 }
 0x835   :  { %v692_v5 = vmul.f32 %v3879_v23, %v689_v4  ;;  %vm697_vm10 = vweird.f32 %v3879_v23  ;;  %v3881_v12 = vpop.eup %3880  ;;  %v258_v4 = vadd.f32 %v4606_v33, %v4589_v26 }
 0x836   :  { %vm698_vm12 = vmor %vm696_vm11, %vm697_vm10  ;;  %v690_v16 = vadd.f32 1.0, %v3881_v12 }
 0x837   :  { %v693_v7 = vsub.f32 1.0, %v692_v5 }
 0x838   :  { %3882 = vrcp.f32 %v690_v16  ;;  %v717_v45 = vand.u32 2147483648, %v690_v16  ;;  %vm711_vm15 = vweird.f32 %v690_v16  ;;  %v715_v46 = vand.u32 2147483647, %v690_v16 }
 0x839   :  { %v694_v9 = vmul.f32 %v3879_v23, %v693_v7 }
 0x83a   :  { %v718_v47 = vor.u32 1.1754944e-38, %v717_v45  ;;  %vm716_vm2 = vcmp.eq.f32.partialorder %v715_v46, 8.507059e+37 }
 0x83b   :  { %v695_v24 = vadd.f32 %v3879_v23, %v694_v9 }
 0x83d   :  { %v699_v14 = vsel %vm698_vm12, %v3879_v23, %v695_v24 }
 0x83e   :  { %v704_v34 = vsel %vm701_vm13, %v703_v15, %v699_v14  ;;  %v3883_v36 = vpop.eup %3882 }
 0x83f   :  { %v707_v37 = vmul.f32 %v3883_v36, %v690_v16  ;;  %vm712_vm14 = vweird.f32 %v3883_v36  ;;  %v723_v54 = vmul.f32 %v704_v34, %v4674_v53 }
 0x840   :  { %vm713_vm1 = vmor %vm711_vm15, %vm712_vm14 }
 0x841   :  { %v708_v41 = vsub.f32 1.0, %v707_v37 }
 0x843   :  { %v709_v42 = vmul.f32 %v3883_v36, %v708_v41 }
 0x845   :  { %v710_v43 = vadd.f32 %v3883_v36, %v709_v42 }
 0x847   :  { %v714_v13 = vsel %vm713_vm1, %v3883_v36, %v710_v43 }
 0x848   :  { %v719_v19 = vsel %vm716_vm2, %v718_v47, %v714_v13 }
 0x849   :  { %v724_v18 = vmul.f32 %v719_v19, %v4669_v49 }
 0x87d   :  { %v728_v17 = vpop.permute.xlu2 %727 }
 0x87e   :  { %v733_v35 = vmul.f32 %v728_v17, %v704_v34 }
 0x880   :  { %737 = vrot.lane.b32.xlu1 %v733_v35, %s4399_s3 }
 0x89d   :  { %v730_v51 = vpop.permute.xlu0 %729 }
 0x89e   :  { %v734_v52 = vmul.f32 %v730_v51, %v719_v19 }
 0x8a0   :  { %739 = vrot.lane.b32.xlu2 %v734_v52, %s4399_s3 }
 0x8f2   :  { %v738_v55 = vpop.permute.xlu1 %737 }
 0x8f3   :  { %v4697_v44 = vadd.f32 %v738_v55, %v723_v54 }
 0x8f5   :  { %3884 = vtanh.f32 %v4697_v44 }
 0x8fa   :  { %v740_v57 = vpop.permute.xlu2 %739 }
 0x8fb   :  { %v3885_v20 = vpop.eup %3884  ;;  %v4701_v39 = vadd.f32 %v740_v57, %v724_v18 }
 0x8fc   :  { %749 = vrot.lane.b32.xlu0 %v3885_v20, %s4399_s3 }
 0x8fd   :  { %3886 = vtanh.f32 %v4701_v39 }
 0x903   :  { %v3887_v59 = vpop.eup %3886 }
 0x904   :  { %751 = vrot.lane.b32.xlu1 %v3887_v59, %s4399_s3 }
 0x96e   :  { %v750_v60 = vpop.permute.xlu0 %749 }
 0x96f   :  { %v755_v53 = vmul.f32 %v750_v60, %v704_v34 }
 0x971   :  { %v4706_v62 = vpack.c.bf16 %v755_v53, %v755_v53 }
 0x973   :  { %v773_v49 = vunpack.c.l.b16 %v4706_v62 }
 0x976   :  { %v752_v61 = vpop.permute.xlu1 %751 }
 0x977   :  { %v756_v21 = vmul.f32 %v752_v61, %v719_v19 }
 0x979   :  { %v4708_v63 = vpack.c.bf16 %v756_v21, %v756_v21 }
 0x97b   :  { %v774_v0 = vunpack.c.l.b16 %v4708_v63 }
 0x97d   :  { %v775_v1 = vpack.c.b16 %v774_v0, %v773_v49 }
 0x97f   :  { %776 = vrot.lane.b32.xlu2 %v775_v1, %s4391_s21 }
 0x9d9   :  { %v777_v22 = vpop.permute.xlu2 %776 }
 0x9da   :  { %3582 = vmatmul.msk.bf16.vlgmr.msra.gmra.mxu2 %vm201_vm0, %v777_v22 }
 0xa5d   :  { %v790_v2 = vpop.f32.mrf.mxu2 }
 0xa5e   :  { %v795_v6 = vadd.f32 %v790_v2, %v256_v3 }
 0xa60   :  { %3888 = vtanh.f32 %v795_v6  ;;  %v3583_v9 = vmul.f32 -1.442695, %v795_v6 }
 0xa65   :  { %v792_v23 = vpop.f32.mrf.mxu2 }
 0xa66   :  { %v3889_v5 = vpop.eup %3888  ;;  %v796_v7 = vadd.f32 %v792_v23, %v258_v4 }
 0xa67   :  { %841 = vrot.lane.b32.xlu0 %v3889_v5, %s4399_s3 }
 0xa68   :  { %3890 = vtanh.f32 %v796_v7  ;;  %v3584_v24 = vmul.f32 -1.442695, %v796_v7 }
 0xa69   :  { %3892 = vpow2.f32 %v3583_v9 }
 0xa6a   :  { %3894 = vpow2.f32 %v3584_v24 }
 0xa6e   :  { %v3891_v8 = vpop.eup %3890 }
 0xa6f   :  { %843 = vrot.lane.b32.xlu1 %v3891_v8, %s4399_s3  ;;  %v3893_v10 = vpop.eup %3892  ;;  %v261_v8 = vadd.f32 %v4606_v33, %v4591_v27 }
 0xa70   :  { %v803_v25 = vadd.f32 1.0, %v3893_v10  ;;  %v3895_v11 = vpop.eup %3894  ;;  %v263_v10 = vadd.f32 %v4606_v33, %v4593_v28 }
 0xa71   :  { %v804_v12 = vadd.f32 1.0, %v3895_v11 }
 0xa72   :  { %3896 = vrcp.f32 %v803_v25  ;;  %v816_v37 = vand.u32 2147483648, %v803_v25  ;;  %vm810_vm4 = vweird.f32 %v803_v25  ;;  %v814_v41 = vand.u32 2147483647, %v803_v25 }
 0xa73   :  { %3898 = vrcp.f32 %v804_v12  ;;  %v831_v19 = vand.u32 2147483648, %v804_v12  ;;  %vm825_vm8 = vweird.f32 %v804_v12  ;;  %v829_v52 = vand.u32 2147483647, %v804_v12 }
 0xa74   :  { %v817_v45 = vor.u32 1.1754944e-38, %v816_v37  ;;  %vm815_vm6 = vcmp.eq.f32.partialorder %v814_v41, 8.507059e+37 }
 0xa75   :  { %v832_v55 = vor.u32 1.1754944e-38, %v831_v19  ;;  %vm830_vm10 = vcmp.eq.f32.partialorder %v829_v52, 8.507059e+37 }
 0xa78   :  { %v3897_v14 = vpop.eup %3896 }
 0xa79   :  { %v806_v26 = vmul.f32 %v3897_v14, %v803_v25  ;;  %v3899_v16 = vpop.eup %3898  ;;  %vm811_vm3 = vweird.f32 %v3897_v14 }
 0xa7a   :  { %v821_v34 = vmul.f32 %v3899_v16, %v804_v12  ;;  %vm812_vm5 = vmor %vm810_vm4, %vm811_vm3  ;;  %vm826_vm7 = vweird.f32 %v3899_v16  ;;  %vm425_vm4 = vcmask 257024  }
 0xa7b   :  { %v807_v15 = vsub.f32 1.0, %v806_v26  ;;  %vm827_vm9 = vmor %vm825_vm8, %vm826_vm7 }
 0xa7c   :  { %v822_v36 = vsub.f32 1.0, %v821_v34 }
 0xa7d   :  { %v808_v17 = vmul.f32 %v3897_v14, %v807_v15 }
 0xa7e   :  { %v823_v43 = vmul.f32 %v3899_v16, %v822_v36 }
 0xa7f   :  { %v809_v35 = vadd.f32 %v3897_v14, %v808_v17 }
 0xa80   :  { %v824_v51 = vadd.f32 %v3899_v16, %v823_v43 }
 0xa81   :  { %v813_v42 = vsel %vm812_vm5, %v3897_v14, %v809_v35 }
 0xa82   :  { %v818_v13 = vsel %vm815_vm6, %v817_v45, %v813_v42  ;;  %v828_v54 = vsel %vm827_vm9, %v3899_v16, %v824_v51 }
 0xa83   :  { %v833_v57 = vsel %vm830_vm10, %v832_v55, %v828_v54  ;;  %v837_v59 = vmul.f32 %v818_v13, %v4697_v44 }
 0xa84   :  { %v838_v21 = vmul.f32 %v833_v57, %v4701_v39 }
 0xad9   :  { %v842_v46 = vpop.permute.xlu0 %841 }
 0xada   :  { %v847_v47 = vmul.f32 %v842_v46, %v818_v13 }
 0xadc   :  { %851 = vrot.lane.b32.xlu2 %v847_v47, %s4399_s3 }
 0xae1   :  { %v844_v18 = vpop.permute.xlu1 %843 }
 0xae2   :  { %v848_v20 = vmul.f32 %v844_v18, %v833_v57 }
 0xae4   :  { %853 = vrot.lane.b32.xlu0 %v848_v20, %s4399_s3 }
 0xb36   :  { %v852_v60 = vpop.permute.xlu2 %851 }
 0xb37   :  { %v4723_v53 = vadd.f32 %v852_v60, %v837_v59 }
 0xb39   :  { %3900 = vtanh.f32 %v4723_v53 }
 0xb3f   :  { %v3901_v61 = vpop.eup %3900 }
 0xb40   :  { %863 = vrot.lane.b32.xlu1 %v3901_v61, %s4399_s3 }
 0xb56   :  { %v854_v49 = vpop.permute.xlu0 %853 }
 0xb57   :  { %v4728_v0 = vadd.f32 %v854_v49, %v838_v21 }
 0xb59   :  { %3902 = vtanh.f32 %v4728_v0 }
 0xb5f   :  { %v3903_v1 = vpop.eup %3902 }
 0xb60   :  { %865 = vrot.lane.b32.xlu2 %v3903_v1, %s4399_s3 }
 0xbb2   :  { %v864_v22 = vpop.permute.xlu1 %863 }
 0xbb3   :  { %v869_v44 = vmul.f32 %v864_v22, %v818_v13 }
 0xbb5   :  { %v4732_v2 = vpack.c.bf16 %v869_v44, %v869_v44 }
 0xbb7   :  { %v887_v23 = vunpack.c.l.b16 %v4732_v2 }
 0xbba   :  { %v866_v3 = vpop.permute.xlu2 %865 }
 0xbbb   :  { %v870_v6 = vmul.f32 %v866_v3, %v833_v57 }
 0xbbd   :  { %v4734_v4 = vpack.c.bf16 %v870_v6, %v870_v6 }
 0xbbf   :  { %v888_v39 = vunpack.c.l.b16 %v4734_v4 }
 0xbc1   :  { %v889_v5 = vpack.c.b16 %v888_v39, %v887_v23 }
 0xbc3   :  { %890 = vrot.lane.b32.xlu0 %v889_v5, %s4391_s21 }
 0xc35   :  { %v891_v7 = vpop.permute.xlu0 %890 }
 0xc36   :  { %3585 = vmatmul.msk.bf16.vlgmr.msrb.gmra.mxu3 %vm201_vm0, %v891_v7 }
 0xcb9   :  { %v904_v9 = vpop.f32.mrf.mxu3 }
 0xcba   :  { %v909_v24 = vadd.f32 %v904_v9, %v261_v8 }
 0xcbc   :  { %3904 = vtanh.f32 %v909_v24  ;;  %v3586_v27 = vmul.f32 -1.442695, %v909_v24 }
 0xcc1   :  { %v906_v25 = vpop.f32.mrf.mxu3 }
 0xcc2   :  { %v3905_v11 = vpop.eup %3904  ;;  %v910_v12 = vadd.f32 %v906_v25, %v263_v10 }
 0xcc3   :  { %955 = vrot.lane.b32.xlu1 %v3905_v11, %s4399_s3 }
 0xcc4   :  { %3906 = vtanh.f32 %v910_v12  ;;  %v3587_v26 = vmul.f32 -1.442695, %v910_v12  ;;  %v4771_v12 = vld [vmem:[#allocation9 + $0x8] sm:$0xff] }
 0xcc5   :  { %1445 = vmatpush.bf16.msra.mxu1 %v4771_v12  ;;  %1565 = vmatpush.bf16.msra.mxu2 %v4771_v12 }
 0xcc6   :  { %3908 = vpow2.f32 %v3587_v26  ;;  %v4774_v26 = vld [vmem:[#allocation9] sm:$0xff] }
 0xcc9   :  { %1446 = vmatpush.bf16.msra.mxu1 %v4774_v26  ;;  %1566 = vmatpush.bf16.msra.mxu2 %v4774_v26 }
 0xcca   :  { %v3907_v14 = vpop.eup %3906 }
 0xccb   :  { %957 = vrot.lane.b32.xlu2 %v3907_v14, %s4399_s3  ;;  %v3792_v14 = vld [vmem:[#allocation7] sm:$0xff] }
 0xccc   :  { %v3909_v15 = vpop.eup %3908 }
 0xccd   :  { %v918_v16 = vadd.f32 1.0, %v3909_v15  ;;  %1677 = vmatpush.bf16.msrb.mxu1 %v4771_v12  ;;  %v3642_v15 = vld [vmem:[%s5560_s1 + $0x10] sm:$0xff] }
 0xccf   :  { %3910 = vrcp.f32 %v918_v16  ;;  %v945_v42 = vand.u32 2147483648, %v918_v16  ;;  %vm939_vm12 = vweird.f32 %v918_v16  ;;  %v943_v43 = vand.u32 2147483647, %v918_v16 }
 0xcd0   :  { %3912 = vpow2.f32 %v3586_v27 }
 0xcd1   :  { %v946_v13 = vor.u32 1.1754944e-38, %v945_v42  ;;  %vm944_vm14 = vcmp.eq.f32.partialorder %v943_v43, 8.507059e+37  ;;  %1678 = vmatpush.bf16.msrb.mxu1 %v4774_v26 }
 0xcd5   :  { %v3911_v17 = vpop.eup %3910 }
 0xcd6   :  { %v3913_v34 = vpop.eup %3912  ;;  %v935_v35 = vmul.f32 %v3911_v17, %v918_v16  ;;  %vm940_vm11 = vweird.f32 %v3911_v17  ;;  %v3643_v16 = vld [vmem:[%s5560_s1 + $0x18] sm:$0xff] }
 0xcd7   :  { %v917_v28 = vadd.f32 1.0, %v3913_v34  ;;  %vm941_vm13 = vmor %vm939_vm12, %vm940_vm11  ;;  %v1423_v27 = vpack.c.bf16 %v3643_v16, %v3642_v15 }
 0xcd8   :  { %v936_v33 = vsub.f32 1.0, %v935_v35  ;;  %v4795_v35 = vld [vmem:[%s5564_s5] ss:$0 sm:$0xff]  ;;  %s3479_s5 = sshll.u32 %s5572_s13, 4  ;;  %s3480_s5 = int_to_ptr.hbm [resolvable:$true] %s3479_s5 }
 0xcd9   :  { %3914 = vrcp.f32 %v917_v28  ;;  %v930_v18 = vand.u32 2147483648, %v917_v28  ;;  %vm924_vm1 = vweird.f32 %v917_v28  ;;  %v928_v57 = vand.u32 2147483647, %v917_v28  ;;  %3652 = vmatmul.msk.bf16.vlgmr.msra.gmra.mxu1 %vm201_vm0, %v1423_v27 }
 0xcda   :  { %v937_v36 = vmul.f32 %v3911_v17, %v936_v33  ;;  %1901 = vmatpush.bf16.msra.mxu1 %v4771_v12 }
 0xcdb   :  { %v931_v59 = vor.u32 1.1754944e-38, %v930_v18  ;;  %vm929_vm3 = vcmp.eq.f32.partialorder %v928_v57, 8.507059e+37  ;;  %v1419_v57 = vld [vmem:[#allocation4 + $0x10] sm:$0xff] }
 0xcdc   :  { %v938_v37 = vadd.f32 %v3911_v17, %v937_v36 }
 0xcde   :  { %v942_v45 = vsel %vm941_vm13, %v3911_v17, %v938_v37  ;;  %1902 = vmatpush.bf16.msra.mxu1 %v4774_v26  ;;  %v268_v37 = vadd.f32 %v4795_v35, %v4597_v30 }
 0xcdf   :  { %v3915_v41 = vpop.eup %3914  ;;  %v947_v51 = vsel %vm944_vm14, %v946_v13, %v942_v45  ;;  %v4805_v45 = vld [vmem:[%s5567_s8] ss:$0 sm:$0xff] }
 0xce0   :  { %v920_v46 = vmul.f32 %v3915_v41, %v917_v28  ;;  %vm925_vm15 = vweird.f32 %v3915_v41  ;;  %v952_v49 = vmul.f32 %v947_v51, %v4728_v0  ;;  %v266_v28 = vadd.f32 %v4795_v35, %v4595_v29 }
 0xce1   :  { %vm926_vm2 = vmor %vm924_vm1, %vm925_vm15 }
 0xce2   :  { %v921_v52 = vsub.f32 1.0, %v920_v46 }
 0xce4   :  { %v922_v54 = vmul.f32 %v3915_v41, %v921_v52 }
 0xce6   :  { %v923_v55 = vadd.f32 %v3915_v41, %v922_v54 }
 0xce8   :  { %v927_v20 = vsel %vm926_vm2, %v3915_v41, %v923_v55 }
 0xce9   :  { %v932_v61 = vsel %vm929_vm3, %v931_v59, %v927_v20 }
 0xcea   :  { %v951_v3 = vmul.f32 %v932_v61, %v4723_v53 }
 0xd25   :  { %v958_v47 = vpop.permute.xlu2 %957 }
 0xd26   :  { %v962_v19 = vmul.f32 %v958_v47, %v947_v51 }
 0xd28   :  { %967 = vrot.lane.b32.xlu1 %v962_v19, %s4399_s3 }
 0xd35   :  { %v956_v60 = vpop.permute.xlu1 %955 }
 0xd36   :  { %v961_v21 = vmul.f32 %v956_v60, %v932_v61 }
 0xd38   :  { %965 = vrot.lane.b32.xlu0 %v961_v21, %s4399_s3 }
 0xd56   :  { %v1448_v46 = vpop.f32.mrf.mxu1 }
 0xd5e   :  { %v1450_v52 = vpop.f32.mrf.mxu1 }
 0xd9a   :  { %v968_v1 = vpop.permute.xlu1 %967 }
 0xd9b   :  { %v4749_v22 = vadd.f32 %v968_v1, %v952_v49 }
 0xd9d   :  { %3916 = vtanh.f32 %v4749_v22 }
 0xda3   :  { %v3917_v44 = vpop.eup %3916 }
 0xda4   :  { %979 = vrot.lane.b32.xlu0 %v3917_v44, %s4399_s3 }
 0xdaa   :  { %v966_v6 = vpop.permute.xlu0 %965 }
 0xdab   :  { %v4754_v23 = vadd.f32 %v966_v6, %v951_v3 }
 0xdac   :  { %421 = vrot.lane.b32.xlu0 %v4624_v40, %s4391_s21 }
 0xdad   :  { %3918 = vtanh.f32 %v4754_v23 }
 0xdb3   :  { %v3919_v39 = vpop.eup %3918 }
 0xdb4   :  { %977 = vrot.lane.b32.xlu2 %v3919_v39, %s4399_s3 }
 0xdbc   :  { %419 = vrot.lane.b32.xlu2 %v4622_v38, %s4391_s21  ;;  %v3793_v38 = vld [vmem:[#allocation7 + $0x8] sm:$0xff] }
 0xdbd   :  { %1352 = vmatpush.bf16.msrb.mxu3 %v3793_v38 }
 0xdc1   :  { %1353 = vmatpush.bf16.msrb.mxu3 %v3792_v14 }
 0xe0e   :  { %v978_v0 = vpop.permute.xlu2 %977 }
 0xe0f   :  { %v983_v5 = vmul.f32 %v978_v0, %v932_v61 }
 0xe11   :  { %v4762_v53 = vpack.c.bf16 %v983_v5, %v983_v5 }
 0xe13   :  { %v1001_v40 = vunpack.c.l.b16 %v4762_v53 }
 0xe16   :  { %v420_v7 = vpop.permute.xlu2 %419  ;;  %v980_v8 = vpop.permute.xlu0 %979 }
 0xe17   :  { %426 = vst.msk [vmem:[#allocation3] sm:$0xf] %vm425_vm4, %v420_v7  ;;  %v984_v9 = vmul.f32 %v980_v8, %v947_v51 }
 0xe19   :  { %v4765_v24 = vpack.c.bf16 %v984_v9, %v984_v9 }
 0xe1b   :  { %v1002_v10 = vunpack.c.l.b16 %v4765_v24 }
 0xe1d   :  { %v1003_v25 = vpack.c.b16 %v1002_v10, %v1001_v40 }
 0xe1e   :  { %v422_v11 = vpop.permute.xlu0 %421 }
 0xe1f   :  { %427 = vst.msk [vmem:[#allocation3 + $0x4] sm:$0xf] %vm425_vm4, %v422_v11  ;;  %1004 = vrot.lane.b32.xlu1 %v1003_v25, %s4391_s21 }
 0xe26   :  { %v3784_v34 = vld [vmem:[#allocation3] sm:$0xff] }
 0xe91   :  { %v1005_v17 = vpop.permute.xlu1 %1004 }
 0xe92   :  { %3588 = vmatmul.msk.bf16.vlgmr.msra.gmra.mxu3 %vm201_vm0, %v1005_v17 }
 0xea2   :  { %3634 = vmatmul.msk.bf16.vlgmr.msrb.gmra.mxu3 %vm201_vm0, %v3784_v34 }
 0xf15   :  { %v1018_v33 = vpop.f32.mrf.mxu3 }
 0xf16   :  { %v1023_v36 = vadd.f32 %v1018_v33, %v266_v28 }
 0xf18   :  { %3920 = vtanh.f32 %v1023_v36  ;;  %v3589_v61 = vmul.f32 -1.442695, %v1023_v36 }
 0xf1d   :  { %v1020_v41 = vpop.f32.mrf.mxu3 }
 0xf1e   :  { %v3921_v42 = vpop.eup %3920  ;;  %v1024_v43 = vadd.f32 %v1020_v41, %v268_v37 }
 0xf1f   :  { %1069 = vrot.lane.b32.xlu1 %v3921_v42, %s4399_s3 }
 0xf20   :  { %3922 = vtanh.f32 %v1024_v43  ;;  %v3590_v20 = vmul.f32 -1.442695, %v1024_v43 }
 0xf25   :  { %v1355_v13 = vpop.f32.mrf.mxu3 }
 0xf26   :  { %v3923_v29 = vpop.eup %3922  ;;  %v1356_v47 = vadd.f32 %v4805_v45, %v1355_v13 }
 0xf27   :  { %1071 = vrot.lane.b32.xlu2 %v3923_v29, %s4399_s3 }
 0xf28   :  { %v1453_v51 = vadd.f32 %v1448_v46, %v1356_v47 }
 0xf2a   :  { %3924 = vtanh.f32 %v1453_v51  ;;  %v3653_v6 = vmul.f32 -1.442695, %v1453_v51 }
 0xf2d   :  { %v1357_v30 = vpop.f32.mrf.mxu3 }
 0xf2e   :  { %v1358_v19 = vadd.f32 %v4805_v45, %v1357_v30 }
 0xf30   :  { %v3925_v54 = vpop.eup %3924  ;;  %v1454_v55 = vadd.f32 %v1450_v52, %v1358_v19 }
 0xf31   :  { %1507 = vrot.lane.b32.xlu0 %v3925_v54, %s4399_s3  ;;  %v1420_v54 = vld [vmem:[#allocation4 + $0x18] sm:$0xff] }
 0xf32   :  { %3926 = vtanh.f32 %v1454_v55  ;;  %v3654_v9 = vmul.f32 -1.442695, %v1454_v55 }
 0xf33   :  { %3928 = vpow2.f32 %v3590_v20 }
 0xf38   :  { %v3927_v18 = vpop.eup %3926 }
 0xf39   :  { %1509 = vrot.lane.b32.xlu1 %v3927_v18, %s4399_s3  ;;  %v3929_v59 = vpop.eup %3928 }
 0xf3a   :  { %v1032_v60 = vadd.f32 1.0, %v3929_v59 }
 0xf3c   :  { %3930 = vrcp.f32 %v1032_v60  ;;  %v1059_v7 = vand.u32 2147483648, %v1032_v60  ;;  %vm1053_vm6 = vweird.f32 %v1032_v60  ;;  %v1057_v8 = vand.u32 2147483647, %v1032_v60 }
 0xf3d   :  { %3932 = vpow2.f32 %v3589_v61 }
 0xf3e   :  { %v1060_v25 = vor.u32 1.1754944e-38, %v1059_v7  ;;  %vm1058_vm8 = vcmp.eq.f32.partialorder %v1057_v8, 8.507059e+37 }
 0xf41   :  { %1497 = vrot.lane.b32.xlu1 %v1419_v57, %s4399_s3 }
 0xf42   :  { %v3931_v21 = vpop.eup %3930 }
 0xf43   :  { %v3933_v49 = vpop.eup %3932  ;;  %v1049_v1 = vmul.f32 %v3931_v21, %v1032_v60  ;;  %vm1054_vm5 = vweird.f32 %v3931_v21 }
 0xf44   :  { %v1031_v44 = vadd.f32 1.0, %v3933_v49  ;;  %vm1055_vm7 = vmor %vm1053_vm6, %vm1054_vm5 }
 0xf45   :  { %v1050_v3 = vsub.f32 1.0, %v1049_v1 }
 0xf46   :  { %3934 = vrcp.f32 %v1031_v44  ;;  %v1044_v36 = vand.u32 2147483648, %v1031_v44  ;;  %vm1038_vm10 = vweird.f32 %v1031_v44  ;;  %v1042_v37 = vand.u32 2147483647, %v1031_v44 }
 0xf47   :  { %v1051_v39 = vmul.f32 %v3931_v21, %v1050_v3  ;;  %3936 = vpow2.f32 %v3653_v6 }
 0xf48   :  { %3938 = vpow2.f32 %v3654_v9  ;;  %v1045_v43 = vor.u32 1.1754944e-38, %v1044_v36  ;;  %vm1043_vm12 = vcmp.eq.f32.partialorder %v1042_v37, 8.507059e+37 }
 0xf49   :  { %v1052_v0 = vadd.f32 %v3931_v21, %v1051_v39 }
 0xf4b   :  { %v1056_v40 = vsel %vm1055_vm7, %v3931_v21, %v1052_v0 }
 0xf4c   :  { %v3935_v5 = vpop.eup %3934  ;;  %v4813_v14 = vsel %vm1058_vm8, %v1060_v25, %v1056_v40 }
 0xf4d   :  { %v1034_v10 = vmul.f32 %v3935_v5, %v1031_v44  ;;  %v3937_v11 = vpop.eup %3936  ;;  %vm1039_vm9 = vweird.f32 %v3935_v5  ;;  %v1066_v25 = vmul.f32 %v4813_v14, %v4749_v22 }
 0xf4e   :  { %v1461_v27 = vadd.f32 1.0, %v3937_v11  ;;  %v3939_v34 = vpop.eup %3938  ;;  %vm1040_vm11 = vmor %vm1038_vm10, %vm1039_vm9 }
 0xf4f   :  { %v1035_v16 = vsub.f32 1.0, %v1034_v10  ;;  %v1462_v33 = vadd.f32 1.0, %v3939_v34 }
 0xf50   :  { %3940 = vrcp.f32 %v1461_v27  ;;  %v1474_v57 = vand.u32 2147483648, %v1461_v27  ;;  %vm1468_vm14 = vweird.f32 %v1461_v27  ;;  %v1472_v20 = vand.u32 2147483647, %v1461_v27 }
 0xf51   :  { %v1036_v17 = vmul.f32 %v3935_v5, %v1035_v16  ;;  %3942 = vrcp.f32 %v1462_v33  ;;  %v1489_v3 = vand.u32 2147483648, %v1462_v33  ;;  %vm1483_vm3 = vweird.f32 %v1462_v33 }
 0xf52   :  { %v1475_v61 = vor.u32 1.1754944e-38, %v1474_v57  ;;  %vm1473_vm1 = vcmp.eq.f32.partialorder %v1472_v20, 8.507059e+37  ;;  %v1487_v6 = vand.u32 2147483647, %v1462_v33 }
 0xf53   :  { %v1037_v28 = vadd.f32 %v3935_v5, %v1036_v17  ;;  %v1490_v0 = vor.u32 1.1754944e-38, %v1489_v3 }
 0xf54   :  { %vm1488_vm6 = vcmp.eq.f32.partialorder %v1487_v6, 8.507059e+37  ;;  %v273_v6 = vadd.f32 %v4795_v35, %v4601_v32 }
 0xf55   :  { %v1041_v42 = vsel %vm1040_vm11, %v3935_v5, %v1037_v28 }
 0xf56   :  { %v3941_v41 = vpop.eup %3940  ;;  %v4817_v29 = vsel %vm1043_vm12, %v1045_v43, %v1041_v42 }
 0xf57   :  { %v1464_v46 = vmul.f32 %v3941_v41, %v1461_v27  ;;  %v3943_v30 = vpop.eup %3942  ;;  %vm1469_vm13 = vweird.f32 %v3941_v41  ;;  %v1065_v9 = vmul.f32 %v4817_v29, %v4754_v23 }
 0xf58   :  { %v1479_v52 = vmul.f32 %v3943_v30, %v1462_v33  ;;  %vm1470_vm15 = vmor %vm1468_vm14, %vm1469_vm13  ;;  %vm1484_vm2 = vweird.f32 %v3943_v30 }
 0xf59   :  { %v1465_v51 = vsub.f32 1.0, %v1464_v46  ;;  %vm1485_vm5 = vmor %vm1483_vm3, %vm1484_vm2 }
 0xf5a   :  { %v1480_v18 = vsub.f32 1.0, %v1479_v52 }
 0xf5b   :  { %v1466_v19 = vmul.f32 %v3941_v41, %v1465_v51 }
 0xf5c   :  { %v1481_v60 = vmul.f32 %v3943_v30, %v1480_v18 }
 0xf5d   :  { %v1467_v55 = vadd.f32 %v3941_v41, %v1466_v19 }
 0xf5e   :  { %v1482_v44 = vadd.f32 %v3943_v30, %v1481_v60 }
 0xf5f   :  { %v1471_v59 = vsel %vm1470_vm15, %v3941_v41, %v1467_v55 }
 0xf60   :  { %v1476_v49 = vsel %vm1473_vm1, %v1475_v61, %v1471_v59  ;;  %v1486_v39 = vsel %vm1485_vm5, %v3943_v30, %v1482_v44 }
 0xf61   :  { %v1491_v7 = vsel %vm1488_vm6, %v1490_v0, %v1486_v39 }
 0xf81   :  { %v1072_v38 = vpop.permute.xlu2 %1071 }
 0xf82   :  { %v1076_v15 = vmul.f32 %v1072_v38, %v4813_v14 }
 0xf84   :  { %1081 = vrot.lane.b32.xlu0 %v1076_v15, %s4399_s3 }
 0xf91   :  { %v1070_v13 = vpop.permute.xlu1 %1069 }
 0xf92   :  { %v1075_v47 = vmul.f32 %v1070_v13, %v4817_v29 }
 0xf94   :  { %1079 = vrot.lane.b32.xlu2 %v1075_v47, %s4399_s3 }
 0xf9c   :  { %1499 = vrot.lane.b32.xlu2 %v1420_v54, %s4399_s3 }
 0xfa3   :  { %v1508_v21 = vpop.permute.xlu0 %1507 }
 0xfa4   :  { %v1513_v1 = vmul.f32 %v1508_v21, %v1476_v49 }
 0xfa6   :  { %1517 = vrot.lane.b32.xlu0 %v1513_v1, %s4399_s3  ;;  %v271_v1 = vadd.f32 %v4795_v35, %v4599_v31 }
 0xfab   :  { %v1510_v5 = vpop.permute.xlu1 %1509 }
 0xfac   :  { %v1514_v8 = vmul.f32 %v1510_v5, %v1491_v7 }
 0xfae   :  { %1519 = vrot.lane.b32.xlu1 %v1514_v8, %s4399_s3 }
 0xfb3   :  { %v1498_v23 = vpop.permute.xlu1 %1497 }
 0xfb4   :  { %v1503_v27 = vmul.f32 %v1498_v23, %v1476_v49 }
 0xfee   :  { %v1080_v40 = vpop.permute.xlu2 %1079 }
 0xfef   :  { %v4826_v10 = vadd.f32 %v1080_v40, %v1065_v9 }
 0xff1   :  { %3944 = vtanh.f32 %v4826_v10 }
 0xff6   :  { %v1082_v11 = vpop.permute.xlu0 %1081  ;;  %v1500_v28 = vpop.permute.xlu2 %1499 }
 0xff7   :  { %v3945_v38 = vpop.eup %3944  ;;  %v4831_v15 = vadd.f32 %v1082_v11, %v1066_v25  ;;  %v1504_v22 = vmul.f32 %v1500_v28, %v1491_v7 }
 0xff8   :  { %1091 = vrot.lane.b32.xlu2 %v3945_v38, %s4399_s3 }
 0xff9   :  { %3946 = vtanh.f32 %v4831_v15 }
 0xfff   :  { %v3947_v16 = vpop.eup %3946 }
0x1000   :  { %1093 = vrot.lane.b32.xlu0 %v3947_v16, %s4399_s3 }
0x1018   :  { %v1518_v17 = vpop.permute.xlu0 %1517 }
0x1019   :  { %v4836_v34 = vadd.f32 %v1518_v17, %v1503_v27 }
0x101b   :  { %3948 = vtanh.f32 %v4836_v34 }
0x1020   :  { %v1520_v33 = vpop.permute.xlu1 %1519 }
0x1021   :  { %v3949_v36 = vpop.eup %3948  ;;  %v4839_v37 = vadd.f32 %v1520_v33, %v1504_v22 }
0x1022   :  { %1529 = vrot.lane.b32.xlu1 %v3949_v36, %s4399_s3 }
0x1023   :  { %3950 = vtanh.f32 %v4839_v37 }
0x1029   :  { %v3951_v41 = vpop.eup %3950 }
0x102a   :  { %1531 = vrot.lane.b32.xlu2 %v3951_v41, %s4399_s3  ;;  %533 = vrot.lane.b32.xlu1 %v4650_v48, %s4391_s21 }
0x1032   :  { %535 = vrot.lane.b32.xlu2 %v4652_v50, %s4391_s21 }
0x1052   :  { %v1092_v42 = vpop.permute.xlu2 %1091 }
0x1053   :  { %v1097_v43 = vmul.f32 %v1092_v42, %v4817_v29 }
0x1055   :  { %v4849_v13 = vpack.c.bf16 %v1097_v43, %v1097_v43 }
0x1057   :  { %v1115_v30 = vunpack.c.l.b16 %v4849_v13 }
0x1072   :  { %v1094_v46 = vpop.permute.xlu0 %1093 }
0x1073   :  { %v1098_v47 = vmul.f32 %v1094_v46, %v4813_v14 }
0x1075   :  { %v4852_v51 = vpack.c.bf16 %v1098_v47, %v1098_v47 }
0x1077   :  { %v1116_v19 = vunpack.c.l.b16 %v4852_v51 }
0x1079   :  { %v1117_v52 = vpack.c.b16 %v1116_v19, %v1115_v30 }
0x107b   :  { %1118 = vrot.lane.b32.xlu0 %v1117_v52, %s4391_s21 }
0x1084   :  { %v1532_v48 = vpop.permute.xlu2 %1531 }
0x1085   :  { %v1536_v50 = vmul.f32 %v1532_v48, %v1491_v7 }
0x1087   :  { %v4858_v55 = vpack.c.bf16 %v1536_v50, %v1536_v50 }
0x1089   :  { %v1552_v20 = vunpack.c.l.b16 %v4858_v55 }
0x108c   :  { %v536_v54 = vpop.permute.xlu2 %535 }
0x108d   :  { %541 = vst.msk [vmem:[#allocation3 + $0xc] sm:$0xf] %vm425_vm4, %v536_v54 }
0x1094   :  { %v1530_v29 = vpop.permute.xlu1 %1529 }
0x1095   :  { %v1535_v18 = vmul.f32 %v1530_v29, %v1476_v49 }
0x1097   :  { %v4860_v57 = vpack.c.bf16 %v1535_v18, %v1535_v18 }
0x1099   :  { %v1551_v14 = vunpack.c.l.b16 %v4860_v57 }
0x109b   :  { %v1553_v59 = vpack.c.b16 %v1552_v20, %v1551_v14 }
0x109c   :  { %v534_v60 = vpop.permute.xlu1 %533 }
0x109d   :  { %540 = vst.msk [vmem:[#allocation3 + $0x8] sm:$0xf] %vm425_vm4, %v534_v60  ;;  %1554 = vrot.lane.b32.xlu0 %v1553_v59, %s4391_s21 }
0x10a4   :  { %v3785_v61 = vld [vmem:[#allocation3 + $0x8] sm:$0xff] }
0x10a5   :  { %3635 = vmatmul.msk.bf16.gmra.mxu3 %vm201_vm0, %v3785_v61 }
0x10ed   :  { %v1119_v21 = vpop.permute.xlu0 %1118 }
0x10ee   :  { %3591 = vmatmul.msk.bf16.vlgmr.msrb.gmra.mxu2 %vm201_vm0, %v1119_v21 }
0x10ef   :  { %1789 = vmatpush.bf16.msrb.mxu2 %v4771_v12 }
0x10f3   :  { %1790 = vmatpush.bf16.msrb.mxu2 %v4774_v26 }
0x110f   :  { %v1555_v49 = vpop.permute.xlu0 %1554 }
0x1110   :  { %3655 = vmatmul.msk.bf16.vlgmr.msra.gmra.mxu2 %vm201_vm0, %v1555_v49 }
0x1111   :  { %2013 = vmatpush.bf16.msra.mxu2 %v4771_v12 }
0x1115   :  { %2014 = vmatpush.bf16.msra.mxu2 %v4774_v26 }
0x1128   :  { %v1360_v5 = vpop.f32.mrf.mxu3 }
0x1129   :  { %v1361_v7 = vadd.f32 %v4805_v45, %v1360_v5 }
0x1130   :  { %v1362_v40 = vpop.f32.mrf.mxu3 }
0x1131   :  { %v1363_v25 = vadd.f32 %v4805_v45, %v1362_v40 }
0x1171   :  { %v1132_v44 = vpop.f32.mrf.mxu2 }
0x1172   :  { %v4875_v3 = vadd.f32 %v1132_v44, %v271_v1 }
0x1179   :  { %v1134_v39 = vpop.f32.mrf.mxu2 }
0x117a   :  { %v4879_v0 = vadd.f32 %v1134_v39, %v273_v6 }
0x1193   :  { %v1568_v8 = vpop.f32.mrf.mxu2 }
0x1194   :  { %v1573_v9 = vadd.f32 %v1568_v8, %v1361_v7 }
0x1196   :  { %3952 = vtanh.f32 %v1573_v9  ;;  %v3656_v27 = vmul.f32 -1.442695, %v1573_v9 }
0x119b   :  { %v1570_v11 = vpop.f32.mrf.mxu2 }
0x119c   :  { %v3953_v31 = vpop.eup %3952  ;;  %v1574_v38 = vadd.f32 %v1570_v11, %v1363_v25 }
0x119d   :  { %1619 = vrot.lane.b32.xlu1 %v3953_v31, %s4399_s3 }
0x119e   :  { %3954 = vtanh.f32 %v1574_v38  ;;  %v3657_v32 = vmul.f32 -1.442695, %v1574_v38 }
0x11a0   :  { %3956 = vpow2.f32 %v3657_v32 }
0x11a4   :  { %v3955_v16 = vpop.eup %3954 }
0x11a5   :  { %1621 = vrot.lane.b32.xlu2 %v3955_v16, %s4399_s3 }
0x11a6   :  { %v3957_v35 = vpop.eup %3956 }
0x11a7   :  { %v1582_v23 = vadd.f32 1.0, %v3957_v35 }
0x11a9   :  { %3958 = vrcp.f32 %v1582_v23  ;;  %v1609_v46 = vand.u32 2147483648, %v1582_v23  ;;  %vm1603_vm8 = vweird.f32 %v1582_v23  ;;  %v1607_v47 = vand.u32 2147483647, %v1582_v23 }
0x11aa   :  { %3960 = vpow2.f32 %v3656_v27 }
0x11ab   :  { %v1610_v52 = vor.u32 1.1754944e-38, %v1609_v46  ;;  %vm1608_vm10 = vcmp.eq.f32.partialorder %v1607_v47, 8.507059e+37 }
0x11af   :  { %v3959_v17 = vpop.eup %3958 }
0x11b0   :  { %v3961_v28 = vpop.eup %3960  ;;  %v1599_v22 = vmul.f32 %v3959_v17, %v1582_v23  ;;  %vm1604_vm7 = vweird.f32 %v3959_v17 }
0x11b1   :  { %v1581_v33 = vadd.f32 1.0, %v3961_v28  ;;  %vm1605_vm9 = vmor %vm1603_vm8, %vm1604_vm7 }
0x11b2   :  { %v1600_v36 = vsub.f32 1.0, %v1599_v22 }
0x11b3   :  { %3962 = vrcp.f32 %v1581_v33  ;;  %v1594_v20 = vand.u32 2147483648, %v1581_v33  ;;  %vm1588_vm12 = vweird.f32 %v1581_v33  ;;  %v1592_v59 = vand.u32 2147483647, %v1581_v33 }
0x11b4   :  { %v1601_v41 = vmul.f32 %v3959_v17, %v1600_v36 }
0x11b5   :  { %v1595_v61 = vor.u32 1.1754944e-38, %v1594_v20  ;;  %vm1593_vm14 = vcmp.eq.f32.partialorder %v1592_v59, 8.507059e+37 }
0x11b6   :  { %v1602_v42 = vadd.f32 %v3959_v17, %v1601_v41 }
0x11b8   :  { %v1606_v30 = vsel %vm1605_vm9, %v3959_v17, %v1602_v42 }
0x11b9   :  { %v3963_v43 = vpop.eup %3962  ;;  %v1611_v54 = vsel %vm1608_vm10, %v1610_v52, %v1606_v30 }
0x11ba   :  { %v1584_v19 = vmul.f32 %v3963_v43, %v1581_v33  ;;  %vm1589_vm11 = vweird.f32 %v3963_v43  ;;  %v1616_v44 = vmul.f32 %v1611_v54, %v4839_v37 }
0x11bb   :  { %vm1590_vm13 = vmor %vm1588_vm12, %vm1589_vm11 }
0x11bc   :  { %v1585_v29 = vsub.f32 1.0, %v1584_v19 }
0x11be   :  { %v1586_v18 = vmul.f32 %v3963_v43, %v1585_v29 }
0x11c0   :  { %v1587_v14 = vadd.f32 %v3963_v43, %v1586_v18 }
0x11c2   :  { %v1591_v60 = vsel %vm1590_vm13, %v3963_v43, %v1587_v14 }
0x11c3   :  { %v1596_v49 = vsel %vm1593_vm14, %v1595_v61, %v1591_v60 }
0x11c4   :  { %v1615_v7 = vmul.f32 %v1596_v49, %v4836_v34 }
0x11ff   :  { %v1622_v48 = vpop.permute.xlu2 %1621 }
0x1200   :  { %v1626_v50 = vmul.f32 %v1622_v48, %v1611_v54 }
0x1202   :  { %1631 = vrot.lane.b32.xlu1 %v1626_v50, %s4399_s3 }
0x120a   :  { %647 = vrot.lane.b32.xlu1 %v4678_v56, %s4391_s21 }
0x120f   :  { %v1620_v21 = vpop.permute.xlu1 %1619 }
0x1210   :  { %v1625_v1 = vmul.f32 %v1620_v21, %v1596_v49 }
0x1212   :  { %1629 = vrot.lane.b32.xlu0 %v1625_v1, %s4399_s3 }
0x1274   :  { %v1632_v6 = vpop.permute.xlu1 %1631 }
0x1275   :  { %v4890_v39 = vadd.f32 %v1632_v6, %v1616_v44 }
0x1277   :  { %3964 = vtanh.f32 %v4890_v39 }
0x127c   :  { %v648_v5 = vpop.permute.xlu1 %647 }
0x127d   :  { %v3965_v56 = vpop.eup %3964  ;;  %654 = vst.msk [vmem:[#allocation3 + $0x10] sm:$0xf] %vm425_vm4, %v648_v5 }
0x127e   :  { %1643 = vrot.lane.b32.xlu0 %v3965_v56, %s4399_s3 }
0x1284   :  { %v1630_v8 = vpop.permute.xlu0 %1629 }
0x1285   :  { %v4896_v9 = vadd.f32 %v1630_v8, %v1615_v7 }
0x1287   :  { %3966 = vtanh.f32 %v4896_v9 }
0x128d   :  { %v3967_v40 = vpop.eup %3966 }
0x128e   :  { %1641 = vrot.lane.b32.xlu2 %v3967_v40, %s4399_s3 }
0x1296   :  { %649 = vrot.lane.b32.xlu2 %v4680_v58, %s4391_s21 }
0x12e8   :  { %v1642_v37 = vpop.permute.xlu2 %1641 }
0x12e9   :  { %v1647_v25 = vmul.f32 %v1642_v37, %v1596_v49 }
0x12eb   :  { %v4902_v38 = vpack.c.bf16 %v1647_v25, %v1647_v25 }
0x12ed   :  { %v1663_v32 = vunpack.c.l.b16 %v4902_v38 }
0x12f0   :  { %v1644_v11 = vpop.permute.xlu0 %1643  ;;  %v650_v31 = vpop.permute.xlu2 %649 }
0x12f1   :  { %v1648_v16 = vmul.f32 %v1644_v11, %v1611_v54  ;;  %655 = vst.msk [vmem:[#allocation3 + $0x14] sm:$0xf] %vm425_vm4, %v650_v31 }
0x12f3   :  { %v4905_v34 = vpack.c.bf16 %v1648_v16, %v1648_v16 }
0x12f5   :  { %v1664_v35 = vunpack.c.l.b16 %v4905_v34 }
0x12f7   :  { %v1665_v23 = vpack.c.b16 %v1664_v35, %v1663_v32 }
0x12f8   :  { %v3786_v27 = vld [vmem:[#allocation3 + $0x10] sm:$0xff] }
0x12f9   :  { %1666 = vrot.lane.b32.xlu0 %v1665_v23, %s4391_s21  ;;  %3636 = vmatmul.msk.bf16.gmra.mxu3 %vm201_vm0, %v3786_v27 }
0x136b   :  { %v1667_v58 = vpop.permute.xlu0 %1666 }
0x136c   :  { %3658 = vmatmul.msk.bf16.vlgmr.msrb.gmra.mxu1 %vm201_vm0, %v1667_v58 }
0x136d   :  { %2125 = vmatpush.bf16.msrb.mxu1 %v4771_v12 }
0x1371   :  { %2126 = vmatpush.bf16.msrb.mxu1 %v4774_v26 }
0x137c   :  { %v1365_v17 = vpop.f32.mrf.mxu3 }
0x137d   :  { %v1366_v28 = vadd.f32 %v4805_v45, %v1365_v17 }
0x1384   :  { %v1367_v36 = vpop.f32.mrf.mxu3 }
0x1385   :  { %v1368_v41 = vadd.f32 %v4805_v45, %v1367_v36 }
0x13e9   :  { %v1680_v22 = vpop.f32.mrf.mxu1 }
0x13ea   :  { %v1685_v33 = vadd.f32 %v1680_v22, %v1366_v28 }
0x13ec   :  { %3968 = vtanh.f32 %v1685_v33  ;;  %v3659_v48 = vmul.f32 -1.442695, %v1685_v33 }
0x13f1   :  { %v1682_v42 = vpop.f32.mrf.mxu1 }
0x13f2   :  { %v3969_v43 = vpop.eup %3968  ;;  %v1686_v46 = vadd.f32 %v1682_v42, %v1368_v41 }
0x13f3   :  { %1731 = vrot.lane.b32.xlu1 %v3969_v43, %s4399_s3 }
0x13f4   :  { %3970 = vtanh.f32 %v1686_v46  ;;  %v3660_v30 = vmul.f32 -1.442695, %v1686_v46 }
0x13f6   :  { %3972 = vpow2.f32 %v3660_v30 }
0x13fa   :  { %v3971_v47 = vpop.eup %3970 }
0x13fb   :  { %1733 = vrot.lane.b32.xlu2 %v3971_v47, %s4399_s3 }
0x13fc   :  { %v3973_v19 = vpop.eup %3972 }
0x13fd   :  { %v1694_v52 = vadd.f32 1.0, %v3973_v19 }
0x13ff   :  { %3974 = vrcp.f32 %v1694_v52  ;;  %v1721_v61 = vand.u32 2147483648, %v1694_v52  ;;  %vm1715_vm1 = vweird.f32 %v1694_v52  ;;  %v1719_v21 = vand.u32 2147483647, %v1694_v52 }
0x1400   :  { %3976 = vpow2.f32 %v3659_v48 }
0x1401   :  { %v1722_v44 = vor.u32 1.1754944e-38, %v1721_v61  ;;  %vm1720_vm3 = vcmp.eq.f32.partialorder %v1719_v21, 8.507059e+37 }
0x1405   :  { %v3975_v54 = vpop.eup %3974 }
0x1406   :  { %v3977_v50 = vpop.eup %3976  ;;  %v1711_v29 = vmul.f32 %v3975_v54, %v1694_v52  ;;  %vm1716_vm15 = vweird.f32 %v3975_v54 }
0x1407   :  { %v1693_v18 = vadd.f32 1.0, %v3977_v50  ;;  %vm1717_vm2 = vmor %vm1715_vm1, %vm1716_vm15 }
0x1408   :  { %v1712_v14 = vsub.f32 1.0, %v1711_v29 }
0x1409   :  { %3978 = vrcp.f32 %v1693_v18  ;;  %v1706_v37 = vand.u32 2147483648, %v1693_v18  ;;  %vm1700_vm6 = vweird.f32 %v1693_v18  ;;  %v1704_v25 = vand.u32 2147483647, %v1693_v18 }
0x140a   :  { %v1713_v20 = vmul.f32 %v3975_v54, %v1712_v14 }
0x140b   :  { %v1707_v31 = vor.u32 1.1754944e-38, %v1706_v37  ;;  %vm1705_vm8 = vcmp.eq.f32.partialorder %v1704_v25, 8.507059e+37 }
0x140c   :  { %v1714_v59 = vadd.f32 %v3975_v54, %v1713_v20 }
0x140e   :  { %v1718_v49 = vsel %vm1717_vm2, %v3975_v54, %v1714_v59 }
0x140f   :  { %v3979_v60 = vpop.eup %3978  ;;  %v1723_v5 = vsel %vm1720_vm3, %v1722_v44, %v1718_v49 }
0x1410   :  { %v1696_v1 = vmul.f32 %v3979_v60, %v1693_v18  ;;  %vm1701_vm5 = vweird.f32 %v3979_v60  ;;  %v1728_v23 = vmul.f32 %v1723_v5, %v4890_v39 }
0x1411   :  { %vm1702_vm7 = vmor %vm1700_vm6, %vm1701_vm5 }
0x1412   :  { %v1697_v7 = vsub.f32 1.0, %v1696_v1 }
0x1414   :  { %v1698_v8 = vmul.f32 %v3979_v60, %v1697_v7 }
0x1416   :  { %v1699_v40 = vadd.f32 %v3979_v60, %v1698_v8 }
0x1418   :  { %v1703_v11 = vsel %vm1702_vm7, %v3979_v60, %v1699_v40 }
0x1419   :  { %v1708_v32 = vsel %vm1705_vm8, %v1707_v31, %v1703_v11 }
0x141a   :  { %v1727_v28 = vmul.f32 %v1708_v32, %v4896_v9 }
0x1455   :  { %v1734_v6 = vpop.permute.xlu2 %1733 }
0x1456   :  { %v1738_v56 = vmul.f32 %v1734_v6, %v1723_v5 }
0x1458   :  { %1743 = vrot.lane.b32.xlu1 %v1738_v56, %s4399_s3 }
0x1460   :  { %761 = vrot.lane.b32.xlu1 %v4706_v62, %s4391_s21 }
0x1465   :  { %v1732_v16 = vpop.permute.xlu1 %1731 }
0x1466   :  { %v1737_v35 = vmul.f32 %v1732_v16, %v1708_v32 }
0x1468   :  { %1741 = vrot.lane.b32.xlu0 %v1737_v35, %s4399_s3 }
0x14ca   :  { %v1744_v27 = vpop.permute.xlu1 %1743 }
0x14cb   :  { %v4923_v58 = vadd.f32 %v1744_v27, %v1728_v23 }
0x14cd   :  { %3980 = vtanh.f32 %v4923_v58 }
0x14d2   :  { %v762_v17 = vpop.permute.xlu1 %761 }
0x14d3   :  { %v3981_v62 = vpop.eup %3980  ;;  %768 = vst.msk [vmem:[#allocation3 + $0x18] sm:$0xf] %vm425_vm4, %v762_v17 }
0x14d4   :  { %1755 = vrot.lane.b32.xlu0 %v3981_v62, %s4399_s3 }
0x14da   :  { %v1742_v22 = vpop.permute.xlu0 %1741 }
0x14db   :  { %v4929_v33 = vadd.f32 %v1742_v22, %v1727_v28 }
0x14dd   :  { %3982 = vtanh.f32 %v4929_v33 }
0x14e3   :  { %v3983_v36 = vpop.eup %3982 }
0x14e4   :  { %1753 = vrot.lane.b32.xlu2 %v3983_v36, %s4399_s3 }
0x14ec   :  { %763 = vrot.lane.b32.xlu2 %v4708_v63, %s4391_s21 }
0x153e   :  { %v1754_v39 = vpop.permute.xlu2 %1753 }
0x153f   :  { %v1759_v41 = vmul.f32 %v1754_v39, %v1708_v32 }
0x1541   :  { %v4935_v46 = vpack.c.bf16 %v1759_v41, %v1759_v41 }
0x1543   :  { %v1775_v30 = vunpack.c.l.b16 %v4935_v46 }
0x1546   :  { %v1756_v42 = vpop.permute.xlu0 %1755  ;;  %v764_v43 = vpop.permute.xlu2 %763 }
0x1547   :  { %v1760_v47 = vmul.f32 %v1756_v42, %v1723_v5  ;;  %769 = vst.msk [vmem:[#allocation3 + $0x1c] sm:$0xf] %vm425_vm4, %v764_v43 }
0x1549   :  { %v4938_v9 = vpack.c.bf16 %v1760_v47, %v1760_v47 }
0x154b   :  { %v1776_v19 = vunpack.c.l.b16 %v4938_v9 }
0x154d   :  { %v1777_v52 = vpack.c.b16 %v1776_v19, %v1775_v30 }
0x154e   :  { %v3787_v48 = vld [vmem:[#allocation3 + $0x18] sm:$0xff] }
0x154f   :  { %1778 = vrot.lane.b32.xlu0 %v1777_v52, %s4391_s21  ;;  %3637 = vmatmul.msk.bf16.gmra.mxu3 %vm201_vm0, %v3787_v48 }
0x15c1   :  { %v1779_v63 = vpop.permute.xlu0 %1778 }
0x15c2   :  { %3661 = vmatmul.msk.bf16.vlgmr.msrb.gmra.mxu2 %vm201_vm0, %v1779_v63 }
0x15c3   :  { %2237 = vmatpush.bf16.msrb.mxu2 %v4771_v12 }
0x15c7   :  { %2238 = vmatpush.bf16.msrb.mxu2 %v4774_v26 }
0x15d2   :  { %v1370_v54 = vpop.f32.mrf.mxu3 }
0x15d3   :  { %v1371_v50 = vadd.f32 %v4805_v45, %v1370_v54 }
0x15da   :  { %v1372_v14 = vpop.f32.mrf.mxu3 }
0x15db   :  { %v1373_v20 = vadd.f32 %v4805_v45, %v1372_v14 }
0x1645   :  { %v1792_v29 = vpop.f32.mrf.mxu2 }
0x1646   :  { %v1797_v18 = vadd.f32 %v1792_v29, %v1371_v50 }
0x1648   :  { %3984 = vtanh.f32 %v1797_v18  ;;  %v3662_v1 = vmul.f32 -1.442695, %v1797_v18 }
0x164d   :  { %v1794_v59 = vpop.f32.mrf.mxu2 }
0x164e   :  { %v3985_v60 = vpop.eup %3984  ;;  %v1798_v61 = vadd.f32 %v1794_v59, %v1373_v20 }
0x164f   :  { %1843 = vrot.lane.b32.xlu1 %v3985_v60, %s4399_s3 }
0x1650   :  { %3986 = vtanh.f32 %v1798_v61  ;;  %v3663_v12 = vmul.f32 -1.442695, %v1798_v61 }
0x1652   :  { %3988 = vpow2.f32 %v3663_v12 }
0x1656   :  { %v3987_v21 = vpop.eup %3986 }
0x1657   :  { %1845 = vrot.lane.b32.xlu2 %v3987_v21, %s4399_s3 }
0x1658   :  { %v3989_v26 = vpop.eup %3988 }
0x1659   :  { %v1806_v49 = vadd.f32 1.0, %v3989_v26 }
0x165b   :  { %3990 = vrcp.f32 %v1806_v49  ;;  %v1833_v25 = vand.u32 2147483648, %v1806_v49  ;;  %vm1827_vm10 = vweird.f32 %v1806_v49  ;;  %v1831_v11 = vand.u32 2147483647, %v1806_v49 }
0x165c   :  { %3992 = vpow2.f32 %v3662_v1 }
0x165d   :  { %v1834_v32 = vor.u32 1.1754944e-38, %v1833_v25  ;;  %vm1832_vm12 = vcmp.eq.f32.partialorder %v1831_v11, 8.507059e+37 }
0x1661   :  { %v3991_v44 = vpop.eup %3990 }
0x1662   :  { %v3993_v6 = vpop.eup %3992  ;;  %v1823_v5 = vmul.f32 %v3991_v44, %v1806_v49  ;;  %vm1828_vm9 = vweird.f32 %v3991_v44 }
0x1663   :  { %v1805_v56 = vadd.f32 1.0, %v3993_v6  ;;  %vm1829_vm11 = vmor %vm1827_vm10, %vm1828_vm9 }
0x1664   :  { %v1824_v7 = vsub.f32 1.0, %v1823_v5 }
0x1665   :  { %3994 = vrcp.f32 %v1805_v56  ;;  %v1818_v22 = vand.u32 2147483648, %v1805_v56  ;;  %vm1812_vm14 = vweird.f32 %v1805_v56  ;;  %v1816_v36 = vand.u32 2147483647, %v1805_v56 }
0x1666   :  { %v1825_v8 = vmul.f32 %v3991_v44, %v1824_v7 }
0x1667   :  { %v1819_v41 = vor.u32 1.1754944e-38, %v1818_v22  ;;  %vm1817_vm1 = vcmp.eq.f32.partialorder %v1816_v36, 8.507059e+37 }
0x1668   :  { %v1826_v40 = vadd.f32 %v3991_v44, %v1825_v8 }
0x166a   :  { %v1830_v31 = vsel %vm1829_vm11, %v3991_v44, %v1826_v40 }
0x166b   :  { %v3995_v37 = vpop.eup %3994  ;;  %v1835_v23 = vsel %vm1832_vm12, %v1834_v32, %v1830_v31 }
0x166c   :  { %v1808_v16 = vmul.f32 %v3995_v37, %v1805_v56  ;;  %vm1813_vm13 = vweird.f32 %v3995_v37  ;;  %v1840_v30 = vmul.f32 %v1835_v23, %v4923_v58 }
0x166d   :  { %vm1814_vm15 = vmor %vm1812_vm14, %vm1813_vm13 }
0x166e   :  { %v1809_v17 = vsub.f32 1.0, %v1808_v16 }
0x1670   :  { %v1810_v62 = vmul.f32 %v3995_v37, %v1809_v17 }
0x1672   :  { %v1811_v28 = vadd.f32 %v3995_v37, %v1810_v62 }
0x1674   :  { %v1815_v39 = vsel %vm1814_vm15, %v3995_v37, %v1811_v28 }
0x1675   :  { %v1820_v43 = vsel %vm1817_vm1, %v1819_v41, %v1815_v39 }
0x1676   :  { %v1839_v63 = vmul.f32 %v1820_v43, %v4929_v33 }
0x16b1   :  { %v1846_v35 = vpop.permute.xlu2 %1845 }
0x16b2   :  { %v1850_v27 = vmul.f32 %v1846_v35, %v1835_v23 }
0x16b4   :  { %1855 = vrot.lane.b32.xlu1 %v1850_v27, %s4399_s3 }
0x16bc   :  { %875 = vrot.lane.b32.xlu1 %v4732_v2, %s4391_s21 }
0x16c1   :  { %v1844_v42 = vpop.permute.xlu1 %1843 }
0x16c2   :  { %v1849_v47 = vmul.f32 %v1844_v42, %v1820_v43 }
0x16c4   :  { %1853 = vrot.lane.b32.xlu0 %v1849_v47, %s4399_s3 }
0x1726   :  { %v1856_v19 = vpop.permute.xlu1 %1855 }
0x1727   :  { %v4956_v52 = vadd.f32 %v1856_v19, %v1840_v30 }
0x1729   :  { %3996 = vtanh.f32 %v4956_v52 }
0x172e   :  { %v876_v48 = vpop.permute.xlu1 %875 }
0x172f   :  { %v3997_v2 = vpop.eup %3996  ;;  %882 = vst.msk [vmem:[#allocation3 + $0x20] sm:$0xf] %vm425_vm4, %v876_v48 }
0x1730   :  { %1867 = vrot.lane.b32.xlu0 %v3997_v2, %s4399_s3 }
0x1736   :  { %v1854_v54 = vpop.permute.xlu0 %1853 }
0x1737   :  { %v4962_v50 = vadd.f32 %v1854_v54, %v1839_v63 }
0x1739   :  { %3998 = vtanh.f32 %v4962_v50 }
0x173f   :  { %v3999_v29 = vpop.eup %3998 }
0x1740   :  { %1865 = vrot.lane.b32.xlu2 %v3999_v29, %s4399_s3 }
0x1748   :  { %877 = vrot.lane.b32.xlu2 %v4734_v4, %s4391_s21 }
0x179a   :  { %v1866_v58 = vpop.permute.xlu2 %1865 }
0x179b   :  { %v1871_v18 = vmul.f32 %v1866_v58, %v1820_v43 }
0x179d   :  { %v4968_v59 = vpack.c.bf16 %v1871_v18, %v1871_v18 }
0x179f   :  { %v1887_v61 = vunpack.c.l.b16 %v4968_v59 }
0x17a2   :  { %v1868_v14 = vpop.permute.xlu0 %1867  ;;  %v878_v20 = vpop.permute.xlu2 %877 }
0x17a3   :  { %v1872_v60 = vmul.f32 %v1868_v14, %v1835_v23  ;;  %883 = vst.msk [vmem:[#allocation3 + $0x24] sm:$0xf] %vm425_vm4, %v878_v20 }
0x17a5   :  { %v4971_v33 = vpack.c.bf16 %v1872_v60, %v1872_v60 }
0x17a7   :  { %v1888_v21 = vunpack.c.l.b16 %v4971_v33 }
0x17a9   :  { %v1889_v12 = vpack.c.b16 %v1888_v21, %v1887_v61 }
0x17aa   :  { %v3788_v26 = vld [vmem:[#allocation3 + $0x20] sm:$0xff] }
0x17ab   :  { %1890 = vrot.lane.b32.xlu0 %v1889_v12, %s4391_s21  ;;  %3638 = vmatmul.msk.bf16.gmra.mxu3 %vm201_vm0, %v3788_v26 }
0x181d   :  { %v1891_v4 = vpop.permute.xlu0 %1890 }
0x181e   :  { %3664 = vmatmul.msk.bf16.vlgmr.msra.gmra.mxu1 %vm201_vm0, %v1891_v4 }
0x182e   :  { %v1375_v49 = vpop.f32.mrf.mxu3 }
0x182f   :  { %v1376_v1 = vadd.f32 %v4805_v45, %v1375_v49 }
0x1836   :  { %v1377_v5 = vpop.f32.mrf.mxu3 }
0x1837   :  { %v1378_v56 = vadd.f32 %v4805_v45, %v1377_v5 }
0x189b   :  { %v1904_v44 = vpop.f32.mrf.mxu1 }
0x189c   :  { %v1909_v6 = vadd.f32 %v1904_v44, %v1376_v1 }
0x189e   :  { %4000 = vtanh.f32 %v1909_v6  ;;  %v3665_v16 = vmul.f32 -1.442695, %v1909_v6 }
0x18a3   :  { %v1906_v7 = vpop.f32.mrf.mxu1 }
0x18a4   :  { %v4001_v8 = vpop.eup %4000  ;;  %v1910_v40 = vadd.f32 %v1906_v7, %v1378_v56 }
0x18a5   :  { %1955 = vrot.lane.b32.xlu1 %v4001_v8, %s4399_s3 }
0x18a6   :  { %4002 = vtanh.f32 %v1910_v40  ;;  %v3666_v25 = vmul.f32 -1.442695, %v1910_v40 }
0x18a8   :  { %4004 = vpow2.f32 %v3666_v25 }
0x18ac   :  { %v4003_v37 = vpop.eup %4002 }
0x18ad   :  { %1957 = vrot.lane.b32.xlu2 %v4003_v37, %s4399_s3 }
0x18ae   :  { %v4005_v11 = vpop.eup %4004 }
0x18af   :  { %v1918_v31 = vadd.f32 1.0, %v4005_v11 }
0x18b1   :  { %4006 = vrcp.f32 %v1918_v31  ;;  %v1945_v22 = vand.u32 2147483648, %v1918_v31  ;;  %vm1939_vm3 = vweird.f32 %v1918_v31  ;;  %v1943_v36 = vand.u32 2147483647, %v1918_v31 }
0x18b2   :  { %4008 = vpow2.f32 %v3665_v16 }
0x18b3   :  { %v1946_v42 = vor.u32 1.1754944e-38, %v1945_v22  ;;  %vm1944_vm6 = vcmp.eq.f32.partialorder %v1943_v36, 8.507059e+37 }
0x18b7   :  { %v4007_v32 = vpop.eup %4006 }
0x18b8   :  { %v4009_v35 = vpop.eup %4008  ;;  %v1935_v23 = vmul.f32 %v4007_v32, %v1918_v31  ;;  %vm1940_vm2 = vweird.f32 %v4007_v32  ;;  %v5012_v31 = vld [vmem:[%s5567_s8] ss:$0 sm:$0xff] }
0x18b9   :  { %v1917_v45 = vadd.f32 1.0, %v4009_v35  ;;  %vm1941_vm5 = vmor %vm1939_vm3, %vm1940_vm2 }
0x18ba   :  { %v1936_v27 = vsub.f32 1.0, %v1935_v23 }
0x18bb   :  { %4010 = vrcp.f32 %v1917_v45  ;;  %v1930_v63 = vand.u32 2147483648, %v1917_v45  ;;  %vm1924_vm8 = vweird.f32 %v1917_v45  ;;  %v1928_v54 = vand.u32 2147483647, %v1917_v45 }
0x18bc   :  { %v1937_v17 = vmul.f32 %v4007_v32, %v1936_v27 }
0x18bd   :  { %v1931_v58 = vor.u32 1.1754944e-38, %v1930_v63  ;;  %vm1929_vm10 = vcmp.eq.f32.partialorder %v1928_v54, 8.507059e+37 }
0x18be   :  { %v1938_v62 = vadd.f32 %v4007_v32, %v1937_v17 }
0x18c0   :  { %v1942_v39 = vsel %vm1941_vm5, %v4007_v32, %v1938_v62 }
0x18c1   :  { %v4011_v28 = vpop.eup %4010  ;;  %v1947_v47 = vsel %vm1944_vm6, %v1946_v42, %v1942_v39 }
0x18c2   :  { %v1920_v41 = vmul.f32 %v4011_v28, %v1917_v45  ;;  %vm1925_vm7 = vweird.f32 %v4011_v28  ;;  %v1952_v60 = vmul.f32 %v1947_v47, %v4956_v52 }
0x18c3   :  { %vm1926_vm9 = vmor %vm1924_vm8, %vm1925_vm7 }
0x18c4   :  { %v1921_v19 = vsub.f32 1.0, %v1920_v41 }
0x18c6   :  { %v1922_v48 = vmul.f32 %v4011_v28, %v1921_v19 }
0x18c8   :  { %v1923_v2 = vadd.f32 %v4011_v28, %v1922_v48 }
0x18ca   :  { %v1927_v29 = vsel %vm1926_vm9, %v4011_v28, %v1923_v2 }
0x18cb   :  { %v1932_v14 = vsel %vm1929_vm10, %v1931_v58, %v1927_v29 }
0x18cc   :  { %v1951_v26 = vmul.f32 %v1932_v14, %v4962_v50 }
0x1907   :  { %v1958_v43 = vpop.permute.xlu2 %1957 }
0x1908   :  { %v1962_v30 = vmul.f32 %v1958_v43, %v1947_v47 }
0x190a   :  { %1967 = vrot.lane.b32.xlu1 %v1962_v30, %s4399_s3 }
0x1912   :  { %989 = vrot.lane.b32.xlu1 %v4762_v53, %s4391_s21 }
0x1917   :  { %v1956_v18 = vpop.permute.xlu1 %1955 }
0x1918   :  { %v1961_v20 = vmul.f32 %v1956_v18, %v1932_v14 }
0x191a   :  { %1965 = vrot.lane.b32.xlu0 %v1961_v20, %s4399_s3 }
0x197c   :  { %v1968_v61 = vpop.permute.xlu1 %1967 }
0x197d   :  { %v4987_v21 = vadd.f32 %v1968_v61, %v1952_v60 }
0x197f   :  { %4012 = vtanh.f32 %v4987_v21 }
0x1984   :  { %v990_v12 = vpop.permute.xlu1 %989 }
0x1985   :  { %v4013_v53 = vpop.eup %4012  ;;  %996 = vst.msk [vmem:[#allocation3 + $0x28] sm:$0xf] %vm425_vm4, %v990_v12 }
0x1986   :  { %1979 = vrot.lane.b32.xlu0 %v4013_v53, %s4399_s3 }
0x198c   :  { %v1966_v4 = vpop.permute.xlu0 %1965 }
0x198d   :  { %v4993_v49 = vadd.f32 %v1966_v4, %v1951_v26 }
0x198f   :  { %4014 = vtanh.f32 %v4993_v49 }
0x1995   :  { %v4015_v1 = vpop.eup %4014 }
0x1996   :  { %1977 = vrot.lane.b32.xlu2 %v4015_v1, %s4399_s3 }
0x199e   :  { %991 = vrot.lane.b32.xlu2 %v4765_v24, %s4391_s21 }
0x19f0   :  { %v1978_v52 = vpop.permute.xlu2 %1977 }
0x19f1   :  { %v1983_v44 = vmul.f32 %v1978_v52, %v1932_v14 }
0x19f3   :  { %v4999_v56 = vpack.c.bf16 %v1983_v44, %v1983_v44 }
0x19f5   :  { %v1999_v8 = vunpack.c.l.b16 %v4999_v56 }
0x19f8   :  { %v1980_v6 = vpop.permute.xlu0 %1979  ;;  %v992_v5 = vpop.permute.xlu2 %991 }
0x19f9   :  { %v1984_v7 = vmul.f32 %v1980_v6, %v1947_v47  ;;  %997 = vst.msk [vmem:[#allocation3 + $0x2c] sm:$0xf] %vm425_vm4, %v992_v5 }
0x19fb   :  { %v5002_v50 = vpack.c.bf16 %v1984_v7, %v1984_v7 }
0x19fd   :  { %v2000_v40 = vunpack.c.l.b16 %v5002_v50 }
0x19ff   :  { %v2001_v37 = vpack.c.b16 %v2000_v40, %v1999_v8 }
0x1a00   :  { %v3789_v25 = vld [vmem:[#allocation3 + $0x28] sm:$0xff] }
0x1a01   :  { %2002 = vrot.lane.b32.xlu0 %v2001_v37, %s4391_s21  ;;  %3639 = vmatmul.msk.bf16.gmra.mxu3 %vm201_vm0, %v3789_v25 }
0x1a73   :  { %v2003_v24 = vpop.permute.xlu0 %2002 }
0x1a74   :  { %3667 = vmatmul.msk.bf16.vlgmr.msra.gmra.mxu2 %vm201_vm0, %v2003_v24 }
0x1a84   :  { %v1380_v11 = vpop.f32.mrf.mxu3 }
0x1a85   :  { %v1381_v16 = vadd.f32 %v5012_v31, %v1380_v11 }
0x1a8c   :  { %v1382_v23 = vpop.f32.mrf.mxu3 }
0x1a8d   :  { %v1383_v45 = vadd.f32 %v5012_v31, %v1382_v23 }
0x1af7   :  { %v2016_v32 = vpop.f32.mrf.mxu2 }
0x1af8   :  { %v2021_v35 = vadd.f32 %v2016_v32, %v1381_v16 }
0x1afa   :  { %4016 = vtanh.f32 %v2021_v35  ;;  %v3668_v41 = vmul.f32 -1.442695, %v2021_v35 }
0x1aff   :  { %v2018_v27 = vpop.f32.mrf.mxu2 }
0x1b00   :  { %v4017_v17 = vpop.eup %4016  ;;  %v2022_v62 = vadd.f32 %v2018_v27, %v1383_v45 }
0x1b01   :  { %2067 = vrot.lane.b32.xlu1 %v4017_v17, %s4399_s3 }
0x1b02   :  { %4018 = vtanh.f32 %v2022_v62  ;;  %v3669_v22 = vmul.f32 -1.442695, %v2022_v62 }
0x1b04   :  { %4020 = vpow2.f32 %v3669_v22 }
0x1b08   :  { %v4019_v28 = vpop.eup %4018 }
0x1b09   :  { %2069 = vrot.lane.b32.xlu2 %v4019_v28, %s4399_s3 }
0x1b0a   :  { %v4021_v36 = vpop.eup %4020 }
0x1b0b   :  { %v2030_v39 = vadd.f32 1.0, %v4021_v36 }
0x1b0d   :  { %4022 = vrcp.f32 %v2030_v39  ;;  %v2057_v54 = vand.u32 2147483648, %v2030_v39  ;;  %vm2051_vm12 = vweird.f32 %v2030_v39  ;;  %v2055_v29 = vand.u32 2147483647, %v2030_v39 }
0x1b0e   :  { %4024 = vpow2.f32 %v3668_v41 }
0x1b0f   :  { %v2058_v14 = vor.u32 1.1754944e-38, %v2057_v54  ;;  %vm2056_vm14 = vcmp.eq.f32.partialorder %v2055_v29, 8.507059e+37 }
0x1b13   :  { %v4023_v42 = vpop.eup %4022 }
0x1b14   :  { %v4025_v43 = vpop.eup %4024  ;;  %v2047_v47 = vmul.f32 %v4023_v42, %v2030_v39  ;;  %vm2052_vm11 = vweird.f32 %v4023_v42 }
0x1b15   :  { %v2029_v30 = vadd.f32 1.0, %v4025_v43  ;;  %vm2053_vm13 = vmor %vm2051_vm12, %vm2052_vm11 }
0x1b16   :  { %v2048_v19 = vsub.f32 1.0, %v2047_v47 }
0x1b17   :  { %4026 = vrcp.f32 %v2029_v30  ;;  %v2042_v4 = vand.u32 2147483648, %v2029_v30  ;;  %vm2036_vm1 = vweird.f32 %v2029_v30  ;;  %v2040_v1 = vand.u32 2147483647, %v2029_v30 }
0x1b18   :  { %v2049_v48 = vmul.f32 %v4023_v42, %v2048_v19 }
0x1b19   :  { %v2043_v44 = vor.u32 1.1754944e-38, %v2042_v4  ;;  %vm2041_vm3 = vcmp.eq.f32.partialorder %v2040_v1, 8.507059e+37 }
0x1b1a   :  { %v2050_v2 = vadd.f32 %v4023_v42, %v2049_v48 }
0x1b1c   :  { %v2054_v58 = vsel %vm2053_vm13, %v4023_v42, %v2050_v2 }
0x1b1d   :  { %v4027_v63 = vpop.eup %4026  ;;  %v2059_v60 = vsel %vm2056_vm14, %v2058_v14, %v2054_v58 }
0x1b1e   :  { %v2032_v18 = vmul.f32 %v4027_v63, %v2029_v30  ;;  %vm2037_vm15 = vweird.f32 %v4027_v63  ;;  %v2064_v8 = vmul.f32 %v2059_v60, %v4987_v21 }
0x1b1f   :  { %vm2038_vm2 = vmor %vm2036_vm1, %vm2037_vm15 }
0x1b20   :  { %v2033_v12 = vsub.f32 1.0, %v2032_v18 }
0x1b22   :  { %v2034_v53 = vmul.f32 %v4027_v63, %v2033_v12 }
0x1b24   :  { %v2035_v26 = vadd.f32 %v4027_v63, %v2034_v53 }
0x1b26   :  { %v2039_v52 = vsel %vm2038_vm2, %v4027_v63, %v2035_v26 }
0x1b27   :  { %v2044_v5 = vsel %vm2041_vm3, %v2043_v44, %v2039_v52 }
0x1b28   :  { %v2063_v24 = vmul.f32 %v2044_v5, %v4993_v49 }
0x1b63   :  { %v2070_v20 = vpop.permute.xlu2 %2069 }
0x1b64   :  { %v2074_v61 = vmul.f32 %v2070_v20, %v2059_v60 }
0x1b66   :  { %2079 = vrot.lane.b32.xlu1 %v2074_v61, %s4399_s3 }
0x1b6e   :  { %1103 = vrot.lane.b32.xlu1 %v4849_v13, %s4391_s21 }
0x1b73   :  { %v2068_v6 = vpop.permute.xlu1 %2067 }
0x1b74   :  { %v2073_v7 = vmul.f32 %v2068_v6, %v2044_v5 }
0x1b76   :  { %2077 = vrot.lane.b32.xlu0 %v2073_v7, %s4399_s3 }
0x1bd8   :  { %v2080_v40 = vpop.permute.xlu1 %2079 }
0x1bd9   :  { %v5023_v37 = vadd.f32 %v2080_v40, %v2064_v8 }
0x1bdb   :  { %4028 = vtanh.f32 %v5023_v37 }
0x1be0   :  { %v1104_v25 = vpop.permute.xlu1 %1103 }
0x1be1   :  { %v4029_v13 = vpop.eup %4028  ;;  %1110 = vst.msk [vmem:[#allocation3 + $0x30] sm:$0xf] %vm425_vm4, %v1104_v25 }
0x1be2   :  { %2091 = vrot.lane.b32.xlu0 %v4029_v13, %s4399_s3 }
0x1be8   :  { %v2078_v11 = vpop.permute.xlu0 %2077 }
0x1be9   :  { %v5029_v16 = vadd.f32 %v2078_v11, %v2063_v24 }
0x1beb   :  { %4030 = vtanh.f32 %v5029_v16 }
0x1bf1   :  { %v4031_v32 = vpop.eup %4030 }
0x1bf2   :  { %2089 = vrot.lane.b32.xlu2 %v4031_v32, %s4399_s3 }
0x1bfa   :  { %1105 = vrot.lane.b32.xlu2 %v4852_v51, %s4391_s21 }
0x1c4c   :  { %v2090_v21 = vpop.permute.xlu2 %2089 }
0x1c4d   :  { %v2095_v35 = vmul.f32 %v2090_v21, %v2044_v5 }
0x1c4f   :  { %v5035_v27 = vpack.c.bf16 %v2095_v35, %v2095_v35 }
0x1c51   :  { %v2111_v62 = vunpack.c.l.b16 %v5035_v27 }
0x1c54   :  { %v2092_v23 = vpop.permute.xlu0 %2091  ;;  %v1106_v45 = vpop.permute.xlu2 %1105 }
0x1c55   :  { %v2096_v17 = vmul.f32 %v2092_v23, %v2059_v60  ;;  %1111 = vst.msk [vmem:[#allocation3 + $0x34] sm:$0xf] %vm425_vm4, %v1106_v45 }
0x1c57   :  { %v5038_v49 = vpack.c.bf16 %v2096_v17, %v2096_v17 }
0x1c59   :  { %v2112_v28 = vunpack.c.l.b16 %v5038_v49 }
0x1c5b   :  { %v2113_v22 = vpack.c.b16 %v2112_v28, %v2111_v62 }
0x1c5c   :  { %v3790_v36 = vld [vmem:[#allocation3 + $0x30] sm:$0xff] }
0x1c5d   :  { %2114 = vrot.lane.b32.xlu0 %v2113_v22, %s4391_s21  ;;  %3640 = vmatmul.msk.bf16.gmra.mxu3 %vm201_vm0, %v3790_v36 }
0x1ccf   :  { %v2115_v51 = vpop.permute.xlu0 %2114 }
0x1cd0   :  { %3670 = vmatmul.msk.bf16.vlgmr.msrb.gmra.mxu1 %vm201_vm0, %v2115_v51 }
0x1ce0   :  { %v1385_v39 = vpop.f32.mrf.mxu3 }
0x1ce1   :  { %v1386_v41 = vadd.f32 %v5012_v31, %v1385_v39 }
0x1ce8   :  { %v1387_v47 = vpop.f32.mrf.mxu3 }
0x1ce9   :  { %v1388_v30 = vadd.f32 %v5012_v31, %v1387_v47 }
0x1d4d   :  { %v2128_v42 = vpop.f32.mrf.mxu1 }
0x1d4e   :  { %v2133_v43 = vadd.f32 %v2128_v42, %v1386_v41  ;;  %v3804_v42 = vld [vmem:[#allocation10] sm:$0xff] }
0x1d50   :  { %4032 = vtanh.f32 %v2133_v43  ;;  %v3671_v18 = vmul.f32 -1.442695, %v2133_v43 }
0x1d55   :  { %v2130_v19 = vpop.f32.mrf.mxu1 }
0x1d56   :  { %v4033_v48 = vpop.eup %4032  ;;  %v2134_v2 = vadd.f32 %v2130_v19, %v1388_v30 }
0x1d57   :  { %2179 = vrot.lane.b32.xlu1 %v4033_v48, %s4399_s3 }
0x1d58   :  { %4034 = vtanh.f32 %v2134_v2  ;;  %v3672_v54 = vmul.f32 -1.442695, %v2134_v2 }
0x1d5a   :  { %4036 = vpow2.f32 %v3672_v54 }
0x1d5e   :  { %v4035_v63 = vpop.eup %4034 }
0x1d5f   :  { %2181 = vrot.lane.b32.xlu2 %v4035_v63, %s4399_s3 }
0x1d60   :  { %v4037_v29 = vpop.eup %4036 }
0x1d61   :  { %v2142_v58 = vadd.f32 1.0, %v4037_v29 }
0x1d63   :  { %4038 = vrcp.f32 %v2142_v58  ;;  %v2169_v4 = vand.u32 2147483648, %v2142_v58  ;;  %vm2163_vm6 = vweird.f32 %v2142_v58  ;;  %v2167_v1 = vand.u32 2147483647, %v2142_v58 }
0x1d64   :  { %4040 = vpow2.f32 %v3671_v18  ;;  %v5078_v18 = vld [vmem:[#allocation12] sm:$0xff] }
0x1d65   :  { %v2170_v6 = vor.u32 1.1754944e-38, %v2169_v4  ;;  %vm2168_vm8 = vcmp.eq.f32.partialorder %v2167_v1, 8.507059e+37  ;;  %v5107_v4 = vld [vmem:[%s5570_s11] ss:$0 sm:$0xff] }
0x1d69   :  { %v4039_v14 = vpop.eup %4038 }
0x1d6a   :  { %v4041_v20 = vpop.eup %4040  ;;  %v2159_v60 = vmul.f32 %v4039_v14, %v2142_v58  ;;  %vm2164_vm5 = vweird.f32 %v4039_v14  ;;  %v5075_v58 = vld [vmem:[#allocation12 + $0x8] sm:$0xff] }
0x1d6b   :  { %v2141_v31 = vadd.f32 1.0, %v4041_v20  ;;  %vm2165_vm7 = vmor %vm2163_vm6, %vm2164_vm5  ;;  %2554 = vmatpush.bf16.msra.mxu2 %v5075_v58  ;;  %2674 = vmatpush.bf16.msra.mxu0 %v5075_v58 }
0x1d6c   :  { %v2160_v61 = vsub.f32 1.0, %v2159_v60  ;;  %3352 = vmatpush.bf16.msra.mxu3 %v5075_v58  ;;  %v3724_v60 = vld [vmem:[%s5560_s1 + $0x20] sm:$0xff] }
0x1d6d   :  { %4042 = vrcp.f32 %v2141_v31  ;;  %v2154_v24 = vand.u32 2147483648, %v2141_v31  ;;  %vm2148_vm10 = vweird.f32 %v2141_v31  ;;  %v2152_v11 = vand.u32 2147483647, %v2141_v31 }
0x1d6e   :  { %v2161_v12 = vmul.f32 %v4039_v14, %v2160_v61 }
0x1d6f   :  { %v2155_v21 = vor.u32 1.1754944e-38, %v2154_v24  ;;  %vm2153_vm12 = vcmp.eq.f32.partialorder %v2152_v11, 8.507059e+37  ;;  %2555 = vmatpush.bf16.msra.mxu2 %v5078_v18  ;;  %2675 = vmatpush.bf16.msra.mxu0 %v5078_v18 }
0x1d70   :  { %v2162_v53 = vadd.f32 %v4039_v14, %v2161_v12  ;;  %3353 = vmatpush.bf16.msra.mxu3 %v5078_v18 }
0x1d72   :  { %v2166_v52 = vsel %vm2165_vm7, %v4039_v14, %v2162_v53  ;;  %v2528_v14 = vld [vmem:[#allocation4 + $0x20] sm:$0xff] }
0x1d73   :  { %v4043_v26 = vpop.eup %4042  ;;  %v2171_v7 = vsel %vm2168_vm8, %v2170_v6, %v2166_v52  ;;  %2900 = vmatpush.bf16.msrb.mxu0 %v5075_v58 }
0x1d74   :  { %v2144_v44 = vmul.f32 %v4043_v26, %v2141_v31  ;;  %vm2149_vm9 = vweird.f32 %v4043_v26  ;;  %v2176_v17 = vmul.f32 %v2171_v7, %v5023_v37  ;;  %v3805_v37 = vld [vmem:[#allocation10 + $0x8] sm:$0xff]  ;;  %v3725_v31 = vld [vmem:[%s5560_s1 + $0x28] sm:$0xff]  ;;  %s4401_s1 = smov [#allocation14]  }
0x1d75   :  { %vm2150_vm11 = vmor %vm2148_vm10, %vm2149_vm9  ;;  %2461 = vmatpush.bf16.msra.mxu1 %v3805_v37  ;;  %v2532_v61 = vpack.c.bf16 %v3725_v31, %v3724_v60  ;;  %s3490_s9 = sshll.u32 %s4401_s1, 4  ;;  %s3491_s9 = int_to_ptr.vmem [resolvable:$true] %s3490_s9 }
0x1d76   :  { %v2145_v40 = vsub.f32 1.0, %v2144_v44 }
0x1d77   :  { %2901 = vmatpush.bf16.msrb.mxu0 %v5078_v18 }
0x1d78   :  { %v2146_v25 = vmul.f32 %v4043_v26, %v2145_v40 }
0x1d79   :  { %2462 = vmatpush.bf16.msra.mxu1 %v3804_v42 }
0x1d7a   :  { %v2147_v13 = vadd.f32 %v4043_v26, %v2146_v25  ;;  %v2529_v25 = vld [vmem:[#allocation4 + $0x28] sm:$0xff] }
0x1d7c   :  { %v2151_v32 = vsel %vm2150_vm11, %v4043_v26, %v2147_v13 }
0x1d7d   :  { %v2156_v23 = vsel %vm2153_vm12, %v2155_v21, %v2151_v32 }
0x1d7e   :  { %v2175_v36 = vmul.f32 %v2156_v23, %v5029_v16 }
0x1db9   :  { %v2182_v5 = vpop.permute.xlu2 %2181 }
0x1dba   :  { %v2186_v8 = vmul.f32 %v2182_v5, %v2171_v7 }
0x1dbc   :  { %2191 = vrot.lane.b32.xlu1 %v2186_v8, %s4399_s3 }
0x1dc9   :  { %v2180_v35 = vpop.permute.xlu1 %2179 }
0x1dca   :  { %v2185_v45 = vmul.f32 %v2180_v35, %v2156_v23 }
0x1dcc   :  { %2189 = vrot.lane.b32.xlu0 %v2185_v45, %s4399_s3 }
0x1e2e   :  { %v2192_v62 = vpop.permute.xlu1 %2191 }
0x1e2f   :  { %v5052_v28 = vadd.f32 %v2192_v62, %v2176_v17 }
0x1e31   :  { %4044 = vtanh.f32 %v5052_v28 }
0x1e37   :  { %v4045_v22 = vpop.eup %4044 }
0x1e38   :  { %2203 = vrot.lane.b32.xlu0 %v4045_v22, %s4399_s3 }
0x1e3e   :  { %v2190_v51 = vpop.permute.xlu0 %2189 }
0x1e3f   :  { %v5057_v39 = vadd.f32 %v2190_v51, %v2175_v36 }
0x1e40   :  { %1543 = vrot.lane.b32.xlu0 %v4858_v55, %s4391_s21 }
0x1e41   :  { %4046 = vtanh.f32 %v5057_v39 }
0x1e47   :  { %v4047_v41 = vpop.eup %4046 }
0x1e48   :  { %2201 = vrot.lane.b32.xlu2 %v4047_v41, %s4399_s3  ;;  %2606 = vrot.lane.b32.xlu0 %v2528_v14, %s4399_s3 }
0x1e50   :  { %1541 = vrot.lane.b32.xlu2 %v4860_v57, %s4391_s21 }
0x1ea2   :  { %v2202_v43 = vpop.permute.xlu2 %2201 }
0x1ea3   :  { %v2207_v16 = vmul.f32 %v2202_v43, %v2156_v23 }
0x1ea5   :  { %v5065_v19 = vpack.c.bf16 %v2207_v16, %v2207_v16 }
0x1ea7   :  { %v2223_v2 = vunpack.c.l.b16 %v5065_v19 }
0x1eaa   :  { %v2204_v47 = vpop.permute.xlu0 %2203  ;;  %v1542_v30 = vpop.permute.xlu2 %1541 }
0x1eab   :  { %v2208_v48 = vmul.f32 %v2204_v47, %v2171_v7  ;;  %1547 = vst.msk [vmem:[#allocation3] sm:$0xf] %vm425_vm4, %v1542_v30 }
0x1ead   :  { %v5068_v55 = vpack.c.bf16 %v2208_v48, %v2208_v48 }
0x1eaf   :  { %v2224_v63 = vunpack.c.l.b16 %v5068_v55 }
0x1eb1   :  { %v2225_v57 = vpack.c.b16 %v2224_v63, %v2223_v2 }
0x1eb2   :  { %v1544_v54 = vpop.permute.xlu0 %1543 }
0x1eb3   :  { %1548 = vst.msk [vmem:[#allocation3 + $0x4] sm:$0xf] %vm425_vm4, %v1544_v54  ;;  %2226 = vrot.lane.b32.xlu1 %v2225_v57, %s4391_s21 }
0x1eba   :  { %v3796_v29 = vld [vmem:[#allocation3] sm:$0xff] }
0x1ebb   :  { %3716 = vmatmul.msk.bf16.vlgmr.msra.gmra.mxu1 %vm201_vm0, %v3796_v29 }
0x1f25   :  { %v2227_v20 = vpop.permute.xlu1 %2226 }
0x1f26   :  { %3673 = vmatmul.msk.bf16.vlgmr.msrb.gmra.mxu2 %vm201_vm0, %v2227_v20 }
0x1f27   :  { %2787 = vmatpush.bf16.msrb.mxu2 %v5075_v58 }
0x1f2b   :  { %2788 = vmatpush.bf16.msrb.mxu2 %v5078_v18 }
0x1f36   :  { %3734 = vmatmul.msk.bf16.vlgmr.msra.gmra.mxu2 %vm201_vm0, %v2532_v61 }
0x1f37   :  { %3013 = vmatpush.bf16.msra.mxu2 %v5075_v58 }
0x1f38   :  { %v2464_v26 = vpop.f32.mrf.mxu1 }
0x1f39   :  { %v2465_v1 = vadd.f32 %v5107_v4, %v2464_v26  ;;  %v2607_v26 = vpop.permute.xlu0 %2606 }
0x1f3b   :  { %3014 = vmatpush.bf16.msra.mxu2 %v5078_v18 }
0x1f40   :  { %v2466_v6 = vpop.f32.mrf.mxu1 }
0x1f41   :  { %v2467_v5 = vadd.f32 %v5107_v4, %v2466_v6 }
0x1fa9   :  { %v5100_v12 = vpop.f32.mrf.mxu2 }
0x1fb1   :  { %v5102_v53 = vpop.f32.mrf.mxu2 }
0x1fb9   :  { %v2557_v52 = vpop.f32.mrf.mxu2 }
0x1fba   :  { %v2562_v44 = vadd.f32 %v2557_v52, %v2465_v1 }
0x1fbc   :  { %4048 = vtanh.f32 %v2562_v44  ;;  %v3735_v21 = vmul.f32 -1.442695, %v2562_v44 }
0x1fc1   :  { %v2559_v7 = vpop.f32.mrf.mxu2 }
0x1fc2   :  { %v4049_v8 = vpop.eup %4048  ;;  %v2563_v40 = vadd.f32 %v2559_v7, %v2467_v5 }
0x1fc3   :  { %2616 = vrot.lane.b32.xlu1 %v4049_v8, %s4399_s3 }
0x1fc4   :  { %4050 = vtanh.f32 %v2563_v40  ;;  %v3736_v24 = vmul.f32 -1.442695, %v2563_v40 }
0x1fc6   :  { %4052 = vpow2.f32 %v3736_v24 }
0x1fca   :  { %v4051_v13 = vpop.eup %4050 }
0x1fcb   :  { %2618 = vrot.lane.b32.xlu2 %v4051_v13, %s4399_s3  ;;  %2608 = vrot.lane.b32.xlu1 %v2529_v25, %s4399_s3 }
0x1fcc   :  { %v4053_v11 = vpop.eup %4052 }
0x1fcd   :  { %v2571_v32 = vadd.f32 1.0, %v4053_v11 }
0x1fcf   :  { %4054 = vrcp.f32 %v2571_v32  ;;  %v2598_v41 = vand.u32 2147483648, %v2571_v32  ;;  %vm2592_vm14 = vweird.f32 %v2571_v32  ;;  %v2596_v37 = vand.u32 2147483647, %v2571_v32 }
0x1fd0   :  { %4056 = vpow2.f32 %v3735_v21 }
0x1fd1   :  { %v2599_v16 = vor.u32 1.1754944e-38, %v2598_v41  ;;  %vm2597_vm1 = vcmp.eq.f32.partialorder %v2596_v37, 8.507059e+37 }
0x1fd5   :  { %v4055_v35 = vpop.eup %4054 }
0x1fd6   :  { %v4057_v23 = vpop.eup %4056  ;;  %v2588_v45 = vmul.f32 %v4055_v35, %v2571_v32  ;;  %vm2593_vm13 = vweird.f32 %v4055_v35 }
0x1fd7   :  { %v2570_v17 = vadd.f32 1.0, %v4057_v23  ;;  %vm2594_vm15 = vmor %vm2592_vm14, %vm2593_vm13 }
0x1fd8   :  { %v2589_v62 = vsub.f32 1.0, %v2588_v45 }
0x1fd9   :  { %4058 = vrcp.f32 %v2570_v17  ;;  %v2583_v54 = vand.u32 2147483648, %v2570_v17  ;;  %vm2577_vm3 = vweird.f32 %v2570_v17  ;;  %v2581_v29 = vand.u32 2147483647, %v2570_v17 }
0x1fda   :  { %v2590_v22 = vmul.f32 %v4055_v35, %v2589_v62 }
0x1fdb   :  { %v2584_v20 = vor.u32 1.1754944e-38, %v2583_v54  ;;  %vm2582_vm6 = vcmp.eq.f32.partialorder %v2581_v29, 8.507059e+37 }
0x1fdc   :  { %v2591_v36 = vadd.f32 %v4055_v35, %v2590_v22 }
0x1fde   :  { %v2595_v43 = vsel %vm2594_vm15, %v4055_v35, %v2591_v36 }
0x1fdf   :  { %v4059_v51 = vpop.eup %4058  ;;  %v2600_v30 = vsel %vm2597_vm1, %v2599_v16, %v2595_v43 }
0x1fe0   :  { %v2573_v42 = vmul.f32 %v4059_v51, %v2570_v17  ;;  %vm2578_vm2 = vweird.f32 %v4059_v51 }
0x1fe1   :  { %vm2579_vm5 = vmor %vm2577_vm3, %vm2578_vm2 }
0x1fe2   :  { %v2574_v48 = vsub.f32 1.0, %v2573_v42 }
0x1fe4   :  { %v2575_v63 = vmul.f32 %v4059_v51, %v2574_v48 }
0x1fe6   :  { %v2576_v57 = vadd.f32 %v4059_v51, %v2575_v63 }
0x1fe8   :  { %v2580_v14 = vsel %vm2579_vm5, %v4059_v51, %v2576_v57 }
0x1fe9   :  { %v2585_v60 = vsel %vm2582_vm6, %v2584_v20, %v2580_v14 }
0x1fea   :  { %v2612_v1 = vmul.f32 %v2607_v26, %v2585_v60 }
0x2025   :  { %v2619_v47 = vpop.permute.xlu2 %2618 }
0x2026   :  { %v2623_v2 = vmul.f32 %v2619_v47, %v2600_v30 }
0x2028   :  { %2628 = vrot.lane.b32.xlu0 %v2623_v2, %s4399_s3 }
0x2030   :  { %1653 = vrot.lane.b32.xlu0 %v4902_v38, %s4391_s21 }
0x2035   :  { %v2617_v31 = vpop.permute.xlu1 %2616 }
0x2036   :  { %v2622_v61 = vmul.f32 %v2617_v31, %v2585_v60 }
0x2038   :  { %2626 = vrot.lane.b32.xlu2 %v2622_v61, %s4399_s3 }
0x203d   :  { %v2609_v6 = vpop.permute.xlu1 %2608 }
0x203e   :  { %v2613_v5 = vmul.f32 %v2609_v6, %v2600_v30 }
0x2092   :  { %v2627_v52 = vpop.permute.xlu2 %2626 }
0x2093   :  { %v5118_v44 = vadd.f32 %v2627_v52, %v2612_v1 }
0x2095   :  { %4060 = vtanh.f32 %v5118_v44 }
0x209a   :  { %v2629_v7 = vpop.permute.xlu0 %2628 }
0x209b   :  { %v4061_v38 = vpop.eup %4060  ;;  %v5121_v8 = vadd.f32 %v2629_v7, %v2613_v5 }
0x209c   :  { %2638 = vrot.lane.b32.xlu1 %v4061_v38, %s4399_s3 }
0x209d   :  { %4062 = vtanh.f32 %v5121_v8 }
0x20a2   :  { %v1654_v40 = vpop.permute.xlu0 %1653 }
0x20a3   :  { %v4063_v25 = vpop.eup %4062  ;;  %1659 = vst.msk [vmem:[#allocation3 + $0x8] sm:$0xf] %vm425_vm4, %v1654_v40 }
0x20a4   :  { %2640 = vrot.lane.b32.xlu2 %v4063_v25, %s4399_s3  ;;  %1655 = vrot.lane.b32.xlu1 %v4905_v34, %s4391_s21 }
0x20fe   :  { %v2641_v13 = vpop.permute.xlu2 %2640 }
0x20ff   :  { %v2645_v24 = vmul.f32 %v2641_v13, %v2600_v30 }
0x2101   :  { %v5129_v32 = vpack.c.bf16 %v2645_v24, %v2645_v24 }
0x2103   :  { %v2661_v23 = vunpack.c.l.b16 %v5129_v32 }
0x210e   :  { %v2639_v11 = vpop.permute.xlu1 %2638 }
0x210f   :  { %v2644_v21 = vmul.f32 %v2639_v11, %v2585_v60 }
0x2111   :  { %v5131_v35 = vpack.c.bf16 %v2644_v21, %v2644_v21 }
0x2113   :  { %v2660_v45 = vunpack.c.l.b16 %v5131_v35 }
0x2115   :  { %v2662_v17 = vpack.c.b16 %v2661_v23, %v2660_v45 }
0x2116   :  { %v1656_v62 = vpop.permute.xlu1 %1655 }
0x2117   :  { %1660 = vst.msk [vmem:[#allocation3 + $0xc] sm:$0xf] %vm425_vm4, %v1656_v62  ;;  %2663 = vrot.lane.b32.xlu2 %v2662_v17, %s4391_s21 }
0x211e   :  { %v3797_v22 = vld [vmem:[#allocation3 + $0x8] sm:$0xff] }
0x211f   :  { %3717 = vmatmul.msk.bf16.gmra.mxu1 %vm201_vm0, %v3797_v22 }
0x2171   :  { %v2664_v34 = vpop.permute.xlu2 %2663 }
0x2172   :  { %3737 = vmatmul.msk.bf16.vlgmr.msra.gmra.mxu0 %vm201_vm0, %v2664_v34 }
0x2173   :  { %3126 = vmatpush.bf16.msra.mxu0 %v5075_v58 }
0x2177   :  { %3127 = vmatpush.bf16.msra.mxu0 %v5078_v18 }
0x219c   :  { %v2469_v36 = vpop.f32.mrf.mxu1 }
0x219d   :  { %v2470_v51 = vadd.f32 %v5107_v4, %v2469_v36 }
0x21a4   :  { %v2471_v42 = vpop.f32.mrf.mxu1 }
0x21a5   :  { %v2472_v43 = vadd.f32 %v5107_v4, %v2471_v42 }
0x21ef   :  { %v2677_v41 = vpop.f32.mrf.mxu0 }
0x21f0   :  { %v2682_v37 = vadd.f32 %v2677_v41, %v2470_v51 }
0x21f2   :  { %4064 = vtanh.f32 %v2682_v37  ;;  %v3738_v2 = vmul.f32 -1.442695, %v2682_v37 }
0x21f7   :  { %v2679_v16 = vpop.f32.mrf.mxu0 }
0x21f8   :  { %v4065_v47 = vpop.eup %4064  ;;  %v2683_v30 = vadd.f32 %v2679_v16, %v2472_v43 }
0x21f9   :  { %2728 = vrot.lane.b32.xlu0 %v4065_v47, %s4399_s3 }
0x21fa   :  { %4066 = vtanh.f32 %v2683_v30  ;;  %v3739_v63 = vmul.f32 -1.442695, %v2683_v30 }
0x21fb   :  { %4068 = vpow2.f32 %v3738_v2 }
0x21fc   :  { %4070 = vpow2.f32 %v3739_v63 }
0x2200   :  { %v4067_v48 = vpop.eup %4066 }
0x2201   :  { %2730 = vrot.lane.b32.xlu1 %v4067_v48, %s4399_s3  ;;  %v4069_v57 = vpop.eup %4068 }
0x2202   :  { %v2690_v54 = vadd.f32 1.0, %v4069_v57  ;;  %v4071_v29 = vpop.eup %4070 }
0x2203   :  { %v2691_v14 = vadd.f32 1.0, %v4071_v29 }
0x2204   :  { %4072 = vrcp.f32 %v2690_v54  ;;  %v2703_v5 = vand.u32 2147483648, %v2690_v54  ;;  %vm2697_vm8 = vweird.f32 %v2690_v54  ;;  %v2701_v7 = vand.u32 2147483647, %v2690_v54 }
0x2205   :  { %4074 = vrcp.f32 %v2691_v14  ;;  %v2718_v23 = vand.u32 2147483648, %v2691_v14  ;;  %vm2712_vm12 = vweird.f32 %v2691_v14  ;;  %v2716_v45 = vand.u32 2147483647, %v2691_v14 }
0x2206   :  { %v2704_v25 = vor.u32 1.1754944e-38, %v2703_v5  ;;  %vm2702_vm10 = vcmp.eq.f32.partialorder %v2701_v7, 8.507059e+37 }
0x2207   :  { %v2719_v62 = vor.u32 1.1754944e-38, %v2718_v23  ;;  %vm2717_vm14 = vcmp.eq.f32.partialorder %v2716_v45, 8.507059e+37 }
0x220a   :  { %v4073_v20 = vpop.eup %4072 }
0x220b   :  { %v2693_v60 = vmul.f32 %v4073_v20, %v2690_v54  ;;  %v4075_v61 = vpop.eup %4074  ;;  %vm2698_vm7 = vweird.f32 %v4073_v20 }
0x220c   :  { %v2708_v1 = vmul.f32 %v4075_v61, %v2691_v14  ;;  %vm2699_vm9 = vmor %vm2697_vm8, %vm2698_vm7  ;;  %vm2713_vm11 = vweird.f32 %v4075_v61 }
0x220d   :  { %v2694_v31 = vsub.f32 1.0, %v2693_v60  ;;  %vm2714_vm13 = vmor %vm2712_vm12, %vm2713_vm11 }
0x220e   :  { %v2709_v6 = vsub.f32 1.0, %v2708_v1 }
0x220f   :  { %v2695_v26 = vmul.f32 %v4073_v20, %v2694_v31 }
0x2210   :  { %v2710_v40 = vmul.f32 %v4075_v61, %v2709_v6 }
0x2211   :  { %v2696_v52 = vadd.f32 %v4073_v20, %v2695_v26 }
0x2212   :  { %v2711_v21 = vadd.f32 %v4075_v61, %v2710_v40 }
0x2213   :  { %v2700_v38 = vsel %vm2699_vm9, %v4073_v20, %v2696_v52 }
0x2214   :  { %v2705_v24 = vsel %vm2702_vm10, %v2704_v25, %v2700_v38  ;;  %v2715_v17 = vsel %vm2714_vm13, %v4075_v61, %v2711_v21 }
0x2215   :  { %v2720_v34 = vsel %vm2717_vm14, %v2719_v62, %v2715_v17  ;;  %v2724_v51 = vmul.f32 %v2705_v24, %v5118_v44 }
0x2216   :  { %v2725_v43 = vmul.f32 %v2720_v34, %v5121_v8 }
0x226b   :  { %v2729_v13 = vpop.permute.xlu0 %2728 }
0x226c   :  { %v2734_v11 = vmul.f32 %v2729_v13, %v2705_v24 }
0x226e   :  { %2738 = vrot.lane.b32.xlu2 %v2734_v11, %s4399_s3 }
0x2273   :  { %v2731_v22 = vpop.permute.xlu1 %2730 }
0x2274   :  { %v2735_v36 = vmul.f32 %v2731_v22, %v2720_v34 }
0x2276   :  { %2740 = vrot.lane.b32.xlu0 %v2735_v36, %s4399_s3 }
0x227e   :  { %1765 = vrot.lane.b32.xlu0 %v4935_v46, %s4391_s21 }
0x22c8   :  { %v2739_v41 = vpop.permute.xlu2 %2738 }
0x22c9   :  { %v5150_v37 = vadd.f32 %v2739_v41, %v2724_v51 }
0x22cb   :  { %4076 = vtanh.f32 %v5150_v37 }
0x22d1   :  { %v4077_v42 = vpop.eup %4076 }
0x22d2   :  { %2750 = vrot.lane.b32.xlu1 %v4077_v42, %s4399_s3 }
0x22da   :  { %1767 = vrot.lane.b32.xlu1 %v4938_v9, %s4391_s21 }
0x22e8   :  { %v2741_v16 = vpop.permute.xlu0 %2740 }
0x22e9   :  { %v5157_v47 = vadd.f32 %v2741_v16, %v2725_v43 }
0x22eb   :  { %4078 = vtanh.f32 %v5157_v47 }
0x22f0   :  { %v1766_v46 = vpop.permute.xlu0 %1765 }
0x22f1   :  { %v4079_v44 = vpop.eup %4078  ;;  %1771 = vst.msk [vmem:[#allocation3 + $0x10] sm:$0xf] %vm425_vm4, %v1766_v46 }
0x22f2   :  { %2752 = vrot.lane.b32.xlu2 %v4079_v44, %s4399_s3 }
0x2344   :  { %v2751_v30 = vpop.permute.xlu1 %2750 }
0x2345   :  { %v2756_v48 = vmul.f32 %v2751_v30, %v2705_v24 }
0x2347   :  { %v5162_v57 = vpack.c.bf16 %v2756_v48, %v2756_v48 }
0x2349   :  { %v2773_v54 = vunpack.c.l.b16 %v5162_v57 }
0x234c   :  { %v2753_v2 = vpop.permute.xlu2 %2752  ;;  %v1768_v63 = vpop.permute.xlu1 %1767 }
0x234d   :  { %v2757_v9 = vmul.f32 %v2753_v2, %v2720_v34  ;;  %1772 = vst.msk [vmem:[#allocation3 + $0x14] sm:$0xf] %vm425_vm4, %v1768_v63 }
0x234f   :  { %v5165_v8 = vpack.c.bf16 %v2757_v9, %v2757_v9 }
0x2351   :  { %v2774_v29 = vunpack.c.l.b16 %v5165_v8 }
0x2353   :  { %v2775_v14 = vpack.c.b16 %v2774_v29, %v2773_v54 }
0x2354   :  { %v3798_v20 = vld [vmem:[#allocation3 + $0x10] sm:$0xff] }
0x2355   :  { %2776 = vrot.lane.b32.xlu2 %v2775_v14, %s4391_s21  ;;  %3718 = vmatmul.msk.bf16.gmra.mxu1 %vm201_vm0, %v3798_v20 }
0x23af   :  { %v2777_v60 = vpop.permute.xlu2 %2776 }
0x23b0   :  { %3742 = vmatmul.msk.bf16.vlgmr.msrb.gmra.mxu2 %vm201_vm0, %v2777_v60 }
0x23b1   :  { %3239 = vmatpush.bf16.msrb.mxu2 %v5075_v58 }
0x23b5   :  { %3240 = vmatpush.bf16.msrb.mxu2 %v5078_v18 }
0x23d2   :  { %v2474_v31 = vpop.f32.mrf.mxu1 }
0x23d3   :  { %v2475_v61 = vadd.f32 %v5107_v4, %v2474_v31 }
0x23da   :  { %v2476_v52 = vpop.f32.mrf.mxu1 }
0x23db   :  { %v2477_v6 = vadd.f32 %v5107_v4, %v2476_v52 }
0x2433   :  { %v2790_v26 = vpop.f32.mrf.mxu2 }
0x2434   :  { %v2795_v1 = vadd.f32 %v2790_v26, %v2475_v61 }
0x2436   :  { %4080 = vtanh.f32 %v2795_v1  ;;  %v3743_v58 = vmul.f32 -1.442695, %v2795_v1 }
0x243b   :  { %v2792_v5 = vpop.f32.mrf.mxu2 }
0x243c   :  { %v4081_v7 = vpop.eup %4080  ;;  %v2796_v38 = vadd.f32 %v2792_v5, %v2477_v6 }
0x243d   :  { %2841 = vrot.lane.b32.xlu0 %v4081_v7, %s4399_s3 }
0x243e   :  { %4082 = vtanh.f32 %v2796_v38  ;;  %v3744_v18 = vmul.f32 -1.442695, %v2796_v38 }
0x243f   :  { %4084 = vpow2.f32 %v3743_v58 }
0x2440   :  { %4086 = vpow2.f32 %v3744_v18 }
0x2444   :  { %v4083_v40 = vpop.eup %4082 }
0x2445   :  { %2843 = vrot.lane.b32.xlu1 %v4083_v40, %s4399_s3  ;;  %v4085_v25 = vpop.eup %4084 }
0x2446   :  { %v2803_v13 = vadd.f32 1.0, %v4085_v25  ;;  %v4087_v24 = vpop.eup %4086 }
0x2447   :  { %v2804_v11 = vadd.f32 1.0, %v4087_v24 }
0x2448   :  { %4088 = vrcp.f32 %v2803_v13  ;;  %v2816_v51 = vand.u32 2147483648, %v2803_v13  ;;  %vm2810_vm1 = vweird.f32 %v2803_v13  ;;  %v2814_v41 = vand.u32 2147483647, %v2803_v13 }
0x2449   :  { %4090 = vrcp.f32 %v2804_v11  ;;  %v2831_v2 = vand.u32 2147483648, %v2804_v11  ;;  %vm2825_vm6 = vweird.f32 %v2804_v11  ;;  %v2829_v63 = vand.u32 2147483647, %v2804_v11 }
0x244a   :  { %v2817_v16 = vor.u32 1.1754944e-38, %v2816_v51  ;;  %vm2815_vm3 = vcmp.eq.f32.partialorder %v2814_v41, 8.507059e+37 }
0x244b   :  { %v2832_v54 = vor.u32 1.1754944e-38, %v2831_v2  ;;  %vm2830_vm8 = vcmp.eq.f32.partialorder %v2829_v63, 8.507059e+37 }
0x244e   :  { %v4089_v21 = vpop.eup %4088 }
0x244f   :  { %v2806_v23 = vmul.f32 %v4089_v21, %v2803_v13  ;;  %v4091_v17 = vpop.eup %4090  ;;  %vm2811_vm15 = vweird.f32 %v4089_v21 }
0x2450   :  { %v2821_v22 = vmul.f32 %v4091_v17, %v2804_v11  ;;  %vm2812_vm2 = vmor %vm2810_vm1, %vm2811_vm15  ;;  %vm2826_vm5 = vweird.f32 %v4091_v17 }
0x2451   :  { %v2807_v45 = vsub.f32 1.0, %v2806_v23  ;;  %vm2827_vm7 = vmor %vm2825_vm6, %vm2826_vm5 }
0x2452   :  { %v2822_v36 = vsub.f32 1.0, %v2821_v22 }
0x2453   :  { %v2808_v62 = vmul.f32 %v4089_v21, %v2807_v45 }
0x2454   :  { %v2823_v43 = vmul.f32 %v4091_v17, %v2822_v36 }
0x2455   :  { %v2809_v34 = vadd.f32 %v4089_v21, %v2808_v62 }
0x2456   :  { %v2824_v48 = vadd.f32 %v4091_v17, %v2823_v43 }
0x2457   :  { %v2813_v42 = vsel %vm2812_vm2, %v4089_v21, %v2809_v34 }
0x2458   :  { %v2818_v44 = vsel %vm2815_vm3, %v2817_v16, %v2813_v42  ;;  %v2828_v9 = vsel %vm2827_vm7, %v4091_v17, %v2824_v48 }
0x2459   :  { %v2833_v14 = vsel %vm2830_vm8, %v2832_v54, %v2828_v9  ;;  %v2837_v60 = vmul.f32 %v2818_v44, %v5150_v37 }
0x245a   :  { %v2838_v1 = vmul.f32 %v2833_v14, %v5157_v47 }
0x24af   :  { %v2842_v46 = vpop.permute.xlu0 %2841 }
0x24b0   :  { %v2847_v30 = vmul.f32 %v2842_v46, %v2818_v44 }
0x24b2   :  { %2851 = vrot.lane.b32.xlu2 %v2847_v30, %s4399_s3 }
0x24b7   :  { %v2844_v29 = vpop.permute.xlu1 %2843 }
0x24b8   :  { %v2848_v20 = vmul.f32 %v2844_v29, %v2833_v14 }
0x24ba   :  { %2853 = vrot.lane.b32.xlu0 %v2848_v20, %s4399_s3 }
0x24c2   :  { %1877 = vrot.lane.b32.xlu0 %v4968_v59, %s4391_s21 }
0x250c   :  { %v2852_v31 = vpop.permute.xlu2 %2851 }
0x250d   :  { %v5183_v61 = vadd.f32 %v2852_v31, %v2837_v60 }
0x250f   :  { %4092 = vtanh.f32 %v5183_v61 }
0x2515   :  { %v4093_v26 = vpop.eup %4092 }
0x2516   :  { %2863 = vrot.lane.b32.xlu1 %v4093_v26, %s4399_s3 }
0x251e   :  { %1879 = vrot.lane.b32.xlu1 %v4971_v33, %s4391_s21 }
0x252c   :  { %v2854_v52 = vpop.permute.xlu0 %2853 }
0x252d   :  { %v5190_v6 = vadd.f32 %v2854_v52, %v2838_v1 }
0x252f   :  { %4094 = vtanh.f32 %v5190_v6 }
0x2534   :  { %v1878_v59 = vpop.permute.xlu0 %1877 }
0x2535   :  { %v4095_v37 = vpop.eup %4094  ;;  %1883 = vst.msk [vmem:[#allocation3 + $0x18] sm:$0xf] %vm425_vm4, %v1878_v59 }
0x2536   :  { %2865 = vrot.lane.b32.xlu2 %v4095_v37, %s4399_s3 }
0x2588   :  { %v2864_v5 = vpop.permute.xlu1 %2863 }
0x2589   :  { %v2869_v7 = vmul.f32 %v2864_v5, %v2818_v44 }
0x258b   :  { %v5195_v58 = vpack.c.bf16 %v2869_v7, %v2869_v7 }
0x258d   :  { %v2886_v18 = vunpack.c.l.b16 %v5195_v58 }
0x2590   :  { %v2866_v38 = vpop.permute.xlu2 %2865  ;;  %v1880_v40 = vpop.permute.xlu1 %1879 }
0x2591   :  { %v2870_v33 = vmul.f32 %v2866_v38, %v2833_v14  ;;  %1884 = vst.msk [vmem:[#allocation3 + $0x1c] sm:$0xf] %vm425_vm4, %v1880_v40 }
0x2593   :  { %v5198_v47 = vpack.c.bf16 %v2870_v33, %v2870_v33 }
0x2595   :  { %v2887_v25 = vunpack.c.l.b16 %v5198_v47 }
0x2597   :  { %v2888_v13 = vpack.c.b16 %v2887_v25, %v2886_v18 }
0x2598   :  { %v3799_v24 = vld [vmem:[#allocation3 + $0x18] sm:$0xff] }
0x2599   :  { %2889 = vrot.lane.b32.xlu2 %v2888_v13, %s4391_s21  ;;  %3719 = vmatmul.msk.bf16.gmra.mxu1 %vm201_vm0, %v3799_v24 }
0x25f3   :  { %v2890_v11 = vpop.permute.xlu2 %2889 }
0x25f4   :  { %3747 = vmatmul.msk.bf16.vlgmr.msrb.gmra.mxu0 %vm201_vm0, %v2890_v11 }
0x2616   :  { %v2479_v21 = vpop.f32.mrf.mxu1 }
0x2617   :  { %v2480_v23 = vadd.f32 %v5107_v4, %v2479_v21 }
0x261e   :  { %v2481_v62 = vpop.f32.mrf.mxu1 }
0x261f   :  { %v2482_v22 = vadd.f32 %v5107_v4, %v2481_v62 }
0x2671   :  { %v2903_v45 = vpop.f32.mrf.mxu0 }
0x2672   :  { %v2908_v17 = vadd.f32 %v2903_v45, %v2480_v23 }
0x2674   :  { %4096 = vtanh.f32 %v2908_v17  ;;  %v3748_v42 = vmul.f32 -1.442695, %v2908_v17 }
0x2679   :  { %v2905_v34 = vpop.f32.mrf.mxu0 }
0x267a   :  { %v4097_v36 = vpop.eup %4096  ;;  %v2909_v51 = vadd.f32 %v2905_v34, %v2482_v22 }
0x267b   :  { %2954 = vrot.lane.b32.xlu0 %v4097_v36, %s4399_s3 }
0x267c   :  { %4098 = vtanh.f32 %v2909_v51  ;;  %v3749_v43 = vmul.f32 -1.442695, %v2909_v51 }
0x267d   :  { %4100 = vpow2.f32 %v3748_v42 }
0x267e   :  { %4102 = vpow2.f32 %v3749_v43 }
0x2682   :  { %v4099_v41 = vpop.eup %4098 }
0x2683   :  { %2956 = vrot.lane.b32.xlu1 %v4099_v41, %s4399_s3  ;;  %v4101_v16 = vpop.eup %4100 }
0x2684   :  { %v2916_v46 = vadd.f32 1.0, %v4101_v16  ;;  %v4103_v44 = vpop.eup %4102 }
0x2685   :  { %v2917_v30 = vadd.f32 1.0, %v4103_v44 }
0x2686   :  { %4104 = vrcp.f32 %v2916_v46  ;;  %v2929_v60 = vand.u32 2147483648, %v2916_v46  ;;  %vm2923_vm10 = vweird.f32 %v2916_v46  ;;  %v2927_v31 = vand.u32 2147483647, %v2916_v46 }
0x2687   :  { %4106 = vrcp.f32 %v2917_v30  ;;  %v2944_v38 = vand.u32 2147483648, %v2917_v30  ;;  %vm2938_vm14 = vweird.f32 %v2917_v30  ;;  %v2942_v40 = vand.u32 2147483647, %v2917_v30 }
0x2688   :  { %v2930_v52 = vor.u32 1.1754944e-38, %v2929_v60  ;;  %vm2928_vm12 = vcmp.eq.f32.partialorder %v2927_v31, 8.507059e+37 }
0x2689   :  { %v2945_v18 = vor.u32 1.1754944e-38, %v2944_v38  ;;  %vm2943_vm1 = vcmp.eq.f32.partialorder %v2942_v40, 8.507059e+37 }
0x268c   :  { %v4105_v48 = vpop.eup %4104 }
0x268d   :  { %v2919_v2 = vmul.f32 %v4105_v48, %v2916_v46  ;;  %v4107_v9 = vpop.eup %4106  ;;  %vm2924_vm9 = vweird.f32 %v4105_v48 }
0x268e   :  { %v2934_v29 = vmul.f32 %v4107_v9, %v2917_v30  ;;  %vm2925_vm11 = vmor %vm2923_vm10, %vm2924_vm9  ;;  %vm2939_vm13 = vweird.f32 %v4107_v9 }
0x268f   :  { %v2920_v63 = vsub.f32 1.0, %v2919_v2  ;;  %vm2940_vm15 = vmor %vm2938_vm14, %vm2939_vm13 }
0x2690   :  { %v2935_v20 = vsub.f32 1.0, %v2934_v29 }
0x2691   :  { %v2921_v54 = vmul.f32 %v4105_v48, %v2920_v63 }
0x2692   :  { %v2936_v1 = vmul.f32 %v4107_v9, %v2935_v20 }
0x2693   :  { %v2922_v14 = vadd.f32 %v4105_v48, %v2921_v54 }
0x2694   :  { %v2937_v7 = vadd.f32 %v4107_v9, %v2936_v1 }
0x2695   :  { %v2926_v26 = vsel %vm2925_vm11, %v4105_v48, %v2922_v14 }
0x2696   :  { %v2931_v37 = vsel %vm2928_vm12, %v2930_v52, %v2926_v26  ;;  %v2941_v33 = vsel %vm2940_vm15, %v4107_v9, %v2937_v7 }
0x2697   :  { %v2946_v13 = vsel %vm2943_vm1, %v2945_v18, %v2941_v33  ;;  %v2950_v11 = vmul.f32 %v2931_v37, %v5183_v61 }
0x2698   :  { %v2951_v17 = vmul.f32 %v2946_v13, %v5190_v6 }
0x26ed   :  { %v2955_v59 = vpop.permute.xlu0 %2954 }
0x26ee   :  { %v2960_v5 = vmul.f32 %v2955_v59, %v2931_v37 }
0x26f0   :  { %2964 = vrot.lane.b32.xlu2 %v2960_v5, %s4399_s3 }
0x26f5   :  { %v2957_v25 = vpop.permute.xlu1 %2956 }
0x26f6   :  { %v2961_v24 = vmul.f32 %v2957_v25, %v2946_v13 }
0x26f8   :  { %2966 = vrot.lane.b32.xlu0 %v2961_v24, %s4399_s3 }
0x2700   :  { %1989 = vrot.lane.b32.xlu0 %v4999_v56, %s4391_s21 }
0x274a   :  { %v2965_v21 = vpop.permute.xlu2 %2964 }
0x274b   :  { %v5214_v23 = vadd.f32 %v2965_v21, %v2950_v11 }
0x274d   :  { %4108 = vtanh.f32 %v5214_v23 }
0x2753   :  { %v4109_v45 = vpop.eup %4108 }
0x2754   :  { %2976 = vrot.lane.b32.xlu1 %v4109_v45, %s4399_s3 }
0x275c   :  { %1991 = vrot.lane.b32.xlu1 %v5002_v50, %s4391_s21 }
0x276a   :  { %v2967_v62 = vpop.permute.xlu0 %2966 }
0x276b   :  { %v5221_v22 = vadd.f32 %v2967_v62, %v2951_v17 }
0x276d   :  { %4110 = vtanh.f32 %v5221_v22 }
0x2772   :  { %v1990_v56 = vpop.permute.xlu0 %1989 }
0x2773   :  { %v4111_v61 = vpop.eup %4110  ;;  %1995 = vst.msk [vmem:[#allocation3 + $0x20] sm:$0xf] %vm425_vm4, %v1990_v56 }
0x2774   :  { %2978 = vrot.lane.b32.xlu2 %v4111_v61, %s4399_s3 }
0x27c6   :  { %v2977_v34 = vpop.permute.xlu1 %2976 }
0x27c7   :  { %v2982_v36 = vmul.f32 %v2977_v34, %v2931_v37 }
0x27c9   :  { %v5226_v42 = vpack.c.bf16 %v2982_v36, %v2982_v36 }
0x27cb   :  { %v2999_v43 = vunpack.c.l.b16 %v5226_v42 }
0x27ce   :  { %v2979_v51 = vpop.permute.xlu2 %2978  ;;  %v1992_v41 = vpop.permute.xlu1 %1991 }
0x27cf   :  { %v2983_v50 = vmul.f32 %v2979_v51, %v2946_v13  ;;  %1996 = vst.msk [vmem:[#allocation3 + $0x24] sm:$0xf] %vm425_vm4, %v1992_v41 }
0x27d1   :  { %v5229_v6 = vpack.c.bf16 %v2983_v50, %v2983_v50 }
0x27d3   :  { %v3000_v16 = vunpack.c.l.b16 %v5229_v6 }
0x27d5   :  { %v3001_v46 = vpack.c.b16 %v3000_v16, %v2999_v43 }
0x27d6   :  { %v3800_v44 = vld [vmem:[#allocation3 + $0x20] sm:$0xff] }
0x27d7   :  { %3002 = vrot.lane.b32.xlu2 %v3001_v46, %s4391_s21  ;;  %3720 = vmatmul.msk.bf16.gmra.mxu1 %vm201_vm0, %v3800_v44 }
0x2831   :  { %v3003_v30 = vpop.permute.xlu2 %3002 }
0x2832   :  { %3752 = vmatmul.msk.bf16.vlgmr.msra.gmra.mxu2 %vm201_vm0, %v3003_v30 }
0x2854   :  { %v2484_v48 = vpop.f32.mrf.mxu1 }
0x2855   :  { %v2485_v2 = vadd.f32 %v5107_v4, %v2484_v48 }
0x285c   :  { %v2486_v54 = vpop.f32.mrf.mxu1 }
0x285d   :  { %v2487_v29 = vadd.f32 %v5107_v4, %v2486_v54 }
0x28b5   :  { %v3016_v63 = vpop.f32.mrf.mxu2 }
0x28b6   :  { %v3021_v9 = vadd.f32 %v3016_v63, %v2485_v2 }
0x28b8   :  { %4112 = vtanh.f32 %v3021_v9  ;;  %v3753_v26 = vmul.f32 -1.442695, %v3021_v9  ;;  %v3592_v9 = vmul.f32 -1.442695, %v4875_v3 }
0x28bd   :  { %v3018_v14 = vpop.f32.mrf.mxu2 }
0x28be   :  { %v4113_v20 = vpop.eup %4112  ;;  %v3022_v60 = vadd.f32 %v3018_v14, %v2487_v29 }
0x28bf   :  { %3067 = vrot.lane.b32.xlu0 %v4113_v20, %s4399_s3 }
0x28c0   :  { %4114 = vtanh.f32 %v3022_v60  ;;  %v3754_v1 = vmul.f32 -1.442695, %v3022_v60 }
0x28c1   :  { %4116 = vpow2.f32 %v3753_v26 }
0x28c2   :  { %4118 = vpow2.f32 %v3754_v1 }
0x28c6   :  { %v4115_v31 = vpop.eup %4114 }
0x28c7   :  { %3069 = vrot.lane.b32.xlu1 %v4115_v31, %s4399_s3  ;;  %v4117_v52 = vpop.eup %4116 }
0x28c8   :  { %v3029_v59 = vadd.f32 1.0, %v4117_v52  ;;  %v4119_v37 = vpop.eup %4118 }
0x28c9   :  { %v3030_v5 = vadd.f32 1.0, %v4119_v37 }
0x28ca   :  { %4120 = vrcp.f32 %v3029_v59  ;;  %v3042_v11 = vand.u32 2147483648, %v3029_v59  ;;  %vm3036_vm3 = vweird.f32 %v3029_v59  ;;  %v3040_v21 = vand.u32 2147483647, %v3029_v59 }
0x28cb   :  { %4122 = vrcp.f32 %v3030_v5  ;;  %v3057_v51 = vand.u32 2147483648, %v3030_v5  ;;  %vm3051_vm8 = vweird.f32 %v3030_v5  ;;  %v3055_v41 = vand.u32 2147483647, %v3030_v5 }
0x28cc   :  { %v3043_v62 = vor.u32 1.1754944e-38, %v3042_v11  ;;  %vm3041_vm6 = vcmp.eq.f32.partialorder %v3040_v21, 8.507059e+37  ;;  %4124 = vtanh.f32 %v4875_v3 }
0x28cd   :  { %v3058_v43 = vor.u32 1.1754944e-38, %v3057_v51  ;;  %vm3056_vm10 = vcmp.eq.f32.partialorder %v3055_v41, 8.507059e+37 }
0x28d0   :  { %v4121_v7 = vpop.eup %4120 }
0x28d1   :  { %v3032_v38 = vmul.f32 %v4121_v7, %v3029_v59  ;;  %v4123_v33 = vpop.eup %4122  ;;  %vm3037_vm2 = vweird.f32 %v4121_v7 }
0x28d2   :  { %v3047_v25 = vmul.f32 %v4123_v33, %v3030_v5  ;;  %vm3038_vm5 = vmor %vm3036_vm3, %vm3037_vm2  ;;  %vm3052_vm7 = vweird.f32 %v4123_v33  ;;  %v4125_v30 = vpop.eup %4124 }
0x28d3   :  { %v3033_v40 = vsub.f32 1.0, %v3032_v38  ;;  %vm3053_vm9 = vmor %vm3051_vm8, %vm3052_vm7 }
0x28d4   :  { %v3048_v24 = vsub.f32 1.0, %v3047_v25 }
0x28d5   :  { %v3034_v18 = vmul.f32 %v4121_v7, %v3033_v40 }
0x28d6   :  { %v3049_v17 = vmul.f32 %v4123_v33, %v3048_v24 }
0x28d7   :  { %v3035_v13 = vadd.f32 %v4121_v7, %v3034_v18 }
0x28d8   :  { %v3050_v36 = vadd.f32 %v4123_v33, %v3049_v17 }
0x28d9   :  { %v3039_v45 = vsel %vm3038_vm5, %v4121_v7, %v3035_v13 }
0x28da   :  { %v3044_v61 = vsel %vm3041_vm6, %v3043_v62, %v3039_v45  ;;  %v3054_v50 = vsel %vm3053_vm9, %v4123_v33, %v3050_v36  ;;  %v3593_v36 = vmul.f32 -1.442695, %v4879_v0 }
0x28db   :  { %v3059_v46 = vsel %vm3056_vm10, %v3058_v43, %v3054_v50  ;;  %v3063_v48 = vmul.f32 %v3044_v61, %v5214_v23 }
0x28dc   :  { %v3064_v3 = vmul.f32 %v3059_v46, %v5221_v22 }
0x2931   :  { %v3068_v56 = vpop.permute.xlu0 %3067 }
0x2932   :  { %v3073_v34 = vmul.f32 %v3068_v56, %v3044_v61 }
0x2934   :  { %3077 = vrot.lane.b32.xlu2 %v3073_v34, %s4399_s3 }
0x2939   :  { %v3070_v16 = vpop.permute.xlu1 %3069 }
0x293a   :  { %v3074_v44 = vmul.f32 %v3070_v16, %v3059_v46 }
0x293c   :  { %3079 = vrot.lane.b32.xlu0 %v3074_v44, %s4399_s3 }
0x2944   :  { %2101 = vrot.lane.b32.xlu0 %v5035_v27, %s4391_s21 }
0x294c   :  { %1183 = vrot.lane.b32.xlu0 %v4125_v30, %s4399_s3 }
0x298e   :  { %v3078_v2 = vpop.permute.xlu2 %3077 }
0x298f   :  { %v5247_v63 = vadd.f32 %v3078_v2, %v3063_v48 }
0x2991   :  { %4126 = vtanh.f32 %v5247_v63 }
0x2992   :  { %4128 = vpow2.f32 %v3592_v9 }
0x2993   :  { %4130 = vtanh.f32 %v4879_v0 }
0x2997   :  { %v4127_v54 = vpop.eup %4126 }
0x2998   :  { %3089 = vrot.lane.b32.xlu1 %v4127_v54, %s4399_s3  ;;  %v4129_v29 = vpop.eup %4128 }
0x2999   :  { %v1145_v27 = vadd.f32 1.0, %v4129_v29  ;;  %v4131_v23 = vpop.eup %4130 }
0x299b   :  { %4132 = vrcp.f32 %v1145_v27  ;;  %v1158_v37 = vand.u32 2147483648, %v1145_v27  ;;  %vm1152_vm12 = vweird.f32 %v1145_v27  ;;  %v1156_v5 = vand.u32 2147483647, %v1145_v27 }
0x299d   :  { %v1159_v7 = vor.u32 1.1754944e-38, %v1158_v37  ;;  %vm1157_vm14 = vcmp.eq.f32.partialorder %v1156_v5, 8.507059e+37 }
0x29a0   :  { %2103 = vrot.lane.b32.xlu1 %v5038_v49, %s4391_s21 }
0x29a1   :  { %v4133_v14 = vpop.eup %4132 }
0x29a2   :  { %v1148_v20 = vmul.f32 %v4133_v14, %v1145_v27  ;;  %vm1153_vm11 = vweird.f32 %v4133_v14 }
0x29a3   :  { %vm1154_vm13 = vmor %vm1152_vm12, %vm1153_vm11 }
0x29a4   :  { %v1149_v26 = vsub.f32 1.0, %v1148_v20 }
0x29a6   :  { %v1150_v1 = vmul.f32 %v4133_v14, %v1149_v26 }
0x29a8   :  { %1185 = vrot.lane.b32.xlu1 %v4131_v23, %s4399_s3  ;;  %v1151_v49 = vadd.f32 %v4133_v14, %v1150_v1 }
0x29aa   :  { %v1155_v22 = vsel %vm1154_vm13, %v4133_v14, %v1151_v49 }
0x29ab   :  { %v5262_v38 = vsel %vm1157_vm14, %v1159_v7, %v1155_v22 }
0x29ae   :  { %v3080_v60 = vpop.permute.xlu0 %3079 }
0x29af   :  { %v5257_v31 = vadd.f32 %v3080_v60, %v3064_v3 }
0x29b1   :  { %4134 = vtanh.f32 %v5257_v31 }
0x29b2   :  { %4136 = vpow2.f32 %v3593_v36 }
0x29b6   :  { %v2102_v52 = vpop.permute.xlu0 %2101 }
0x29b7   :  { %v4135_v59 = vpop.eup %4134  ;;  %2107 = vst.msk [vmem:[#allocation3 + $0x28] sm:$0xf] %vm425_vm4, %v2102_v52  ;;  %v1179_v52 = vmul.f32 %v5262_v38, %v4826_v10 }
0x29b8   :  { %3091 = vrot.lane.b32.xlu2 %v4135_v59, %s4399_s3  ;;  %v4137_v51 = vpop.eup %4136 }
0x29b9   :  { %v1146_v41 = vadd.f32 1.0, %v4137_v51 }
0x29bb   :  { %4138 = vrcp.f32 %v1146_v41  ;;  %v1173_v14 = vand.u32 2147483648, %v1146_v41  ;;  %vm1167_vm1 = vweird.f32 %v1146_v41  ;;  %v1171_v3 = vand.u32 2147483647, %v1146_v41 }
0x29bd   :  { %v1174_v1 = vor.u32 1.1754944e-38, %v1173_v14  ;;  %vm1172_vm3 = vcmp.eq.f32.partialorder %v1171_v3, 8.507059e+37 }
0x29be   :  { %v1184_v40 = vpop.permute.xlu0 %1183 }
0x29bf   :  { %v1189_v33 = vmul.f32 %v1184_v40, %v5262_v38 }
0x29c1   :  { %1193 = vrot.lane.b32.xlu1 %v1189_v33, %s4399_s3  ;;  %v4139_v50 = vpop.eup %4138 }
0x29c2   :  { %v1163_v16 = vmul.f32 %v4139_v50, %v1146_v41  ;;  %vm1168_vm15 = vweird.f32 %v4139_v50 }
0x29c3   :  { %vm1169_vm2 = vmor %vm1167_vm1, %vm1168_vm15 }
0x29c4   :  { %v1164_v44 = vsub.f32 1.0, %v1163_v16 }
0x29c6   :  { %v1165_v2 = vmul.f32 %v4139_v50, %v1164_v44 }
0x29c8   :  { %v1166_v27 = vadd.f32 %v4139_v50, %v1165_v2 }
0x29ca   :  { %v1170_v60 = vsel %vm1169_vm2, %v4139_v50, %v1166_v27 }
0x2a0a   :  { %v3090_v18 = vpop.permute.xlu1 %3089 }
0x2a0b   :  { %v3095_v25 = vmul.f32 %v3090_v18, %v3044_v61 }
0x2a0d   :  { %v5266_v11 = vpack.c.bf16 %v3095_v25, %v3095_v25 }
0x2a0f   :  { %v3112_v17 = vunpack.c.l.b16 %v5266_v11 }
0x2a12   :  { %v3092_v13 = vpop.permute.xlu2 %3091  ;;  %v2104_v24 = vpop.permute.xlu1 %2103 }
0x2a13   :  { %v3096_v21 = vmul.f32 %v3092_v13, %v3059_v46  ;;  %2108 = vst.msk [vmem:[#allocation3 + $0x2c] sm:$0xf] %vm425_vm4, %v2104_v24 }
0x2a15   :  { %v5269_v45 = vpack.c.bf16 %v3096_v21, %v3096_v21 }
0x2a17   :  { %v3113_v62 = vunpack.c.l.b16 %v5269_v45 }
0x2a19   :  { %v3114_v56 = vpack.c.b16 %v3113_v62, %v3112_v17 }
0x2a1a   :  { %v3801_v34 = vld [vmem:[#allocation3 + $0x28] sm:$0xff]  ;;  %v1186_v9 = vpop.permute.xlu1 %1185 }
0x2a1b   :  { %3115 = vrot.lane.b32.xlu2 %v3114_v56, %s4391_s21  ;;  %3721 = vmatmul.msk.bf16.gmra.mxu1 %vm201_vm0, %v3801_v34 }
0x2a33   :  { %v1194_v26 = vpop.permute.xlu1 %1193 }
0x2a34   :  { %v5284_v59 = vadd.f32 %v1194_v26, %v1179_v52 }
0x2a75   :  { %v3116_v61 = vpop.permute.xlu2 %3115 }
0x2a76   :  { %3757 = vmatmul.msk.bf16.vlgmr.msra.gmra.mxu0 %vm201_vm0, %v3116_v61 }
0x2a98   :  { %v2489_v43 = vpop.f32.mrf.mxu1 }
0x2a99   :  { %v2490_v46 = vadd.f32 %v5107_v4, %v2489_v43 }
0x2aa0   :  { %v2491_v54 = vpop.f32.mrf.mxu1 }
0x2aa1   :  { %v2492_v29 = vadd.f32 %v5107_v4, %v2491_v54  ;;  %v5282_v4 = vsel %vm1172_vm3, %v1174_v1, %v1170_v60 }
0x2aa2   :  { %v1190_v49 = vmul.f32 %v1186_v9, %v5282_v4  ;;  %v1180_v50 = vmul.f32 %v5282_v4, %v4831_v15 }
0x2af3   :  { %v3129_v30 = vpop.f32.mrf.mxu0 }
0x2af4   :  { %v3134_v48 = vadd.f32 %v3129_v30, %v2490_v46 }
0x2af6   :  { %4140 = vtanh.f32 %v3134_v48  ;;  %v3758_v22 = vmul.f32 -1.442695, %v3134_v48 }
0x2afb   :  { %v3131_v0 = vpop.f32.mrf.mxu0 }
0x2afc   :  { %v4141_v23 = vpop.eup %4140  ;;  %v3135_v20 = vadd.f32 %v3131_v0, %v2492_v29 }
0x2afd   :  { %3180 = vrot.lane.b32.xlu2 %v4141_v23, %s4399_s3 }
0x2afe   :  { %4142 = vtanh.f32 %v3135_v20  ;;  %v3759_v25 = vmul.f32 -1.442695, %v3135_v20 }
0x2aff   :  { %4144 = vtanh.f32 %v5284_v59 }
0x2b00   :  { %4146 = vpow2.f32 %v3758_v22 }
0x2b04   :  { %v4143_v37 = vpop.eup %4142 }
0x2b05   :  { %3182 = vrot.lane.b32.xlu0 %v4143_v37, %s4399_s3  ;;  %1195 = vrot.lane.b32.xlu2 %v1190_v49, %s4399_s3  ;;  %v4145_v5 = vpop.eup %4144 }
0x2b06   :  { %v4147_v10 = vpop.eup %4146 }
0x2b07   :  { %v3142_v7 = vadd.f32 1.0, %v4147_v10 }
0x2b09   :  { %4148 = vrcp.f32 %v3142_v7  ;;  %v3155_v21 = vand.u32 2147483648, %v3142_v7  ;;  %vm3149_vm6 = vweird.f32 %v3142_v7  ;;  %v3153_v17 = vand.u32 2147483647, %v3142_v7 }
0x2b0a   :  { %4150 = vpow2.f32 %v3759_v25 }
0x2b0b   :  { %v3156_v34 = vor.u32 1.1754944e-38, %v3155_v21  ;;  %vm3154_vm8 = vcmp.eq.f32.partialorder %v3153_v17, 8.507059e+37 }
0x2b0d   :  { %1205 = vrot.lane.b32.xlu2 %v4145_v5, %s4399_s3 }
0x2b0f   :  { %v4149_v40 = vpop.eup %4148 }
0x2b10   :  { %v3145_v33 = vmul.f32 %v4149_v40, %v3142_v7  ;;  %vm3150_vm5 = vweird.f32 %v4149_v40  ;;  %v4151_v62 = vpop.eup %4150 }
0x2b11   :  { %vm3151_vm7 = vmor %vm3149_vm6, %vm3150_vm5  ;;  %v3143_v61 = vadd.f32 1.0, %v4151_v62 }
0x2b12   :  { %v3146_v18 = vsub.f32 1.0, %v3145_v33 }
0x2b13   :  { %4152 = vrcp.f32 %v3143_v61  ;;  %v3170_v27 = vand.u32 2147483648, %v3143_v61  ;;  %vm3164_vm10 = vweird.f32 %v3143_v61  ;;  %v3168_v0 = vand.u32 2147483647, %v3143_v61 }
0x2b14   :  { %v3147_v13 = vmul.f32 %v4149_v40, %v3146_v18 }
0x2b15   :  { %v3171_v14 = vor.u32 1.1754944e-38, %v3170_v27  ;;  %vm3169_vm12 = vcmp.eq.f32.partialorder %v3168_v0, 8.507059e+37 }
0x2b16   :  { %v3148_v24 = vadd.f32 %v4149_v40, %v3147_v13 }
0x2b18   :  { %v3152_v56 = vsel %vm3151_vm7, %v4149_v40, %v3148_v24 }
0x2b19   :  { %v3157_v51 = vsel %vm3154_vm8, %v3156_v34, %v3152_v56  ;;  %v4153_v46 = vpop.eup %4152 }
0x2b1a   :  { %v3160_v44 = vmul.f32 %v4153_v46, %v3143_v61  ;;  %vm3165_vm9 = vweird.f32 %v4153_v46 }
0x2b1b   :  { %vm3166_vm11 = vmor %vm3164_vm10, %vm3165_vm9 }
0x2b1c   :  { %v3161_v2 = vsub.f32 1.0, %v3160_v44 }
0x2b1e   :  { %v3162_v54 = vmul.f32 %v4153_v46, %v3161_v2 }
0x2b20   :  { %v3163_v15 = vadd.f32 %v4153_v46, %v3162_v54 }
0x2b22   :  { %v3167_v23 = vsel %vm3166_vm11, %v4153_v46, %v3163_v15 }
0x2b23   :  { %v3172_v3 = vsel %vm3169_vm12, %v3171_v14, %v3167_v23 }
0x2b24   :  { %v3177_v22 = vmul.f32 %v3172_v3, %v5257_v31 }
0x2b57   :  { %v3181_v36 = vpop.permute.xlu2 %3180 }
0x2b58   :  { %v3186_v41 = vmul.f32 %v3181_v36, %v3157_v51 }
0x2b5a   :  { %3190 = vrot.lane.b32.xlu0 %v3186_v41, %s4399_s3 }
0x2b5f   :  { %v1196_v43 = vpop.permute.xlu2 %1195 }
0x2b60   :  { %v5294_v16 = vadd.f32 %v1196_v43, %v1180_v50 }
0x2b62   :  { %4154 = vtanh.f32 %v5294_v16 }
0x2b67   :  { %v1206_v48 = vpop.permute.xlu2 %1205 }
0x2b68   :  { %v4155_v30 = vpop.eup %4154  ;;  %v5299_v9 = vmul.f32 %v1206_v48, %v5262_v38  ;;  %v3176_v38 = vmul.f32 %v3157_v51, %v5247_v63 }
0x2b69   :  { %1207 = vrot.lane.b32.xlu0 %v4155_v30, %s4399_s3 }
0x2b6a   :  { %v1213_v29 = vpack.c.bf16 %v5299_v9, %v5299_v9 }
0x2b71   :  { %1217 = vrot.lane.b32.xlu0 %v1213_v29, %s4391_s21 }
0x2b77   :  { %v3183_v20 = vpop.permute.xlu0 %3182 }
0x2b78   :  { %v3187_v60 = vmul.f32 %v3183_v20, %v3172_v3 }
0x2b79   :  { %2215 = vrot.lane.b32.xlu0 %v5068_v55, %s4391_s21 }
0x2b7a   :  { %3192 = vrot.lane.b32.xlu1 %v3187_v60, %s4399_s3 }
0x2bcc   :  { %v3191_v26 = vpop.permute.xlu0 %3190 }
0x2bcd   :  { %v5308_v1 = vadd.f32 %v3191_v26, %v3176_v38 }
0x2bcf   :  { %4156 = vtanh.f32 %v5308_v1 }
0x2bd5   :  { %v4157_v52 = vpop.eup %4156 }
0x2bd6   :  { %3202 = vrot.lane.b32.xlu1 %v4157_v52, %s4399_s3 }
0x2bdb   :  { %v1208_v49 = vpop.permute.xlu0 %1207 }
0x2bdc   :  { %v5313_v37 = vmul.f32 %v1208_v49, %v5282_v4 }
0x2bde   :  { %v1214_v5 = vpack.c.bf16 %v5313_v37, %v5313_v37 }
0x2be0   :  { %1219 = vrot.lane.b32.xlu1 %v1214_v5, %s4391_s21 }
0x2be3   :  { %v1218_v55 = vpop.permute.xlu0 %1217 }
0x2be4   :  { %1224 = vst.msk [vmem:[#allocation3 + $0x38] sm:$0xf] %vm425_vm4, %v1218_v55 }
0x2beb   :  { %v2216_v63 = vpop.permute.xlu0 %2215 }
0x2bec   :  { %2220 = vst.msk [vmem:[#allocation3 + $0x34] sm:$0xf] %vm425_vm4, %v2216_v63  ;;  %v3193_v10 = vpop.permute.xlu1 %3192  ;;  %v5353_v63 = vld [vmem:[%s5570_s11] ss:$0 sm:$0xff]  ;;  %s4400_s11 = smov 96  }
0x2bed   :  { %v5321_v7 = vadd.f32 %v3193_v10, %v3177_v22 }
0x2bef   :  { %4158 = vtanh.f32 %v5321_v7 }
0x2bf5   :  { %v4159_v4 = vpop.eup %4158 }
0x2bf6   :  { %3204 = vrot.lane.b32.xlu2 %v4159_v4, %s4399_s3 }
0x2bfe   :  { %2213 = vrot.lane.b32.xlu2 %v5065_v19, %s4391_s21 }
0x2c48   :  { %v3203_v40 = vpop.permute.xlu1 %3202 }
0x2c49   :  { %v3208_v33 = vmul.f32 %v3203_v40, %v3157_v51  ;;  %v4210_v51 = vld [vmem:[%s5567_s8] ss:$0 sm:$0xff] }
0x2c4b   :  { %v5327_v25 = vpack.c.bf16 %v3208_v33, %v3208_v33 }
0x2c4d   :  { %v3225_v21 = vunpack.c.l.b16 %v5327_v25 }
0x2c50   :  { %v3205_v18 = vpop.permute.xlu2 %3204 }
0x2c51   :  { %v3209_v13 = vmul.f32 %v3205_v18, %v3172_v3 }
0x2c52   :  { %v1220_v31 = vpop.permute.xlu1 %1219 }
0x2c53   :  { %v5329_v24 = vpack.c.bf16 %v3209_v13, %v3209_v13  ;;  %1225 = vst.msk [vmem:[#allocation3 + $0x3c] sm:$0xf] %vm425_vm4, %v1220_v31 }
0x2c55   :  { %v3226_v17 = vunpack.c.l.b16 %v5329_v24 }
0x2c57   :  { %v3227_v62 = vpack.c.b16 %v3226_v17, %v3225_v21 }
0x2c58   :  { %v2214_v56 = vpop.permute.xlu2 %2213 }
0x2c59   :  { %2219 = vst.msk [vmem:[#allocation3 + $0x30] sm:$0xf] %vm425_vm4, %v2214_v56  ;;  %3228 = vrot.lane.b32.xlu1 %v3227_v62, %s4391_s21 }
0x2c5a   :  { %v3791_v19 = vld [vmem:[#allocation3 + $0x38] sm:$0xff] }
0x2c5b   :  { %3641 = vmatmul.msk.bf16.gmra.mxu3 %vm201_vm0, %v3791_v19 }
0x2c60   :  { %v3802_v34 = vld [vmem:[#allocation3 + $0x30] sm:$0xff] }
0x2c61   :  { %3722 = vmatmul.msk.bf16.gmra.mxu1 %vm201_vm0, %v3802_v34 }
0x2ccb   :  { %v3229_v61 = vpop.permute.xlu1 %3228 }
0x2ccc   :  { %3762 = vmatmul.msk.bf16.vlgmr.msrb.gmra.mxu2 %vm201_vm0, %v3229_v61 }
0x2cde   :  { %v1390_v36 = vpop.f32.mrf.mxu3  ;;  %v2494_v55 = vpop.f32.mrf.mxu1 }
0x2cdf   :  { %v1391_v41 = vadd.f32 %v4210_v51, %v1390_v36  ;;  %v2495_v22 = vadd.f32 %v5353_v63, %v2494_v55 }
0x2ce1   :  { %v2245_v50 = vadd.f32 %v5100_v12, %v1391_v41 }
0x2ce3   :  { %4160 = vtanh.f32 %v2245_v50  ;;  %v3674_v2 = vmul.f32 -1.442695, %v2245_v50 }
0x2ce6   :  { %v1392_v43 = vpop.f32.mrf.mxu3  ;;  %v2496_v18 = vpop.f32.mrf.mxu1 }
0x2ce7   :  { %v1393_v46 = vadd.f32 %v4210_v51, %v1392_v43  ;;  %v2497_v13 = vadd.f32 %v5353_v63, %v2496_v18 }
0x2ce9   :  { %v4161_v44 = vpop.eup %4160  ;;  %v2246_v30 = vadd.f32 %v5102_v53, %v1393_v46 }
0x2cea   :  { %2291 = vrot.lane.b32.xlu2 %v4161_v44, %s4399_s3 }
0x2ceb   :  { %4162 = vtanh.f32 %v2246_v30  ;;  %v3675_v0 = vmul.f32 -1.442695, %v2246_v30 }
0x2cec   :  { %4164 = vpow2.f32 %v3674_v2 }
0x2cf1   :  { %v4163_v48 = vpop.eup %4162 }
0x2cf2   :  { %2293 = vrot.lane.b32.xlu0 %v4163_v48, %s4399_s3  ;;  %v4165_v54 = vpop.eup %4164 }
0x2cf3   :  { %v2253_v29 = vadd.f32 1.0, %v4165_v54 }
0x2cf5   :  { %4166 = vrcp.f32 %v2253_v29  ;;  %v2266_v53 = vand.u32 2147483648, %v2253_v29  ;;  %vm2260_vm14 = vweird.f32 %v2253_v29  ;;  %v2264_v20 = vand.u32 2147483647, %v2253_v29 }
0x2cf6   :  { %4168 = vpow2.f32 %v3675_v0 }
0x2cf7   :  { %v2267_v38 = vor.u32 1.1754944e-38, %v2266_v53  ;;  %vm2265_vm1 = vcmp.eq.f32.partialorder %v2264_v20, 8.507059e+37 }
0x2cfb   :  { %v4167_v15 = vpop.eup %4166 }
0x2cfc   :  { %v2256_v27 = vmul.f32 %v4167_v15, %v2253_v29  ;;  %vm2261_vm13 = vweird.f32 %v4167_v15  ;;  %v4169_v3 = vpop.eup %4168 }
0x2cfd   :  { %vm2262_vm15 = vmor %vm2260_vm14, %vm2261_vm13  ;;  %v2254_v26 = vadd.f32 1.0, %v4169_v3 }
0x2cfe   :  { %v2257_v12 = vsub.f32 1.0, %v2256_v27 }
0x2cff   :  { %4170 = vrcp.f32 %v2254_v26  ;;  %v2281_v34 = vand.u32 2147483648, %v2254_v26  ;;  %vm2275_vm3 = vweird.f32 %v2254_v26  ;;  %v2279_v36 = vand.u32 2147483647, %v2254_v26 }
0x2d00   :  { %v2258_v23 = vmul.f32 %v4167_v15, %v2257_v12 }
0x2d01   :  { %v2282_v41 = vor.u32 1.1754944e-38, %v2281_v34  ;;  %vm2280_vm6 = vcmp.eq.f32.partialorder %v2279_v36, 8.507059e+37 }
0x2d02   :  { %v2259_v14 = vadd.f32 %v4167_v15, %v2258_v23 }
0x2d04   :  { %v2263_v60 = vsel %vm2262_vm15, %v4167_v15, %v2259_v14 }
0x2d05   :  { %v5346_v49 = vsel %vm2265_vm1, %v2267_v38, %v2263_v60  ;;  %v4171_v10 = vpop.eup %4170 }
0x2d06   :  { %v2271_v33 = vmul.f32 %v4171_v10, %v2254_v26  ;;  %vm2276_vm2 = vweird.f32 %v4171_v10  ;;  %v2287_v38 = vmul.f32 %v5346_v49, %v5057_v39 }
0x2d07   :  { %vm2277_vm5 = vmor %vm2275_vm3, %vm2276_vm2 }
0x2d08   :  { %v2272_v31 = vsub.f32 1.0, %v2271_v33 }
0x2d0a   :  { %v2273_v56 = vmul.f32 %v4171_v10, %v2272_v31 }
0x2d0c   :  { %v2274_v19 = vadd.f32 %v4171_v10, %v2273_v56 }
0x2d0e   :  { %v2278_v51 = vsel %vm2277_vm5, %v4171_v10, %v2274_v19 }
0x2d0f   :  { %v5359_v43 = vsel %vm2280_vm6, %v2282_v41, %v2278_v51 }
0x2d10   :  { %v2288_v19 = vmul.f32 %v5359_v43, %v5052_v28 }
0x2d44   :  { %v2292_v52 = vpop.permute.xlu2 %2291 }
0x2d45   :  { %v2297_v5 = vmul.f32 %v2292_v52, %v5346_v49 }
0x2d47   :  { %2301 = vrot.lane.b32.xlu0 %v2297_v5, %s4399_s3 }
0x2d4f   :  { %v3242_v4 = vpop.f32.mrf.mxu2 }
0x2d50   :  { %v3247_v40 = vadd.f32 %v3242_v4, %v2495_v22 }
0x2d52   :  { %4172 = vtanh.f32 %v3247_v40  ;;  %v3763_v2 = vmul.f32 -1.442695, %v3247_v40 }
0x2d57   :  { %v3244_v21 = vpop.f32.mrf.mxu2 }
0x2d58   :  { %v4173_v17 = vpop.eup %4172  ;;  %v3248_v62 = vadd.f32 %v3244_v21, %v2497_v13 }
0x2d59   :  { %3293 = vrot.lane.b32.xlu1 %v4173_v17, %s4399_s3 }
0x2d5a   :  { %4174 = vtanh.f32 %v3248_v62  ;;  %v3764_v44 = vmul.f32 -1.442695, %v3248_v62 }
0x2d5c   :  { %4176 = vpow2.f32 %v3764_v44 }
0x2d60   :  { %v4175_v61 = vpop.eup %4174 }
0x2d61   :  { %3295 = vrot.lane.b32.xlu2 %v4175_v61, %s4399_s3 }
0x2d62   :  { %v4177_v30 = vpop.eup %4176 }
0x2d63   :  { %v3256_v48 = vadd.f32 1.0, %v4177_v30 }
0x2d64   :  { %v2294_v50 = vpop.permute.xlu0 %2293 }
0x2d65   :  { %v2298_v46 = vmul.f32 %v2294_v50, %v5359_v43  ;;  %4178 = vrcp.f32 %v3256_v48  ;;  %v3283_v53 = vand.u32 2147483648, %v3256_v48  ;;  %vm3277_vm8 = vweird.f32 %v3256_v48 }
0x2d66   :  { %4180 = vpow2.f32 %v3763_v2  ;;  %v3281_v20 = vand.u32 2147483647, %v3256_v48 }
0x2d67   :  { %2303 = vrot.lane.b32.xlu1 %v2298_v46, %s4399_s3  ;;  %v3284_v26 = vor.u32 1.1754944e-38, %v3283_v53 }
0x2d68   :  { %vm3282_vm10 = vcmp.eq.f32.partialorder %v3281_v20, 8.507059e+37 }
0x2d6b   :  { %v4179_v54 = vpop.eup %4178 }
0x2d6c   :  { %v4181_v29 = vpop.eup %4180  ;;  %v3273_v15 = vmul.f32 %v4179_v54, %v3256_v48  ;;  %vm3278_vm7 = vweird.f32 %v4179_v54 }
0x2d6d   :  { %v3255_v27 = vadd.f32 1.0, %v4181_v29  ;;  %vm3279_vm9 = vmor %vm3277_vm8, %vm3278_vm7 }
0x2d6e   :  { %v3274_v12 = vsub.f32 1.0, %v3273_v15 }
0x2d6f   :  { %4182 = vrcp.f32 %v3255_v27  ;;  %v3268_v39 = vand.u32 2147483648, %v3255_v27  ;;  %vm3262_vm12 = vweird.f32 %v3255_v27  ;;  %v3266_v13 = vand.u32 2147483647, %v3255_v27 }
0x2d70   :  { %v3275_v0 = vmul.f32 %v4179_v54, %v3274_v12 }
0x2d71   :  { %v3269_v21 = vor.u32 1.1754944e-38, %v3268_v39  ;;  %vm3267_vm14 = vcmp.eq.f32.partialorder %v3266_v13, 8.507059e+37 }
0x2d72   :  { %v3276_v23 = vadd.f32 %v4179_v54, %v3275_v0 }
0x2d74   :  { %v3280_v3 = vsel %vm3279_vm9, %v4179_v54, %v3276_v23 }
0x2d75   :  { %v4183_v14 = vpop.eup %4182  ;;  %v3285_v22 = vsel %vm3282_vm10, %v3284_v26, %v3280_v3 }
0x2d76   :  { %v3258_v60 = vmul.f32 %v4183_v14, %v3255_v27  ;;  %vm3263_vm11 = vweird.f32 %v4183_v14  ;;  %v3290_v46 = vmul.f32 %v3285_v22, %v5321_v7 }
0x2d77   :  { %vm3264_vm13 = vmor %vm3262_vm12, %vm3263_vm11 }
0x2d78   :  { %v3259_v4 = vsub.f32 1.0, %v3258_v60 }
0x2d7a   :  { %v3260_v40 = vmul.f32 %v4183_v14, %v3259_v4 }
0x2d7c   :  { %v3261_v18 = vadd.f32 %v4183_v14, %v3260_v40 }
0x2d7e   :  { %v3265_v31 = vsel %vm3264_vm13, %v4183_v14, %v3261_v18 }
0x2d7f   :  { %v3270_v62 = vsel %vm3267_vm14, %v3269_v21, %v3265_v31 }
0x2d80   :  { %v3289_v51 = vmul.f32 %v3270_v62, %v5308_v1 }
0x2db9   :  { %v2302_v52 = vpop.permute.xlu0 %2301 }
0x2dba   :  { %v5365_v5 = vadd.f32 %v2302_v52, %v2287_v38 }
0x2dbb   :  { %v3296_v55 = vpop.permute.xlu2 %3295 }
0x2dbc   :  { %v3300_v10 = vmul.f32 %v3296_v55, %v3285_v22  ;;  %4184 = vtanh.f32 %v5365_v5 }
0x2dbe   :  { %3305 = vrot.lane.b32.xlu0 %v3300_v10, %s4399_s3 }
0x2dc2   :  { %v4185_v33 = vpop.eup %4184 }
0x2dc3   :  { %2313 = vrot.lane.b32.xlu1 %v4185_v33, %s4399_s3 }
0x2dcb   :  { %v3294_v17 = vpop.permute.xlu1 %3293 }
0x2dcc   :  { %v3299_v56 = vmul.f32 %v3294_v17, %v3270_v62 }
0x2dce   :  { %3303 = vrot.lane.b32.xlu2 %v3299_v56, %s4399_s3 }
0x2dd9   :  { %v2304_v34 = vpop.permute.xlu1 %2303 }
0x2dda   :  { %v2308_v61 = vadd.f32 %v2304_v34, %v2288_v19 }
0x2ddc   :  { %4186 = vtanh.f32 %v2308_v61 }
0x2de2   :  { %v4187_v36 = vpop.eup %4186 }
0x2de3   :  { %2315 = vrot.lane.b32.xlu2 %v4187_v36, %s4399_s3 }
0x2e28   :  { %v3304_v41 = vpop.permute.xlu2 %3303 }
0x2e29   :  { %v5375_v50 = vadd.f32 %v3304_v41, %v3289_v51 }
0x2e2b   :  { %4188 = vtanh.f32 %v5375_v50 }
0x2e30   :  { %v3306_v44 = vpop.permute.xlu0 %3305 }
0x2e31   :  { %v4189_v30 = vpop.eup %4188  ;;  %v5379_v48 = vadd.f32 %v3306_v44, %v3290_v46 }
0x2e32   :  { %3315 = vrot.lane.b32.xlu0 %v4189_v30, %s4399_s3 }
0x2e33   :  { %4190 = vtanh.f32 %v5379_v48 }
0x2e35   :  { %v2314_v28 = vpop.permute.xlu1 %2313 }
0x2e36   :  { %v2319_v2 = vmul.f32 %v2314_v28, %v5346_v49 }
0x2e38   :  { %v2321_v1 = vpack.c.bf16 %v2319_v2, %v2319_v2 }
0x2e39   :  { %v4191_v54 = vpop.eup %4190 }
0x2e3a   :  { %3317 = vrot.lane.b32.xlu1 %v4191_v54, %s4399_s3  ;;  %2325 = vrot.lane.b32.xlu2 %v2321_v1, %s4391_s21 }
0x2e3d   :  { %v2316_v29 = vpop.permute.xlu2 %2315 }
0x2e3e   :  { %v5387_v7 = vmul.f32 %v2316_v29, %v5359_v43 }
0x2e40   :  { %v2322_v15 = vpack.c.bf16 %v5387_v7, %v5387_v7 }
0x2e42   :  { %2327 = vrot.lane.b32.xlu0 %v2322_v15, %s4391_s21 }
0x2e94   :  { %v2326_v27 = vpop.permute.xlu2 %2325 }
0x2e95   :  { %2331 = vst.msk [vmem:[#allocation3 + $0x38] sm:$0xf] %vm425_vm4, %v2326_v27 }
0x2ea4   :  { %v3316_v12 = vpop.permute.xlu0 %3315 }
0x2ea5   :  { %v3321_v49 = vmul.f32 %v3316_v12, %v3270_v62 }
0x2ea7   :  { %v5393_v23 = vpack.c.bf16 %v3321_v49, %v3321_v49 }
0x2ea9   :  { %v3338_v20 = vunpack.c.l.b16 %v5393_v23 }
0x2eac   :  { %v3318_v0 = vpop.permute.xlu1 %3317 }
0x2ead   :  { %v3322_v14 = vmul.f32 %v3318_v0, %v3285_v22 }
0x2eaf   :  { %v5395_v53 = vpack.c.bf16 %v3322_v14, %v3322_v14 }
0x2eb1   :  { %v3339_v43 = vunpack.c.l.b16 %v5395_v53 }
0x2eb3   :  { %v3340_v3 = vpack.c.b16 %v3339_v43, %v3338_v20 }
0x2eb4   :  { %v2328_v60 = vpop.permute.xlu0 %2327 }
0x2eb5   :  { %3341 = vrot.lane.b32.xlu1 %v3340_v3, %s4391_s21  ;;  %2332 = vst.msk [vmem:[#allocation3 + $0x3c] sm:$0xf] %vm425_vm4, %v2328_v60 }
0x2ebc   :  { %v3803_v38 = vld [vmem:[#allocation3 + $0x38] sm:$0xff] }
0x2ebd   :  { %3723 = vmatmul.msk.bf16.gmra.mxu1 %vm201_vm0, %v3803_v38 }
0x2f27   :  { %v3342_v26 = vpop.permute.xlu1 %3341 }
0x2f28   :  { %3767 = vmatmul.msk.bf16.vlgmr.msra.gmra.mxu3 %vm201_vm0, %v3342_v26 }
0x2f3a   :  { %v2499_v52 = vpop.f32.mrf.mxu1 }
0x2f3b   :  { %v2500_v55 = vadd.f32 %v5353_v63, %v2499_v52 }
0x2f42   :  { %v2501_v4 = vpop.f32.mrf.mxu1 }
0x2f43   :  { %v2502_v40 = vadd.f32 %v5353_v63, %v2501_v4 }
0x2fab   :  { %v3355_v22 = vpop.f32.mrf.mxu3 }
0x2fac   :  { %v3360_v10 = vadd.f32 %v3355_v22, %v2500_v55 }
0x2fae   :  { %4192 = vtanh.f32 %v3360_v10  ;;  %v3768_v31 = vmul.f32 -1.442695, %v3360_v10 }
0x2fb3   :  { %v3357_v33 = vpop.f32.mrf.mxu3 }
0x2fb4   :  { %v4193_v18 = vpop.eup %4192  ;;  %v3361_v39 = vadd.f32 %v3357_v33, %v2502_v40 }
0x2fb5   :  { %3406 = vrot.lane.b32.xlu2 %v4193_v18, %s4399_s3 }
0x2fb6   :  { %4194 = vtanh.f32 %v3361_v39  ;;  %v3769_v19 = vmul.f32 -1.442695, %v3361_v39 }
0x2fb7   :  { %4196 = vpow2.f32 %v3768_v31 }
0x2fbc   :  { %v4195_v13 = vpop.eup %4194 }
0x2fbd   :  { %3408 = vrot.lane.b32.xlu0 %v4195_v13, %s4399_s3  ;;  %v4197_v63 = vpop.eup %4196 }
0x2fbe   :  { %v3368_v21 = vadd.f32 1.0, %v4197_v63 }
0x2fc0   :  { %4198 = vrcp.f32 %v3368_v21  ;;  %v3381_v51 = vand.u32 2147483648, %v3368_v21  ;;  %vm3375_vm1 = vweird.f32 %v3368_v21 }
0x2fc1   :  { %4200 = vpow2.f32 %v3769_v19 }
0x2fc5   :  { %1228 = vrot.lane.b32.xlu0 %v5299_v9, %s4391_s21  ;;  %v3379_v9 = vand.u32 2147483647, %v3368_v21 }
0x2fc6   :  { %v4199_v17 = vpop.eup %4198 }
0x2fc7   :  { %v3371_v62 = vmul.f32 %v4199_v17, %v3368_v21  ;;  %vm3376_vm15 = vweird.f32 %v4199_v17  ;;  %v4201_v41 = vpop.eup %4200  ;;  %vm3380_vm3 = vcmp.eq.f32.partialorder %v3379_v9, 8.507059e+37 }
0x2fc8   :  { %vm3377_vm2 = vmor %vm3375_vm1, %vm3376_vm15  ;;  %v3369_v44 = vadd.f32 1.0, %v4201_v41 }
0x2fc9   :  { %v3372_v56 = vsub.f32 1.0, %v3371_v62 }
0x2fca   :  { %4202 = vrcp.f32 %v3369_v44  ;;  %v3396_v12 = vand.u32 2147483648, %v3369_v44  ;;  %vm3390_vm6 = vweird.f32 %v3369_v44  ;;  %v3394_v49 = vand.u32 2147483647, %v3369_v44 }
0x2fcb   :  { %v3373_v34 = vmul.f32 %v4199_v17, %v3372_v56 }
0x2fcc   :  { %v3397_v14 = vor.u32 1.1754944e-38, %v3396_v12  ;;  %vm3395_vm8 = vcmp.eq.f32.partialorder %v3394_v49, 8.507059e+37 }
0x2fcd   :  { %2335 = vrot.lane.b32.xlu0 %v2319_v2, %s4391_s21  ;;  %v3374_v36 = vadd.f32 %v4199_v17, %v3373_v34 }
0x2fcf   :  { %v3378_v46 = vsel %vm3377_vm2, %v4199_v17, %v3374_v36 }
0x2fd0   :  { %v4203_v54 = vpop.eup %4202 }
0x2fd1   :  { %v3386_v1 = vmul.f32 %v4203_v54, %v3369_v44  ;;  %vm3391_vm5 = vweird.f32 %v4203_v54 }
0x2fd2   :  { %vm3392_vm7 = vmor %vm3390_vm6, %vm3391_vm5 }
0x2fd3   :  { %v3387_v29 = vsub.f32 1.0, %v3386_v1 }
0x2fd5   :  { %2348 = vrot.lane.b32.xlu0 %v2308_v61, %s4400_s11  ;;  %v3382_v61 = vor.u32 1.1754944e-38, %v3381_v51  ;;  %v3388_v15 = vmul.f32 %v4203_v54, %v3387_v29 }
0x2fd7   :  { %v5411_v28 = vsel %vm3380_vm3, %v3382_v61, %v3378_v46  ;;  %v3389_v27 = vadd.f32 %v4203_v54, %v3388_v15 }
0x2fd9   :  { %v3393_v0 = vsel %vm3392_vm7, %v4203_v54, %v3389_v27 }
0x300f   :  { %v3407_v30 = vpop.permute.xlu2 %3406 }
0x3010   :  { %v3412_v2 = vmul.f32 %v3407_v30, %v5411_v28 }
0x3012   :  { %3416 = vrot.lane.b32.xlu1 %v3412_v2, %s4399_s3 }
0x301a   :  { %1230 = vrot.lane.b32.xlu1 %v5313_v37, %s4391_s21  ;;  %v5421_v37 = vsel %vm3395_vm8, %v3397_v14, %v3393_v0 }
0x3022   :  { %2337 = vrot.lane.b32.xlu1 %v5387_v7, %s4391_s21 }
0x302a   :  { %2650 = vrot.lane.b32.xlu1 %v5131_v35, %s4391_s21 }
0x302f   :  { %v3409_v20 = vpop.permute.xlu0 %3408 }
0x3030   :  { %v3413_v43 = vmul.f32 %v3409_v20, %v5421_v37 }
0x3032   :  { %3418 = vrot.lane.b32.xlu2 %v3413_v43, %s4399_s3 }
0x3037   :  { %v1229_v7 = vpop.permute.xlu0 %1228 }
0x3038   :  { %1234 = vst.msk [vmem:[#allocation13] sm:$0xff] %vm201_vm0, %v1229_v7 }
0x303a   :  { %1238 = vrot.lane.b32.xlu2 %v5284_v59, %s4400_s11  ;;  %v3402_v59 = vmul.f32 %v5411_v28, %v5375_v50 }
0x303f   :  { %v2336_v35 = vpop.permute.xlu0 %2335 }
0x3040   :  { %2342 = vst.msk [vmem:[#allocation13 + $0x10] sm:$0xff] %vm201_vm0, %v2336_v35 }
0x3042   :  { %1240 = vrot.lane.b32.xlu2 %v5294_v16, %s4400_s11  ;;  %v3403_v16 = vmul.f32 %v5421_v37, %v5379_v48 }
0x3047   :  { %v2349_v3 = vpop.permute.xlu0 %2348 }
0x3048   :  { %2354 = vst.msk [vmem:[#allocation14 + $0x18] sm:$0xff] %vm201_vm0, %v2349_v3 }
0x304a   :  { %2346 = vrot.lane.b32.xlu2 %v5365_v5, %s4400_s11 }
0x3052   :  { %2652 = vrot.lane.b32.xlu2 %v5129_v32, %s4391_s21 }
0x305a   :  { %2875 = vrot.lane.b32.xlu2 %v5195_v58, %s4391_s21 }
0x3084   :  { %v3417_v60 = vpop.permute.xlu1 %3416 }
0x3085   :  { %v3422_v38 = vadd.f32 %v3417_v60, %v3402_v59 }
0x3087   :  { %4204 = vtanh.f32 %v3422_v38 }
0x308c   :  { %v1231_v26 = vpop.permute.xlu1 %1230  ;;  %v3419_v52 = vpop.permute.xlu2 %3418 }
0x308d   :  { %v4205_v55 = vpop.eup %4204  ;;  %1235 = vst.msk [vmem:[#allocation13 + $0x8] sm:$0xff] %vm201_vm0, %v1231_v26  ;;  %v3423_v5 = vadd.f32 %v3419_v52, %v3403_v16 }
0x308e   :  { %3428 = vrot.lane.b32.xlu0 %v4205_v55, %s4399_s3 }
0x308f   :  { %4206 = vtanh.f32 %v3423_v5  ;;  %3464 = vrot.lane.b32.xlu2 %v3423_v5, %s4400_s11 }
0x3094   :  { %v2338_v32 = vpop.permute.xlu1 %2337  ;;  %v1239_v58 = vpop.permute.xlu2 %1238 }
0x3095   :  { %v4207_v50 = vpop.eup %4206  ;;  %2343 = vst.msk [vmem:[#allocation13 + $0x18] sm:$0xff] %vm201_vm0, %v2338_v32 }
0x3096   :  { %1244 = vst.msk [vmem:[#allocation14] sm:$0xff] %vm201_vm0, %v1239_v58  ;;  %2762 = vrot.lane.b32.xlu0 %v5162_v57, %s4391_s21  ;;  %3430 = vrot.lane.b32.xlu1 %v4207_v50, %s4399_s3 }
0x3097   :  { %3103 = vrot.lane.b32.xlu2 %v5269_v45, %s4391_s21 }
0x309c   :  { %v2651_v48 = vpop.permute.xlu1 %2650  ;;  %v1241_v22 = vpop.permute.xlu2 %1240 }
0x309d   :  { %2656 = vst.msk [vmem:[%s5571_s12] sm:$0xf] %vm425_vm4, %v2651_v48 }
0x309e   :  { %1245 = vst.msk [vmem:[#allocation14 + $0x8] sm:$0xff] %vm201_vm0, %v1241_v22  ;;  %2877 = vrot.lane.b32.xlu0 %v5198_v47, %s4391_s21  ;;  %2764 = vrot.lane.b32.xlu1 %v5165_v8, %s4391_s21 }
0x309f   :  { %3327 = vrot.lane.b32.xlu2 %v5393_v23, %s4391_s21 }
0x30a4   :  { %v2347_v57 = vpop.permute.xlu2 %2346 }
0x30a5   :  { %2353 = vst.msk [vmem:[#allocation14 + $0x10] sm:$0xff] %vm201_vm0, %v2347_v57 }
0x30a6   :  { %2990 = vrot.lane.b32.xlu0 %v5229_v6, %s4391_s21  ;;  %2988 = vrot.lane.b32.xlu1 %v5226_v42, %s4391_s21 }
0x30ac   :  { %v2653_v45 = vpop.permute.xlu2 %2652 }
0x30ad   :  { %2657 = vst.msk [vmem:[%s5571_s12 + $0x4] sm:$0xf] %vm425_vm4, %v2653_v45 }
0x30ae   :  { %3214 = vrot.lane.b32.xlu0 %v5327_v25, %s4391_s21  ;;  %3462 = vrot.lane.b32.xlu1 %v3422_v38, %s4400_s11  ;;  %s3492_s11 = sshll.u32 %s5573_s14, 4  ;;  %s3493_s11 = int_to_ptr.hbm [resolvable:$true] %s3492_s11 }
0x30b4   :  { %v2876_v8 = vpop.permute.xlu2 %2875 }
0x30b5   :  { %3745 = vst.msk [vmem:[%s5571_s12 + $0x10] sm:$0xf] %vm425_vm4, %v2876_v8 }
0x30b6   :  { %3101 = vrot.lane.b32.xlu1 %v5266_v11, %s4391_s21 }
0x30be   :  { %3216 = vrot.lane.b32.xlu1 %v5329_v24, %s4391_s21 }
0x30e9   :  { %v3465_v47 = vpop.permute.xlu2 %3464 }
0x30ea   :  { %3470 = vst.msk [vmem:[#allocation14 + $0x28] sm:$0xff] %vm201_vm0, %v3465_v47 }
0x30f1   :  { %v3104_v42 = vpop.permute.xlu2 %3103 }
0x30f2   :  { %3756 = vst.msk [vmem:[%s5571_s12 + $0x24] sm:$0xf] %vm425_vm4, %v3104_v42 }
0x30f9   :  { %v3328_v6 = vpop.permute.xlu2 %3327 }
0x30fa   :  { %3765 = vst.msk [vmem:[%s5571_s12 + $0x30] sm:$0xf] %vm425_vm4, %v3328_v6 }
0x3100   :  { %v3429_v25 = vpop.permute.xlu0 %3428 }
0x3101   :  { %v3434_v11 = vmul.f32 %v3429_v25, %v5411_v28 }
0x3103   :  { %v3436_v23 = vpack.c.bf16 %v3434_v11, %v3434_v11  ;;  %3451 = vrot.lane.b32.xlu2 %v3434_v11, %s4391_s21 }
0x3105   :  { %3440 = vrot.lane.b32.xlu1 %v3436_v23, %s4391_s21 }
0x3108   :  { %v2763_v24 = vpop.permute.xlu0 %2762  ;;  %v3431_v10 = vpop.permute.xlu1 %3430 }
0x3109   :  { %3740 = vst.msk [vmem:[%s5571_s12 + $0x8] sm:$0xf] %vm425_vm4, %v2763_v24  ;;  %v3435_v4 = vmul.f32 %v3431_v10, %v5421_v37 }
0x310b   :  { %v3437_v40 = vpack.c.bf16 %v3435_v4, %v3435_v4  ;;  %3453 = vrot.lane.b32.xlu0 %v3435_v4, %s4391_s21 }
0x310d   :  { %3442 = vrot.lane.b32.xlu2 %v3437_v40, %s4391_s21 }
0x3110   :  { %v2878_v33 = vpop.permute.xlu0 %2877  ;;  %v2765_v18 = vpop.permute.xlu1 %2764 }
0x3111   :  { %3746 = vst.msk [vmem:[%s5571_s12 + $0x14] sm:$0xf] %vm425_vm4, %v2878_v33 }
0x3112   :  { %3741 = vst.msk [vmem:[%s5571_s12 + $0xc] sm:$0xf] %vm425_vm4, %v2765_v18 }
0x3113   :  { %3329 = vrot.lane.b32.xlu0 %v5395_v53, %s4391_s21 }
0x3118   :  { %v2991_v39 = vpop.permute.xlu0 %2990  ;;  %v2989_v13 = vpop.permute.xlu1 %2988 }
0x3119   :  { %3751 = vst.msk [vmem:[%s5571_s12 + $0x1c] sm:$0xf] %vm425_vm4, %v2991_v39 }
0x311a   :  { %3750 = vst.msk [vmem:[%s5571_s12 + $0x18] sm:$0xf] %vm425_vm4, %v2989_v13 }
0x3120   :  { %v3215_v31 = vpop.permute.xlu0 %3214  ;;  %v3463_v53 = vpop.permute.xlu1 %3462 }
0x3121   :  { %3760 = vst.msk [vmem:[%s5571_s12 + $0x28] sm:$0xf] %vm425_vm4, %v3215_v31 }
0x3122   :  { %3469 = vst.msk [vmem:[#allocation14 + $0x20] sm:$0xff] %vm201_vm0, %v3463_v53 }
0x3123   :  { %3498 = dma.vmem_to_hbm [thread:$0]  %s3491_s9, 768, %s3493_s11, [#allocation15], %s4395_s15, %s4395_s15, %s4396_s16  }
0x3128   :  { %v3102_v63 = vpop.permute.xlu1 %3101 }
0x3129   :  { %3755 = vst.msk [vmem:[%s5571_s12 + $0x20] sm:$0xf] %vm425_vm4, %v3102_v63 }
0x3130   :  { %v3217_v21 = vpop.permute.xlu1 %3216 }
0x3131   :  { %3761 = vst.msk [vmem:[%s5571_s12 + $0x2c] sm:$0xf] %vm425_vm4, %v3217_v21 }
0x315d   :  { %v3452_v17 = vpop.permute.xlu2 %3451 }
0x315e   :  { %3458 = vst.msk [vmem:[#allocation13 + $0x20] sm:$0xff] %vm201_vm0, %v3452_v17 }
0x3167   :  { %v3443_v62 = vpop.permute.xlu2 %3442 }
0x3168   :  { %3771 = vst.msk [vmem:[%s5571_s12 + $0x3c] sm:$0xf] %vm425_vm4, %v3443_v62 }
0x3177   :  { %v3441_v56 = vpop.permute.xlu1 %3440 }
0x3178   :  { %3770 = vst.msk [vmem:[%s5571_s12 + $0x38] sm:$0xf] %vm425_vm4, %v3441_v56 }
0x317d   :  { %v3454_v19 = vpop.permute.xlu0 %3453 }
0x317e   :  { %3459 = vst.msk [vmem:[#allocation13 + $0x28] sm:$0xff] %vm201_vm0, %v3454_v19 }
0x317f   :  { %3485 = dma.vmem_to_hbm [thread:$0]  %s3478_s19, 768, %s3480_s5, [#allocation6], %s4395_s15, %s4395_s15, %s4396_s16  }
0x3185   :  { %v3330_v34 = vpop.permute.xlu0 %3329 }
0x3186   :  { %3766 = vst.msk [vmem:[%s5571_s12 + $0x34] sm:$0xf] %vm425_vm4, %v3330_v34 }
0x3187   :  { %4386 = dma.done.wait [#allocation6], 768  }
0x3188   :  { %4387 = vsyncadd [#allocation6], 4294966528 }
0x3189   :  { %4388 = dma.done.wait [#allocation15], 768  }
0x318a   :  { %4389 = vsyncadd [#allocation15], 4294966528 }
0x318b   :  { %3509 = vsyncpa [#allocation5], 1 }
0x318c   :  { %3510 = vsyncpa [#allocation8], 1 }
0x318d   :  { %3511 = vsyncpa [#allocation11], 1 }
0x318e   :  { %3512 = vsyncpa [#allocation6], 1 }
0x318f   :  { %3513 = vsyncpa [#allocation15], 1 }

</bundles_post_ra>
